<compile_context>
chip_gen: v7x
topology: tpu7x:2x2x1
jax: 0.10.0
libtpu: 0.0.40
codegen_flags: <defaults>
</compile_context>

<pallas_src>
import functools
import math

import jax
import jax.numpy as jnp
from jax import lax
from jax.experimental import pallas as pl
from jax.experimental.pallas import tpu as pltpu


MATMUL_DTYPE = jnp.bfloat16       # MXU operand dtype (f32 accumulation everywhere)
ACT_DTYPE = jnp.bfloat16          # inter-kernel activations (only used as MXU operands)
VMEM_LIMIT = 48 * 1024 * 1024     # explicit scoped-VMEM cap (v5e default 16 MiB; v7x phys 64 MiB)
EPS = 1e-5


def _gelu(x):
    # exact (erf) gelu == torch.nn.functional.gelu default; kept exact for parity.
    return 0.5 * x * (1.0 + lax.erf(x * 0.7071067811865476))


def _compiler_params(grid_rank):
    return pltpu.CompilerParams(
        dimension_semantics=("parallel",) * grid_rank,
        vmem_limit_bytes=VMEM_LIMIT)


def _make_group_pool(c, groups):
    """(C,C) block matrix: 1 where channels share a group (layout c*G + g)."""
    gid = jnp.arange(c) // groups
    return (gid[:, None] == gid[None, :]).astype(jnp.float32)


def _pick_hw_tile(hw, max_tile=2048):
    """Largest divisor of hw that is a multiple of 128 and <= max_tile."""
    if hw <= max_tile:
        return hw
    for t in range(max_tile, 127, -128):
        if hw % t == 0:
            return t
    return hw


# ---------------------------------------------------------------------------
# In-kernel helpers
# ---------------------------------------------------------------------------
def _apply_norm(x, pool, groups, eps):
    """groups == 1: nn.InstanceNorm2d (affine=False) per channel over H*W.
    groups == G : GNorm = instance norm over (group, H, W) per base channel.
    Stats are computed by reducing over the lane (H*W) axis FIRST and then
    group-pooling the tiny (C,1) column with the hoisted pool matrix."""
    hw = x.shape[-1]
    inv_n = 1.0 / float(groups * hw)
    s = jnp.sum(x, axis=-1, keepdims=True)                       # (C,1)
    if groups > 1:
        s = jnp.dot(pool, s, preferred_element_type=jnp.float32)  # group sum, broadcast
    mean = s * inv_n
    d = x - mean
    ss = jnp.sum(d * d, axis=-1, keepdims=True)                  # (C,1)
    if groups > 1:
        ss = jnp.dot(pool, ss, preferred_element_type=jnp.float32)
    var = ss * inv_n
    return d * lax.rsqrt(var + eps)


# ---------------------------------------------------------------------------
# Pallas kernels
# ---------------------------------------------------------------------------
def _lift_kernel(x_ref, w_ref, b_ref, pool_ref, o_ref, onorm_ref, *, groups, eps):
    """Lifting GConv2d (1x1): matmul + bias; emits bf16 activation AND the f32
    GNorm of it (layer-0 spectral-conv input) in one pass."""
    w = w_ref[...]
    y = jnp.dot(w, x_ref[0].astype(w.dtype),
                preferred_element_type=jnp.float32) + b_ref[...]
    o_ref[0, :, :] = y.astype(o_ref.dtype)
    onorm_ref[0, :, :] = _apply_norm(y, pool_ref[...], groups, eps)


def lift_conv(x, w, b, pool, *, groups, eps=EPS):
    bsz, cin, hw = x.shape
    cout = w.shape[0]
    return pl.pallas_call(
        functools.partial(_lift_kernel, groups=groups, eps=eps),
        out_shape=(jax.ShapeDtypeStruct((bsz, cout, hw), ACT_DTYPE),
                   jax.ShapeDtypeStruct((bsz, cout, hw), jnp.float32)),
        grid=(bsz,),
        in_specs=[pl.BlockSpec((1, cin, hw), lambda i: (i, 0, 0)),
                  pl.BlockSpec((cout, cin), lambda i: (0, 0)),
                  pl.BlockSpec((cout, 1), lambda i: (0, 0)),
                  pl.BlockSpec(pool.shape, lambda i: (0, 0))],
        out_specs=(pl.BlockSpec((1, cout, hw), lambda i: (i, 0, 0)),
                   pl.BlockSpec((1, cout, hw), lambda i: (i, 0, 0))),
        compiler_params=_compiler_params(1),
    )(x, w, b, pool)


def _fno_layer_kernel(x1_ref, x_ref, pool1_ref, pool2_ref, m1w_ref, m1b_ref,
                      m2w_ref, m2b_ref, ww_ref, wb_ref, o_ref, *onorm_refs,
                      groups, next_groups, eps, activation):
    """One Fourier layer tail, fully fused:
       norm(spectral out) -> mlp1 -> gelu -> mlp2 -> + W-branch 1x1(x) -> (gelu)
       plus (except last layer) the norm of the result for the next rfft2."""
    m1w, m2w, ww = m1w_ref[...], m2w_ref[...], ww_ref[...]
    dt = m1w.dtype
    pool1 = pool1_ref[...] if groups > 1 else None
    # spectral branch: norm -> mlp1 -> gelu -> mlp2 (intermediates stay in VMEM)
    x1n = _apply_norm(x1_ref[0], pool1, groups, eps)
    h = jnp.dot(m1w, x1n.astype(dt), preferred_element_type=jnp.float32)
    h = _gelu(h + m1b_ref[...])
    y1 = jnp.dot(m2w, h.astype(dt), preferred_element_type=jnp.float32) + m2b_ref[...]
    # W branch: 1x1 conv on the (bf16) layer input, fused residual add (+ gelu)
    y2 = jnp.dot(ww, x_ref[0].astype(dt), preferred_element_type=jnp.float32) + wb_ref[...]
    y = y1 + y2
    if activation == "gelu":
        y = _gelu(y)
    o_ref[0, :, :] = y.astype(o_ref.dtype)
    if next_groups is not None:
        pool2 = pool2_ref[...] if next_groups > 1 else None
        onorm_refs[0][0, :, :] = _apply_norm(y, pool2, next_groups, eps)


def fno_layer(x1, x, pool1, pool2, m1w, m1b, m2w, m2b, ww, wb, *,
              groups, next_groups, activation, eps=EPS):
    bsz, c1, hw = x1.shape
    cin = x.shape[1]
    cmid = m1w.shape[0]
    cout = m2w.shape[0]
    emit_norm = next_groups is not None
    y_shape = jax.ShapeDtypeStruct((bsz, cout, hw), ACT_DTYPE)
    y_spec = pl.BlockSpec((1, cout, hw), lambda i: (i, 0, 0))
    if emit_norm:
        out_shape = (y_shape, jax.ShapeDtypeStruct((bsz, cout, hw), jnp.float32))
        out_specs = (y_spec, pl.BlockSpec((1, cout, hw), lambda i: (i, 0, 0)))
    else:
        out_shape = y_shape
        out_specs = y_spec
    return pl.pallas_call(
        functools.partial(_fno_layer_kernel, groups=groups, next_groups=next_groups,
                          eps=eps, activation=activation),
        out_shape=out_shape,
        grid=(bsz,),
        in_specs=[pl.BlockSpec((1, c1, hw), lambda i: (i, 0, 0)),
                  pl.BlockSpec((1, cin, hw), lambda i: (i, 0, 0)),
                  pl.BlockSpec(pool1.shape, lambda i: (0, 0)),
                  pl.BlockSpec(pool2.shape, lambda i: (0, 0)),
                  pl.BlockSpec((cmid, c1), lambda i: (0, 0)),
                  pl.BlockSpec((cmid, 1), lambda i: (0, 0)),
                  pl.BlockSpec((cout, cmid), lambda i: (0, 0)),
                  pl.BlockSpec((cout, 1), lambda i: (0, 0)),
                  pl.BlockSpec((cout, cin), lambda i: (0, 0)),
                  pl.BlockSpec((cout, 1), lambda i: (0, 0))],
        out_specs=out_specs,
        compiler_params=_compiler_params(1),
    )(x1, x, pool1, pool2, m1w, m1b, m2w, m2b, ww, wb)


def _qhead_kernel(x_ref, w1_ref, b1_ref, w2_ref, b2_ref, o_ref):
    w1, w2 = w1_ref[...], w2_ref[...]
    dt = w1.dtype
    h = jnp.dot(w1, x_ref[0].astype(dt), preferred_element_type=jnp.float32)
    h = _gelu(h + b1_ref[...])
    o_ref[0, :, :] = (jnp.dot(w2, h.astype(dt),
                              preferred_element_type=jnp.float32) + b2_ref[...])


def q_head(x, w1, b1, w2, b2):
    """Fused q = MLP2d(width -> 4*width(gelu) -> num_channels); matmul-only so
    the lane (H*W) axis is tiled (extra parallel grid blocks, bounded VMEM)."""
    bsz, cin, hw = x.shape
    cmid = w1.shape[0]
    cout = w2.shape[0]
    hwt = _pick_hw_tile(hw)
    return pl.pallas_call(
        _qhead_kernel,
        out_shape=jax.ShapeDtypeStruct((bsz, cout, hw), jnp.float32),
        grid=(bsz, hw // hwt),
        in_specs=[pl.BlockSpec((1, cin, hwt), lambda i, j: (i, 0, j)),
                  pl.BlockSpec((cmid, cin), lambda i, j: (0, 0)),
                  pl.BlockSpec((cmid, 1), lambda i, j: (0, 0)),
                  pl.BlockSpec((cout, cmid), lambda i, j: (0, 0)),
                  pl.BlockSpec((cout, 1), lambda i, j: (0, 0))],
        out_specs=pl.BlockSpec((1, cout, hwt), lambda i, j: (i, 0, j)),
        compiler_params=_compiler_params(2),
    )(x, w1, b1, w2, b2)


# ---------------------------------------------------------------------------
# Spectral conv (FFT + retained-mode complex channel mix) -- XLA glue
# ---------------------------------------------------------------------------
def spectral_conv2d(x_bchw, w_complex, modes):
    """rfft2 -> low-mode complex channel mix (complex64 einsum) -> irfft2.
    x:(B,Cin,H,W) f32, w_complex:(M=2*modes*modes, Cin, Cout) complex64."""
    b, c, h, w = x_bchw.shape
    assert h >= 2 * modes and (w // 2 + 1) >= modes, "retained modes overlap the spectrum"
    cout = w_complex.shape[-1]
    x_ft = jnp.fft.rfft2(x_bchw, axes=(2, 3))                     # (B,C,H,Wr) c64
    top = x_ft[:, :, :modes, :modes]
    bot = x_ft[:, :, h - modes:, :modes]
    blk = jnp.concatenate([top, bot], axis=2).reshape(b, c, 2 * modes * modes)
    out = jnp.einsum("bcm,mco->bom", blk, w_complex)              # (B,Cout,M) c64
    out = out.reshape(b, cout, 2 * modes, modes)
    out_ft = jnp.zeros((b, cout, h, w // 2 + 1), dtype=jnp.complex64)
    out_ft = out_ft.at[:, :, :modes, :modes].set(out[:, :, :modes])
    out_ft = out_ft.at[:, :, h - modes:, :modes].set(out[:, :, modes:])
    y = jnp.fft.irfft2(out_ft, s=(h, w), axes=(2, 3))
    return y.astype(jnp.float32)


# ---------------------------------------------------------------------------
# Effective-weight construction (hoisted out of the forward)
# ---------------------------------------------------------------------------
def _rot_perm(g):
    s = jnp.arange(g)
    r = jnp.arange(g)
    return (s[None, :] - r[:, None]) % g          # perm[g, s] = g^{-1} * s (C4)


def gconv1x1_effective(w, b, g):
    """w:(out,in,G), b:(out,) -> channels-first dense (out*G, in*G) matrix
    with row index o*G + g_out, column index i*G + g_in."""
    out_ch, in_ch, _ = w.shape
    perm = _rot_perm(g)
    w_g = w[:, :, perm]                            # (o, i, g_out, g_in)
    weff = jnp.transpose(w_g, (0, 2, 1, 3)).reshape(out_ch * g, in_ch * g)
    beff = jnp.repeat(b, g)
    return weff, beff


def gspectral_effective(w, g):
    """w:(in,G,out,M) -> (M, in*G, out*G) effective spectral weights."""
    in_ch, _, out_ch, m = w.shape
    perm = _rot_perm(g)
    w_g = w[:, perm, :, :]                         # (i, g_out, g_in, o, M)
    return jnp.transpose(w_g, (4, 0, 2, 3, 1)).reshape(m, in_ch * g, out_ch * g)


# ---------------------------------------------------------------------------
# Parameter init + one-time "prepare"
# ---------------------------------------------------------------------------
def init_ghybrid2d(key, *, num_channels, modes, Gwidth, width, initial_step,
                   reflection, n_equiv):
    assert reflection == 0, "reflection group not implemented"
    assert n_equiv in (1, 2, 3)
    G = 4 * (1 + reflection)
    cin0 = num_channels * initial_step + 1
    keys = iter(jax.random.split(key, 128))

    def u(shape, fan_in):
        bound = 1.0 / math.sqrt(fan_in)
        return jax.random.uniform(next(keys), shape, jnp.float32, -bound, bound)

    M = 2 * modes * modes
    p = dict(G=G, modes=modes, Gwidth=Gwidth, width=width,
             num_channels=num_channels, n_equiv=n_equiv)
    # lifting GConv2d(cin0 -> Gwidth, k=1, first_layer=True)
    p["p_w"] = u((Gwidth, cin0), cin0)
    p["p_b"] = u((Gwidth,), cin0)

    layers = []
    for layer in range(4):
        lp = {}
        if layer < n_equiv:
            scale = 1.0 / (Gwidth * Gwidth)
            lp["spec_wr"] = scale * jax.random.uniform(next(keys), (Gwidth, G, Gwidth, M), jnp.float32)
            lp["spec_wi"] = scale * jax.random.uniform(next(keys), (Gwidth, G, Gwidth, M), jnp.float32)
            lp["mlp1_w"], lp["mlp1_b"] = u((Gwidth, Gwidth, G), Gwidth * G), u((Gwidth,), Gwidth * G)
            lp["mlp2_w"], lp["mlp2_b"] = u((Gwidth, Gwidth, G), Gwidth * G), u((Gwidth,), Gwidth * G)
            lp["w_w"], lp["w_b"] = u((Gwidth, Gwidth, G), Gwidth * G), u((Gwidth,), Gwidth * G)
        else:
            in_w = Gwidth * G if layer == n_equiv else width
            scale = 1.0 / (in_w * width)
            lp["spec_wr"] = scale * jax.random.uniform(next(keys), (M, in_w, width), jnp.float32)
            lp["spec_wi"] = scale * jax.random.uniform(next(keys), (M, in_w, width), jnp.float32)
            lp["mlp1_w"], lp["mlp1_b"] = u((width, width), width), u((width,), width)
            lp["mlp2_w"], lp["mlp2_b"] = u((width, width), width), u((width,), width)
            lp["w_w"], lp["w_b"] = u((in_w, width), in_w), u((width,), in_w)
        layers.append(lp)
    p["layers"] = layers

    # q = MLP2d(width, num_channels, width * 4)
    p["q1_w"], p["q1_b"] = u((width, 4 * width), width), u((4 * width,), width)
    p["q2_w"], p["q2_b"] = u((4 * width, num_channels), 4 * width), u((num_channels,), 4 * width)
    return p


def prepare_ghybrid2d(p):
    """Build all effective channels-first weights ONCE: bf16 matmul weights,
    (C,1) f32 bias columns, complex64 spectral weights, hoisted pool matrix."""
    G = p["G"]
    wd = MATMUL_DTYPE

    def wcast(w):
        return w.astype(wd)

    def bcol(b):
        return b.astype(jnp.float32)[:, None]

    prep = dict(G=G, modes=p["modes"], Gwidth=p["Gwidth"], width=p["width"],
                n_equiv=p["n_equiv"], num_channels=p["num_channels"])
    # lifting GConv2d: 1x1 kernel is rotation invariant -> replicate over group
    prep["p_w"] = wcast(jnp.repeat(p["p_w"], G, axis=0))       # (Gwidth*G, cin0)
    prep["p_b"] = bcol(jnp.repeat(p["p_b"], G))
    prep["pool_g"] = _make_group_pool(p["Gwidth"] * G, G)      # hoisted GNorm pool

    layers = []
    for layer, lp in enumerate(p["layers"]):
        d = {}
        if layer < p["n_equiv"]:
            swr = gspectral_effective(lp["spec_wr"], G)
            swi = gspectral_effective(lp["spec_wi"], G)
            m1w, m1b = gconv1x1_effective(lp["mlp1_w"], lp["mlp1_b"], G)
            m2w, m2b = gconv1x1_effective(lp["mlp2_w"], lp["mlp2_b"], G)
            ww, wb = gconv1x1_effective(lp["w_w"], lp["w_b"], G)
        else:
            swr, swi = lp["spec_wr"], lp["spec_wi"]
            m1w, m1b = lp["mlp1_w"].T, lp["mlp1_b"]
            m2w, m2b = lp["mlp2_w"].T, lp["mlp2_b"]
            ww, wb = lp["w_w"].T, lp["w_b"]
        d["spec_w"] = (swr + 1j * swi).astype(jnp.complex64)   # full-precision spectral mix
        d["mlp1_w"], d["mlp1_b"] = wcast(m1w), bcol(m1b)
        d["mlp2_w"], d["mlp2_b"] = wcast(m2w), bcol(m2b)
        d["w_w"], d["w_b"] = wcast(ww), bcol(wb)
        layers.append(d)
    prep["layers"] = layers
    prep["q1_w"], prep["q1_b"] = wcast(p["q1_w"].T), bcol(p["q1_b"])
    prep["q2_w"], prep["q2_b"] = wcast(p["q2_w"].T), bcol(p["q2_b"])
    return prep


# ---------------------------------------------------------------------------
# Forward
# ---------------------------------------------------------------------------
def ghybrid2d_forward(prep, x):
    G, modes, n_equiv = prep["G"], prep["modes"], prep["n_equiv"]
    B, H, Wsp = x.shape[0], x.shape[1], x.shape[2]
    HW = H * Wsp
    x = x.reshape(B, H, Wsp, -1)

    # get_grid: (x-0.5)^2 + (y-0.5)^2 appended as an extra channel
    gx = jnp.linspace(0.0, 1.0, H).reshape(1, H, 1, 1)
    gy = jnp.linspace(0.0, 1.0, Wsp).reshape(1, 1, Wsp, 1)
    grid = jnp.broadcast_to((gx - 0.5) ** 2 + (gy - 0.5) ** 2, (B, H, Wsp, 1))
    x = jnp.concatenate([x, grid.astype(x.dtype)], axis=-1)
    # channels-first, spatial flattened -> (B, C0, H*W)  (lane axis = H*W)
    x = jnp.transpose(x, (0, 3, 1, 2)).reshape(B, -1, HW).astype(jnp.float32)

    dummy_pool = jnp.zeros((1, 1), jnp.float32)
    pool_g = prep["pool_g"]

    # lifting GConv2d; also emits GNorm(x) for the layer-0 spectral conv
    x, xn = lift_conv(x, prep["p_w"], prep["p_b"], pool_g, groups=G)

    for layer in range(4):
        lp = prep["layers"][layer]
        groups = G if layer < n_equiv else 1                    # GNorm vs InstanceNorm
        next_groups = (G if (layer + 1) < n_equiv else 1) if layer < 3 else None
        c_in = xn.shape[1]
        x1 = spectral_conv2d(xn.reshape(B, c_in, H, Wsp), lp["spec_w"], modes)
        x1 = x1.reshape(B, x1.shape[1], HW)
        pool1 = pool_g if groups > 1 else dummy_pool
        pool2 = pool_g if (next_groups is not None and next_groups > 1) else dummy_pool
        # fused: norm(x1) -> mlp1(gelu) -> mlp2 -> + W-branch 1x1(x) -> (gelu)
        #        [+ norm of result for next layer's FFT, except after layer 3]
        outs = fno_layer(x1, x, pool1, pool2,
                         lp["mlp1_w"], lp["mlp1_b"], lp["mlp2_w"], lp["mlp2_b"],
                         lp["w_w"], lp["w_b"],
                         groups=groups, next_groups=next_groups,
                         activation="gelu" if layer < 3 else None)
        if next_groups is not None:
            x, xn = outs
        else:
            x = outs

    # q head: MLP2d(width -> 4*width -> num_channels), fused + HW-tiled
    y = q_head(x, prep["q1_w"], prep["q1_b"], prep["q2_w"], prep["q2_b"])
    y = jnp.transpose(y.reshape(B, y.shape[1], H, Wsp), (0, 2, 3, 1))
    return y[:, :, :, None, :]                                  # (B, H, W, 1, num_channels)


if __name__ == "__main__":
    key = jax.random.PRNGKey(0)
    num_channels, initial_step = 1, 3
    modes, Gwidth, width = 4, 8, 32
    reflection, n_equiv = 0, 2
    B, H, W = 2, 16, 16

    pkey, xkey = jax.random.split(key)
    params = init_ghybrid2d(pkey, num_channels=num_channels, modes=modes,
                            Gwidth=Gwidth, width=width, initial_step=initial_step,
                            reflection=reflection, n_equiv=n_equiv)
    prep = prepare_ghybrid2d(params)   # effective weights / pools built once

    # input: (batch, x, y, t=initial_step, channels)
    x = jax.random.normal(xkey, (B, H, W, initial_step, num_channels), jnp.float32)

    fwd = jax.jit(lambda inp: ghybrid2d_forward(prep, inp))
    out = fwd(x)
    jax.block_until_ready(out)
    assert out.shape == (B, H, W, 1, num_channels), out.shape
    assert bool(jnp.all(jnp.isfinite(out)))
    print("KERNEL_OK")
</pallas_src>

<mosaic_0001>
module attributes {stable_mosaic.version = 11 : i64} {
  func.func @_lift_kernel(%arg0: i32, %arg1: memref<1x4x256xf32, #tpu.memory_space<vmem>>, %arg2: memref<32x4xbf16, #tpu.memory_space<vmem>>, %arg3: memref<32x1xf32, #tpu.memory_space<vmem>>, %arg4: memref<32x32xf32, #tpu.memory_space<vmem>>, %arg5: memref<1x32x256xbf16, #tpu.memory_space<vmem>>, %arg6: memref<1x32x256xf32, #tpu.memory_space<vmem>>) attributes {dimension_semantics = [#tpu.dimension_semantics<parallel>], iteration_bounds = array<i64: 2>, scalar_prefetch = 0 : i64, scratch_operands = 0 : i64, tpu.core_type = #tpu.core_type<tc>, window_params = [{transform_indices = @transform_0, window_bounds = array<i64: 1, 4, 256>}, {pipeline_mode = #tpu.pipeline_mode<synchronous>, transform_indices = @transform_1, window_bounds = array<i64: 32, 4>}, {pipeline_mode = #tpu.pipeline_mode<synchronous>, transform_indices = @transform_2, window_bounds = array<i64: 32, 1>}, {pipeline_mode = #tpu.pipeline_mode<synchronous>, transform_indices = @transform_3, window_bounds = array<i64: 32, 32>}, {transform_indices = @transform_4, window_bounds = array<i64: 1, 32, 256>}, {transform_indices = @transform_5, window_bounds = array<i64: 1, 32, 256>}]} {
    %c0 = arith.constant 0 : index
    %c0_0 = arith.constant 0 : index
    %0 = vector.load %arg2[%c0, %c0_0] : memref<32x4xbf16, #tpu.memory_space<vmem>>, vector<32x4xbf16>
    %c0_1 = arith.constant 0 : index
    %c0_2 = arith.constant 0 : index
    %c0_3 = arith.constant 0 : index
    %1 = vector.load %arg1[%c0_1, %c0_2, %c0_3] : memref<1x4x256xf32, #tpu.memory_space<vmem>>, vector<1x4x256xf32>
    %2 = vector.shape_cast %1 : vector<1x4x256xf32> to vector<4x256xf32>
    %3 = arith.truncf %2 : vector<4x256xf32> to vector<4x256xbf16>
    %cst = arith.constant dense<0.000000e+00> : vector<32x256xf32>
    %4 = tpu.matmul %0, %3, %cst {dimension_numbers = #tpu.dot_dimension_numbers<[1], [0], [0], [1], [0, 0, 1, 1], [], []>} : vector<32x4xbf16>, vector<4x256xbf16>, vector<32x256xf32> -> vector<32x256xf32>
    %c0_4 = arith.constant 0 : index
    %c0_5 = arith.constant 0 : index
    %5 = vector.load %arg3[%c0_4, %c0_5] : memref<32x1xf32, #tpu.memory_space<vmem>>, vector<32x1xf32>
    %6 = vector.broadcast %5 : vector<32x1xf32> to vector<32x256xf32>
    %7 = arith.addf %4, %6 : vector<32x256xf32>
    %8 = arith.truncf %7 : vector<32x256xf32> to vector<32x256xbf16>
    %c0_6 = arith.constant 0 : index
    %c0_7 = arith.constant 0 : index
    %c0_8 = arith.constant 0 : index
    %9 = vector.load %arg5[%c0_6, %c0_7, %c0_8] : memref<1x32x256xbf16, #tpu.memory_space<vmem>>, vector<1x32x256xbf16>
    %10 = vector.shape_cast %9 : vector<1x32x256xbf16> to vector<32x256xbf16>
    %11 = vector.shape_cast %8 : vector<32x256xbf16> to vector<1x32x256xbf16>
    tpu.vector_store %arg5[%c0_6, %c0_7, %c0_8], %11 {strides = array<i32>} : memref<1x32x256xbf16, #tpu.memory_space<vmem>>, vector<1x32x256xbf16>,
    %c0_9 = arith.constant 0 : index
    %c0_10 = arith.constant 0 : index
    %12 = vector.load %arg4[%c0_9, %c0_10] : memref<32x32xf32, #tpu.memory_space<vmem>>, vector<32x32xf32>
    %cst_11 = arith.constant dense<0.000000e+00> : vector<32xf32>
    %13 = vector.multi_reduction <add>, %7, %cst_11 [1] : vector<32x256xf32> to vector<32xf32>
    %14 = vector.shape_cast %13 : vector<32xf32> to vector<32x1xf32>
    %cst_12 = arith.constant dense<0.000000e+00> : vector<32x1xf32>
    %15 = tpu.matmul %12, %14, %cst_12 {dimension_numbers = #tpu.dot_dimension_numbers<[1], [0], [0], [1], [0, 0, 1, 1], [], []>} : vector<32x32xf32>, vector<32x1xf32>, vector<32x1xf32> -> vector<32x1xf32>
    %cst_13 = arith.constant 9.765625E-4 : f32
    %16 = vector.broadcast %cst_13 : f32 to vector<32x1xf32>
    %17 = arith.mulf %15, %16 : vector<32x1xf32>
    %18 = vector.broadcast %17 : vector<32x1xf32> to vector<32x256xf32>
    %19 = arith.subf %7, %18 : vector<32x256xf32>
    %20 = arith.mulf %19, %19 : vector<32x256xf32>
    %cst_14 = arith.constant dense<0.000000e+00> : vector<32xf32>
    %21 = vector.multi_reduction <add>, %20, %cst_14 [1] : vector<32x256xf32> to vector<32xf32>
    %22 = vector.shape_cast %21 : vector<32xf32> to vector<32x1xf32>
    %cst_15 = arith.constant dense<0.000000e+00> : vector<32x1xf32>
    %23 = tpu.matmul %12, %22, %cst_15 {dimension_numbers = #tpu.dot_dimension_numbers<[1], [0], [0], [1], [0, 0, 1, 1], [], []>} : vector<32x32xf32>, vector<32x1xf32>, vector<32x1xf32> -> vector<32x1xf32>
    %cst_16 = arith.constant 9.765625E-4 : f32
    %24 = vector.broadcast %cst_16 : f32 to vector<32x1xf32>
    %25 = arith.mulf %23, %24 : vector<32x1xf32>
    %cst_17 = arith.constant 9.99999974E-6 : f32
    %26 = vector.broadcast %cst_17 : f32 to vector<32x1xf32>
    %27 = arith.addf %25, %26 : vector<32x1xf32>
    %28 = math.rsqrt %27 : vector<32x1xf32>
    %29 = vector.broadcast %28 : vector<32x1xf32> to vector<32x256xf32>
    %30 = arith.mulf %19, %29 : vector<32x256xf32>
    %c0_18 = arith.constant 0 : index
    %c0_19 = arith.constant 0 : index
    %c0_20 = arith.constant 0 : index
    %31 = vector.load %arg6[%c0_18, %c0_19, %c0_20] : memref<1x32x256xf32, #tpu.memory_space<vmem>>, vector<1x32x256xf32>
    %32 = vector.shape_cast %31 : vector<1x32x256xf32> to vector<32x256xf32>
    %33 = vector.shape_cast %30 : vector<32x256xf32> to vector<1x32x256xf32>
    tpu.vector_store %arg6[%c0_18, %c0_19, %c0_20], %33 {strides = array<i32>} : memref<1x32x256xf32, #tpu.memory_space<vmem>>, vector<1x32x256xf32>,
    return
  }
  func.func @transform_0(%arg0: i32) -> (i32, i32, i32) {
    %c0_i32 = arith.constant 0 : i32
    %c0_i32_0 = arith.constant 0 : i32
    %c0_i32_1 = arith.constant 0 : i32
    return %arg0, %c0_i32, %c0_i32_0 : i32, i32, i32
  }
  func.func @transform_1(%arg0: i32) -> (i32, i32) {
    %c0_i32 = arith.constant 0 : i32
    %c0_i32_0 = arith.constant 0 : i32
    %c0_i32_1 = arith.constant 0 : i32
    return %c0_i32, %c0_i32_0 : i32, i32
  }
  func.func @transform_2(%arg0: i32) -> (i32, i32) {
    %c0_i32 = arith.constant 0 : i32
    %c0_i32_0 = arith.constant 0 : i32
    %c0_i32_1 = arith.constant 0 : i32
    return %c0_i32, %c0_i32_0 : i32, i32
  }
  func.func @transform_3(%arg0: i32) -> (i32, i32) {
    %c0_i32 = arith.constant 0 : i32
    %c0_i32_0 = arith.constant 0 : i32
    %c0_i32_1 = arith.constant 0 : i32
    return %c0_i32, %c0_i32_0 : i32, i32
  }
  func.func @transform_4(%arg0: i32) -> (i32, i32, i32) {
    %c0_i32 = arith.constant 0 : i32
    %c0_i32_0 = arith.constant 0 : i32
    %c0_i32_1 = arith.constant 0 : i32
    return %arg0, %c0_i32, %c0_i32_0 : i32, i32, i32
  }
  func.func @transform_5(%arg0: i32) -> (i32, i32, i32) {
    %c0_i32 = arith.constant 0 : i32
    %c0_i32_0 = arith.constant 0 : i32
    %c0_i32_1 = arith.constant 0 : i32
    return %arg0, %c0_i32, %c0_i32_0 : i32, i32, i32
  }
}

module attributes {stable_mosaic.version = 11 : i64} {
  func.func @_fno_layer_kernel(%arg0: i32, %arg1: memref<1x32x256xf32, #tpu.memory_space<vmem>>, %arg2: memref<1x32x256xbf16, #tpu.memory_space<vmem>>, %arg3: memref<32x32xf32, #tpu.memory_space<vmem>>, %arg4: memref<32x32xf32, #tpu.memory_space<vmem>>, %arg5: memref<32x32xbf16, #tpu.memory_space<vmem>>, %arg6: memref<32x1xf32, #tpu.memory_space<vmem>>, %arg7: memref<32x32xbf16, #tpu.memory_space<vmem>>, %arg8: memref<32x1xf32, #tpu.memory_space<vmem>>, %arg9: memref<32x32xbf16, #tpu.memory_space<vmem>>, %arg10: memref<32x1xf32, #tpu.memory_space<vmem>>, %arg11: memref<1x32x256xbf16, #tpu.memory_space<vmem>>, %arg12: memref<1x32x256xf32, #tpu.memory_space<vmem>>) attributes {dimension_semantics = [#tpu.dimension_semantics<parallel>], iteration_bounds = array<i64: 2>, scalar_prefetch = 0 : i64, scratch_operands = 0 : i64, tpu.core_type = #tpu.core_type<tc>, window_params = [{transform_indices = @transform_0, window_bounds = array<i64: 1, 32, 256>}, {transform_indices = @transform_1, window_bounds = array<i64: 1, 32, 256>}, {pipeline_mode = #tpu.pipeline_mode<synchronous>, transform_indices = @transform_2, window_bounds = array<i64: 32, 32>}, {pipeline_mode = #tpu.pipeline_mode<synchronous>, transform_indices = @transform_3, window_bounds = array<i64: 32, 32>}, {pipeline_mode = #tpu.pipeline_mode<synchronous>, transform_indices = @transform_4, window_bounds = array<i64: 32, 32>}, {pipeline_mode = #tpu.pipeline_mode<synchronous>, transform_indices = @transform_5, window_bounds = array<i64: 32, 1>}, {pipeline_mode = #tpu.pipeline_mode<synchronous>, transform_indices = @transform_6, window_bounds = array<i64: 32, 32>}, {pipeline_mode = #tpu.pipeline_mode<synchronous>, transform_indices = @transform_7, window_bounds = array<i64: 32, 1>}, {pipeline_mode = #tpu.pipeline_mode<synchronous>, transform_indices = @transform_8, window_bounds = array<i64: 32, 32>}, {pipeline_mode = #tpu.pipeline_mode<synchronous>, transform_indices = @transform_9, window_bounds = array<i64: 32, 1>}, {transform_indices = @transform_10, window_bounds = array<i64: 1, 32, 256>}, {transform_indices = @transform_11, window_bounds = array<i64: 1, 32, 256>}]} {
    %c0 = arith.constant 0 : index
    %c0_0 = arith.constant 0 : index
    %0 = vector.load %arg5[%c0, %c0_0] : memref<32x32xbf16, #tpu.memory_space<vmem>>, vector<32x32xbf16>
    %c0_1 = arith.constant 0 : index
    %c0_2 = arith.constant 0 : index
    %1 = vector.load %arg7[%c0_1, %c0_2] : memref<32x32xbf16, #tpu.memory_space<vmem>>, vector<32x32xbf16>
    %c0_3 = arith.constant 0 : index
    %c0_4 = arith.constant 0 : index
    %2 = vector.load %arg9[%c0_3, %c0_4] : memref<32x32xbf16, #tpu.memory_space<vmem>>, vector<32x32xbf16>
    %c0_5 = arith.constant 0 : index
    %c0_6 = arith.constant 0 : index
    %3 = vector.load %arg3[%c0_5, %c0_6] : memref<32x32xf32, #tpu.memory_space<vmem>>, vector<32x32xf32>
    %c0_7 = arith.constant 0 : index
    %c0_8 = arith.constant 0 : index
    %c0_9 = arith.constant 0 : index
    %4 = vector.load %arg1[%c0_7, %c0_8, %c0_9] : memref<1x32x256xf32, #tpu.memory_space<vmem>>, vector<1x32x256xf32>
    %5 = vector.shape_cast %4 : vector<1x32x256xf32> to vector<32x256xf32>
    %cst = arith.constant dense<0.000000e+00> : vector<32xf32>
    %6 = vector.multi_reduction <add>, %5, %cst [1] : vector<32x256xf32> to vector<32xf32>
    %7 = vector.shape_cast %6 : vector<32xf32> to vector<32x1xf32>
    %cst_10 = arith.constant dense<0.000000e+00> : vector<32x1xf32>
    %8 = tpu.matmul %3, %7, %cst_10 {dimension_numbers = #tpu.dot_dimension_numbers<[1], [0], [0], [1], [0, 0, 1, 1], [], []>} : vector<32x32xf32>, vector<32x1xf32>, vector<32x1xf32> -> vector<32x1xf32>
    %cst_11 = arith.constant 9.765625E-4 : f32
    %9 = vector.broadcast %cst_11 : f32 to vector<32x1xf32>
    %10 = arith.mulf %8, %9 : vector<32x1xf32>
    %11 = vector.broadcast %10 : vector<32x1xf32> to vector<32x256xf32>
    %12 = arith.subf %5, %11 : vector<32x256xf32>
    %13 = arith.mulf %12, %12 : vector<32x256xf32>
    %cst_12 = arith.constant dense<0.000000e+00> : vector<32xf32>
    %14 = vector.multi_reduction <add>, %13, %cst_12 [1] : vector<32x256xf32> to vector<32xf32>
    %15 = vector.shape_cast %14 : vector<32xf32> to vector<32x1xf32>
    %cst_13 = arith.constant dense<0.000000e+00> : vector<32x1xf32>
    %16 = tpu.matmul %3, %15, %cst_13 {dimension_numbers = #tpu.dot_dimension_numbers<[1], [0], [0], [1], [0, 0, 1, 1], [], []>} : vector<32x32xf32>, vector<32x1xf32>, vector<32x1xf32> -> vector<32x1xf32>
    %cst_14 = arith.constant 9.765625E-4 : f32
    %17 = vector.broadcast %cst_14 : f32 to vector<32x1xf32>
    %18 = arith.mulf %16, %17 : vector<32x1xf32>
    %cst_15 = arith.constant 9.99999974E-6 : f32
    %19 = vector.broadcast %cst_15 : f32 to vector<32x1xf32>
    %20 = arith.addf %18, %19 : vector<32x1xf32>
    %21 = math.rsqrt %20 : vector<32x1xf32>
    %22 = vector.broadcast %21 : vector<32x1xf32> to vector<32x256xf32>
    %23 = arith.mulf %12, %22 : vector<32x256xf32>
    %24 = arith.truncf %23 : vector<32x256xf32> to vector<32x256xbf16>
    %cst_16 = arith.constant dense<0.000000e+00> : vector<32x256xf32>
    %25 = tpu.matmul %0, %24, %cst_16 {dimension_numbers = #tpu.dot_dimension_numbers<[1], [0], [0], [1], [0, 0, 1, 1], [], []>} : vector<32x32xbf16>, vector<32x256xbf16>, vector<32x256xf32> -> vector<32x256xf32>
    %c0_17 = arith.constant 0 : index
    %c0_18 = arith.constant 0 : index
    %26 = vector.load %arg6[%c0_17, %c0_18] : memref<32x1xf32, #tpu.memory_space<vmem>>, vector<32x1xf32>
    %27 = vector.broadcast %26 : vector<32x1xf32> to vector<32x256xf32>
    %28 = arith.addf %25, %27 : vector<32x256xf32>
    %cst_19 = arith.constant 5.000000e-01 : f32
    %29 = vector.broadcast %cst_19 : f32 to vector<32x256xf32>
    %30 = arith.mulf %29, %28 : vector<32x256xf32>
    %cst_20 = arith.constant 0.707106769 : f32
    %31 = vector.broadcast %cst_20 : f32 to vector<32x256xf32>
    %32 = arith.mulf %28, %31 : vector<32x256xf32>
    %33 = math.erf %32 : vector<32x256xf32>
    %cst_21 = arith.constant 1.000000e+00 : f32
    %34 = vector.broadcast %cst_21 : f32 to vector<32x256xf32>
    %35 = arith.addf %34, %33 : vector<32x256xf32>
    %36 = arith.mulf %30, %35 : vector<32x256xf32>
    %37 = arith.truncf %36 : vector<32x256xf32> to vector<32x256xbf16>
    %cst_22 = arith.constant dense<0.000000e+00> : vector<32x256xf32>
    %38 = tpu.matmul %1, %37, %cst_22 {dimension_numbers = #tpu.dot_dimension_numbers<[1], [0], [0], [1], [0, 0, 1, 1], [], []>} : vector<32x32xbf16>, vector<32x256xbf16>, vector<32x256xf32> -> vector<32x256xf32>
    %c0_23 = arith.constant 0 : index
    %c0_24 = arith.constant 0 : index
    %39 = vector.load %arg8[%c0_23, %c0_24] : memref<32x1xf32, #tpu.memory_space<vmem>>, vector<32x1xf32>
    %40 = vector.broadcast %39 : vector<32x1xf32> to vector<32x256xf32>
    %41 = arith.addf %38, %40 : vector<32x256xf32>
    %c0_25 = arith.constant 0 : index
    %c0_26 = arith.constant 0 : index
    %c0_27 = arith.constant 0 : index
    %42 = vector.load %arg2[%c0_25, %c0_26, %c0_27] : memref<1x32x256xbf16, #tpu.memory_space<vmem>>, vector<1x32x256xbf16>
    %43 = vector.shape_cast %42 : vector<1x32x256xbf16> to vector<32x256xbf16>
    %cst_28 = arith.constant dense<0.000000e+00> : vector<32x256xf32>
    %44 = tpu.matmul %2, %43, %cst_28 {dimension_numbers = #tpu.dot_dimension_numbers<[1], [0], [0], [1], [0, 0, 1, 1], [], []>} : vector<32x32xbf16>, vector<32x256xbf16>, vector<32x256xf32> -> vector<32x256xf32>
    %c0_29 = arith.constant 0 : index
    %c0_30 = arith.constant 0 : index
    %45 = vector.load %arg10[%c0_29, %c0_30] : memref<32x1xf32, #tpu.memory_space<vmem>>, vector<32x1xf32>
    %46 = vector.broadcast %45 : vector<32x1xf32> to vector<32x256xf32>
    %47 = arith.addf %44, %46 : vector<32x256xf32>
    %48 = arith.addf %41, %47 : vector<32x256xf32>
    %cst_31 = arith.constant 5.000000e-01 : f32
    %49 = vector.broadcast %cst_31 : f32 to vector<32x256xf32>
    %50 = arith.mulf %49, %48 : vector<32x256xf32>
    %cst_32 = arith.constant 0.707106769 : f32
    %51 = vector.broadcast %cst_32 : f32 to vector<32x256xf32>
    %52 = arith.mulf %48, %51 : vector<32x256xf32>
    %53 = math.erf %52 : vector<32x256xf32>
    %cst_33 = arith.constant 1.000000e+00 : f32
    %54 = vector.broadcast %cst_33 : f32 to vector<32x256xf32>
    %55 = arith.addf %54, %53 : vector<32x256xf32>
    %56 = arith.mulf %50, %55 : vector<32x256xf32>
    %57 = arith.truncf %56 : vector<32x256xf32> to vector<32x256xbf16>
    %c0_34 = arith.constant 0 : index
    %c0_35 = arith.constant 0 : index
    %c0_36 = arith.constant 0 : index
    %58 = vector.load %arg11[%c0_34, %c0_35, %c0_36] : memref<1x32x256xbf16, #tpu.memory_space<vmem>>, vector<1x32x256xbf16>
    %59 = vector.shape_cast %58 : vector<1x32x256xbf16> to vector<32x256xbf16>
    %60 = vector.shape_cast %57 : vector<32x256xbf16> to vector<1x32x256xbf16>
    tpu.vector_store %arg11[%c0_34, %c0_35, %c0_36], %60 {strides = array<i32>} : memref<1x32x256xbf16, #tpu.memory_space<vmem>>, vector<1x32x256xbf16>,
    %c0_37 = arith.constant 0 : index
    %c0_38 = arith.constant 0 : index
    %61 = vector.load %arg4[%c0_37, %c0_38] : memref<32x32xf32, #tpu.memory_space<vmem>>, vector<32x32xf32>
    %cst_39 = arith.constant dense<0.000000e+00> : vector<32xf32>
    %62 = vector.multi_reduction <add>, %56, %cst_39 [1] : vector<32x256xf32> to vector<32xf32>
    %63 = vector.shape_cast %62 : vector<32xf32> to vector<32x1xf32>
    %cst_40 = arith.constant dense<0.000000e+00> : vector<32x1xf32>
    %64 = tpu.matmul %61, %63, %cst_40 {dimension_numbers = #tpu.dot_dimension_numbers<[1], [0], [0], [1], [0, 0, 1, 1], [], []>} : vector<32x32xf32>, vector<32x1xf32>, vector<32x1xf32> -> vector<32x1xf32>
    %cst_41 = arith.constant 9.765625E-4 : f32
    %65 = vector.broadcast %cst_41 : f32 to vector<32x1xf32>
    %66 = arith.mulf %64, %65 : vector<32x1xf32>
    %67 = vector.broadcast %66 : vector<32x1xf32> to vector<32x256xf32>
    %68 = arith.subf %56, %67 : vector<32x256xf32>
    %69 = arith.mulf %68, %68 : vector<32x256xf32>
    %cst_42 = arith.constant dense<0.000000e+00> : vector<32xf32>
    %70 = vector.multi_reduction <add>, %69, %cst_42 [1] : vector<32x256xf32> to vector<32xf32>
    %71 = vector.shape_cast %70 : vector<32xf32> to vector<32x1xf32>
    %cst_43 = arith.constant dense<0.000000e+00> : vector<32x1xf32>
    %72 = tpu.matmul %61, %71, %cst_43 {dimension_numbers = #tpu.dot_dimension_numbers<[1], [0], [0], [1], [0, 0, 1, 1], [], []>} : vector<32x32xf32>, vector<32x1xf32>, vector<32x1xf32> -> vector<32x1xf32>
    %cst_44 = arith.constant 9.765625E-4 : f32
    %73 = vector.broadcast %cst_44 : f32 to vector<32x1xf32>
    %74 = arith.mulf %72, %73 : vector<32x1xf32>
    %cst_45 = arith.constant 9.99999974E-6 : f32
    %75 = vector.broadcast %cst_45 : f32 to vector<32x1xf32>
    %76 = arith.addf %74, %75 : vector<32x1xf32>
    %77 = math.rsqrt %76 : vector<32x1xf32>
    %78 = vector.broadcast %77 : vector<32x1xf32> to vector<32x256xf32>
    %79 = arith.mulf %68, %78 : vector<32x256xf32>
    %c0_46 = arith.constant 0 : index
    %c0_47 = arith.constant 0 : index
    %c0_48 = arith.constant 0 : index
    %80 = vector.load %arg12[%c0_46, %c0_47, %c0_48] : memref<1x32x256xf32, #tpu.memory_space<vmem>>, vector<1x32x256xf32>
    %81 = vector.shape_cast %80 : vector<1x32x256xf32> to vector<32x256xf32>
    %82 = vector.shape_cast %79 : vector<32x256xf32> to vector<1x32x256xf32>
    tpu.vector_store %arg12[%c0_46, %c0_47, %c0_48], %82 {strides = array<i32>} : memref<1x32x256xf32, #tpu.memory_space<vmem>>, vector<1x32x256xf32>,
    return
  }
  func.func @transform_0(%arg0: i32) -> (i32, i32, i32) {
    %c0_i32 = arith.constant 0 : i32
    %c0_i32_0 = arith.constant 0 : i32
    %c0_i32_1 = arith.constant 0 : i32
    return %arg0, %c0_i32, %c0_i32_0 : i32, i32, i32
  }
  func.func @transform_1(%arg0: i32) -> (i32, i32, i32) {
    %c0_i32 = arith.constant 0 : i32
    %c0_i32_0 = arith.constant 0 : i32
    %c0_i32_1 = arith.constant 0 : i32
    return %arg0, %c0_i32, %c0_i32_0 : i32, i32, i32
  }
  func.func @transform_2(%arg0: i32) -> (i32, i32) {
    %c0_i32 = arith.constant 0 : i32
    %c0_i32_0 = arith.constant 0 : i32
    %c0_i32_1 = arith.constant 0 : i32
    return %c0_i32, %c0_i32_0 : i32, i32
  }
  func.func @transform_3(%arg0: i32) -> (i32, i32) {
    %c0_i32 = arith.constant 0 : i32
    %c0_i32_0 = arith.constant 0 : i32
    %c0_i32_1 = arith.constant 0 : i32
    return %c0_i32, %c0_i32_0 : i32, i32
  }
  func.func @transform_4(%arg0: i32) -> (i32, i32) {
    %c0_i32 = arith.constant 0 : i32
    %c0_i32_0 = arith.constant 0 : i32
    %c0_i32_1 = arith.constant 0 : i32
    return %c0_i32, %c0_i32_0 : i32, i32
  }
  func.func @transform_5(%arg0: i32) -> (i32, i32) {
    %c0_i32 = arith.constant 0 : i32
    %c0_i32_0 = arith.constant 0 : i32
    %c0_i32_1 = arith.constant 0 : i32
    return %c0_i32, %c0_i32_0 : i32, i32
  }
  func.func @transform_6(%arg0: i32) -> (i32, i32) {
    %c0_i32 = arith.constant 0 : i32
    %c0_i32_0 = arith.constant 0 : i32
    %c0_i32_1 = arith.constant 0 : i32
    return %c0_i32, %c0_i32_0 : i32, i32
  }
  func.func @transform_7(%arg0: i32) -> (i32, i32) {
    %c0_i32 = arith.constant 0 : i32
    %c0_i32_0 = arith.constant 0 : i32
    %c0_i32_1 = arith.constant 0 : i32
    return %c0_i32, %c0_i32_0 : i32, i32
  }
  func.func @transform_8(%arg0: i32) -> (i32, i32) {
    %c0_i32 = arith.constant 0 : i32
    %c0_i32_0 = arith.constant 0 : i32
    %c0_i32_1 = arith.constant 0 : i32
    return %c0_i32, %c0_i32_0 : i32, i32
  }
  func.func @transform_9(%arg0: i32) -> (i32, i32) {
    %c0_i32 = arith.constant 0 : i32
    %c0_i32_0 = arith.constant 0 : i32
    %c0_i32_1 = arith.constant 0 : i32
    return %c0_i32, %c0_i32_0 : i32, i32
  }
  func.func @transform_10(%arg0: i32) -> (i32, i32, i32) {
    %c0_i32 = arith.constant 0 : i32
    %c0_i32_0 = arith.constant 0 : i32
    %c0_i32_1 = arith.constant 0 : i32
    return %arg0, %c0_i32, %c0_i32_0 : i32, i32, i32
  }
  func.func @transform_11(%arg0: i32) -> (i32, i32, i32) {
    %c0_i32 = arith.constant 0 : i32
    %c0_i32_0 = arith.constant 0 : i32
    %c0_i32_1 = arith.constant 0 : i32
    return %arg0, %c0_i32, %c0_i32_0 : i32, i32, i32
  }
}

module attributes {stable_mosaic.version = 11 : i64} {
  func.func @_fno_layer_kernel(%arg0: i32, %arg1: memref<1x32x256xf32, #tpu.memory_space<vmem>>, %arg2: memref<1x32x256xbf16, #tpu.memory_space<vmem>>, %arg3: memref<32x32xf32, #tpu.memory_space<vmem>>, %arg4: memref<1x1xf32, #tpu.memory_space<vmem>>, %arg5: memref<32x32xbf16, #tpu.memory_space<vmem>>, %arg6: memref<32x1xf32, #tpu.memory_space<vmem>>, %arg7: memref<32x32xbf16, #tpu.memory_space<vmem>>, %arg8: memref<32x1xf32, #tpu.memory_space<vmem>>, %arg9: memref<32x32xbf16, #tpu.memory_space<vmem>>, %arg10: memref<32x1xf32, #tpu.memory_space<vmem>>, %arg11: memref<1x32x256xbf16, #tpu.memory_space<vmem>>, %arg12: memref<1x32x256xf32, #tpu.memory_space<vmem>>) attributes {dimension_semantics = [#tpu.dimension_semantics<parallel>], iteration_bounds = array<i64: 2>, scalar_prefetch = 0 : i64, scratch_operands = 0 : i64, tpu.core_type = #tpu.core_type<tc>, window_params = [{transform_indices = @transform_0, window_bounds = array<i64: 1, 32, 256>}, {transform_indices = @transform_1, window_bounds = array<i64: 1, 32, 256>}, {pipeline_mode = #tpu.pipeline_mode<synchronous>, transform_indices = @transform_2, window_bounds = array<i64: 32, 32>}, {pipeline_mode = #tpu.pipeline_mode<synchronous>, transform_indices = @transform_3, window_bounds = array<i64: 1, 1>}, {pipeline_mode = #tpu.pipeline_mode<synchronous>, transform_indices = @transform_4, window_bounds = array<i64: 32, 32>}, {pipeline_mode = #tpu.pipeline_mode<synchronous>, transform_indices = @transform_5, window_bounds = array<i64: 32, 1>}, {pipeline_mode = #tpu.pipeline_mode<synchronous>, transform_indices = @transform_6, window_bounds = array<i64: 32, 32>}, {pipeline_mode = #tpu.pipeline_mode<synchronous>, transform_indices = @transform_7, window_bounds = array<i64: 32, 1>}, {pipeline_mode = #tpu.pipeline_mode<synchronous>, transform_indices = @transform_8, window_bounds = array<i64: 32, 32>}, {pipeline_mode = #tpu.pipeline_mode<synchronous>, transform_indices = @transform_9, window_bounds = array<i64: 32, 1>}, {transform_indices = @transform_10, window_bounds = array<i64: 1, 32, 256>}, {transform_indices = @transform_11, window_bounds = array<i64: 1, 32, 256>}]} {
    %c0 = arith.constant 0 : index
    %c0_0 = arith.constant 0 : index
    %0 = vector.load %arg5[%c0, %c0_0] : memref<32x32xbf16, #tpu.memory_space<vmem>>, vector<32x32xbf16>
    %c0_1 = arith.constant 0 : index
    %c0_2 = arith.constant 0 : index
    %1 = vector.load %arg7[%c0_1, %c0_2] : memref<32x32xbf16, #tpu.memory_space<vmem>>, vector<32x32xbf16>
    %c0_3 = arith.constant 0 : index
    %c0_4 = arith.constant 0 : index
    %2 = vector.load %arg9[%c0_3, %c0_4] : memref<32x32xbf16, #tpu.memory_space<vmem>>, vector<32x32xbf16>
    %c0_5 = arith.constant 0 : index
    %c0_6 = arith.constant 0 : index
    %3 = vector.load %arg3[%c0_5, %c0_6] : memref<32x32xf32, #tpu.memory_space<vmem>>, vector<32x32xf32>
    %c0_7 = arith.constant 0 : index
    %c0_8 = arith.constant 0 : index
    %c0_9 = arith.constant 0 : index
    %4 = vector.load %arg1[%c0_7, %c0_8, %c0_9] : memref<1x32x256xf32, #tpu.memory_space<vmem>>, vector<1x32x256xf32>
    %5 = vector.shape_cast %4 : vector<1x32x256xf32> to vector<32x256xf32>
    %cst = arith.constant dense<0.000000e+00> : vector<32xf32>
    %6 = vector.multi_reduction <add>, %5, %cst [1] : vector<32x256xf32> to vector<32xf32>
    %7 = vector.shape_cast %6 : vector<32xf32> to vector<32x1xf32>
    %cst_10 = arith.constant dense<0.000000e+00> : vector<32x1xf32>
    %8 = tpu.matmul %3, %7, %cst_10 {dimension_numbers = #tpu.dot_dimension_numbers<[1], [0], [0], [1], [0, 0, 1, 1], [], []>} : vector<32x32xf32>, vector<32x1xf32>, vector<32x1xf32> -> vector<32x1xf32>
    %cst_11 = arith.constant 9.765625E-4 : f32
    %9 = vector.broadcast %cst_11 : f32 to vector<32x1xf32>
    %10 = arith.mulf %8, %9 : vector<32x1xf32>
    %11 = vector.broadcast %10 : vector<32x1xf32> to vector<32x256xf32>
    %12 = arith.subf %5, %11 : vector<32x256xf32>
    %13 = arith.mulf %12, %12 : vector<32x256xf32>
    %cst_12 = arith.constant dense<0.000000e+00> : vector<32xf32>
    %14 = vector.multi_reduction <add>, %13, %cst_12 [1] : vector<32x256xf32> to vector<32xf32>
    %15 = vector.shape_cast %14 : vector<32xf32> to vector<32x1xf32>
    %cst_13 = arith.constant dense<0.000000e+00> : vector<32x1xf32>
    %16 = tpu.matmul %3, %15, %cst_13 {dimension_numbers = #tpu.dot_dimension_numbers<[1], [0], [0], [1], [0, 0, 1, 1], [], []>} : vector<32x32xf32>, vector<32x1xf32>, vector<32x1xf32> -> vector<32x1xf32>
    %cst_14 = arith.constant 9.765625E-4 : f32
    %17 = vector.broadcast %cst_14 : f32 to vector<32x1xf32>
    %18 = arith.mulf %16, %17 : vector<32x1xf32>
    %cst_15 = arith.constant 9.99999974E-6 : f32
    %19 = vector.broadcast %cst_15 : f32 to vector<32x1xf32>
    %20 = arith.addf %18, %19 : vector<32x1xf32>
    %21 = math.rsqrt %20 : vector<32x1xf32>
    %22 = vector.broadcast %21 : vector<32x1xf32> to vector<32x256xf32>
    %23 = arith.mulf %12, %22 : vector<32x256xf32>
    %24 = arith.truncf %23 : vector<32x256xf32> to vector<32x256xbf16>
    %cst_16 = arith.constant dense<0.000000e+00> : vector<32x256xf32>
    %25 = tpu.matmul %0, %24, %cst_16 {dimension_numbers = #tpu.dot_dimension_numbers<[1], [0], [0], [1], [0, 0, 1, 1], [], []>} : vector<32x32xbf16>, vector<32x256xbf16>, vector<32x256xf32> -> vector<32x256xf32>
    %c0_17 = arith.constant 0 : index
    %c0_18 = arith.constant 0 : index
    %26 = vector.load %arg6[%c0_17, %c0_18] : memref<32x1xf32, #tpu.memory_space<vmem>>, vector<32x1xf32>
    %27 = vector.broadcast %26 : vector<32x1xf32> to vector<32x256xf32>
    %28 = arith.addf %25, %27 : vector<32x256xf32>
    %cst_19 = arith.constant 5.000000e-01 : f32
    %29 = vector.broadcast %cst_19 : f32 to vector<32x256xf32>
    %30 = arith.mulf %29, %28 : vector<32x256xf32>
    %cst_20 = arith.constant 0.707106769 : f32
    %31 = vector.broadcast %cst_20 : f32 to vector<32x256xf32>
    %32 = arith.mulf %28, %31 : vector<32x256xf32>
    %33 = math.erf %32 : vector<32x256xf32>
    %cst_21 = arith.constant 1.000000e+00 : f32
    %34 = vector.broadcast %cst_21 : f32 to vector<32x256xf32>
    %35 = arith.addf %34, %33 : vector<32x256xf32>
    %36 = arith.mulf %30, %35 : vector<32x256xf32>
    %37 = arith.truncf %36 : vector<32x256xf32> to vector<32x256xbf16>
    %cst_22 = arith.constant dense<0.000000e+00> : vector<32x256xf32>
    %38 = tpu.matmul %1, %37, %cst_22 {dimension_numbers = #tpu.dot_dimension_numbers<[1], [0], [0], [1], [0, 0, 1, 1], [], []>} : vector<32x32xbf16>, vector<32x256xbf16>, vector<32x256xf32> -> vector<32x256xf32>
    %c0_23 = arith.constant 0 : index
    %c0_24 = arith.constant 0 : index
    %39 = vector.load %arg8[%c0_23, %c0_24] : memref<32x1xf32, #tpu.memory_space<vmem>>, vector<32x1xf32>
    %40 = vector.broadcast %39 : vector<32x1xf32> to vector<32x256xf32>
    %41 = arith.addf %38, %40 : vector<32x256xf32>
    %c0_25 = arith.constant 0 : index
    %c0_26 = arith.constant 0 : index
    %c0_27 = arith.constant 0 : index
    %42 = vector.load %arg2[%c0_25, %c0_26, %c0_27] : memref<1x32x256xbf16, #tpu.memory_space<vmem>>, vector<1x32x256xbf16>
    %43 = vector.shape_cast %42 : vector<1x32x256xbf16> to vector<32x256xbf16>
    %cst_28 = arith.constant dense<0.000000e+00> : vector<32x256xf32>
    %44 = tpu.matmul %2, %43, %cst_28 {dimension_numbers = #tpu.dot_dimension_numbers<[1], [0], [0], [1], [0, 0, 1, 1], [], []>} : vector<32x32xbf16>, vector<32x256xbf16>, vector<32x256xf32> -> vector<32x256xf32>
    %c0_29 = arith.constant 0 : index
    %c0_30 = arith.constant 0 : index
    %45 = vector.load %arg10[%c0_29, %c0_30] : memref<32x1xf32, #tpu.memory_space<vmem>>, vector<32x1xf32>
    %46 = vector.broadcast %45 : vector<32x1xf32> to vector<32x256xf32>
    %47 = arith.addf %44, %46 : vector<32x256xf32>
    %48 = arith.addf %41, %47 : vector<32x256xf32>
    %cst_31 = arith.constant 5.000000e-01 : f32
    %49 = vector.broadcast %cst_31 : f32 to vector<32x256xf32>
    %50 = arith.mulf %49, %48 : vector<32x256xf32>
    %cst_32 = arith.constant 0.707106769 : f32
    %51 = vector.broadcast %cst_32 : f32 to vector<32x256xf32>
    %52 = arith.mulf %48, %51 : vector<32x256xf32>
    %53 = math.erf %52 : vector<32x256xf32>
    %cst_33 = arith.constant 1.000000e+00 : f32
    %54 = vector.broadcast %cst_33 : f32 to vector<32x256xf32>
    %55 = arith.addf %54, %53 : vector<32x256xf32>
    %56 = arith.mulf %50, %55 : vector<32x256xf32>
    %57 = arith.truncf %56 : vector<32x256xf32> to vector<32x256xbf16>
    %c0_34 = arith.constant 0 : index
    %c0_35 = arith.constant 0 : index
    %c0_36 = arith.constant 0 : index
    %58 = vector.load %arg11[%c0_34, %c0_35, %c0_36] : memref<1x32x256xbf16, #tpu.memory_space<vmem>>, vector<1x32x256xbf16>
    %59 = vector.shape_cast %58 : vector<1x32x256xbf16> to vector<32x256xbf16>
    %60 = vector.shape_cast %57 : vector<32x256xbf16> to vector<1x32x256xbf16>
    tpu.vector_store %arg11[%c0_34, %c0_35, %c0_36], %60 {strides = array<i32>} : memref<1x32x256xbf16, #tpu.memory_space<vmem>>, vector<1x32x256xbf16>,
    %cst_37 = arith.constant dense<0.000000e+00> : vector<32xf32>
    %61 = vector.multi_reduction <add>, %56, %cst_37 [1] : vector<32x256xf32> to vector<32xf32>
    %62 = vector.shape_cast %61 : vector<32xf32> to vector<32x1xf32>
    %cst_38 = arith.constant 3.906250e-03 : f32
    %63 = vector.broadcast %cst_38 : f32 to vector<32x1xf32>
    %64 = arith.mulf %62, %63 : vector<32x1xf32>
    %65 = vector.broadcast %64 : vector<32x1xf32> to vector<32x256xf32>
    %66 = arith.subf %56, %65 : vector<32x256xf32>
    %67 = arith.mulf %66, %66 : vector<32x256xf32>
    %cst_39 = arith.constant dense<0.000000e+00> : vector<32xf32>
    %68 = vector.multi_reduction <add>, %67, %cst_39 [1] : vector<32x256xf32> to vector<32xf32>
    %69 = vector.shape_cast %68 : vector<32xf32> to vector<32x1xf32>
    %cst_40 = arith.constant 3.906250e-03 : f32
    %70 = vector.broadcast %cst_40 : f32 to vector<32x1xf32>
    %71 = arith.mulf %69, %70 : vector<32x1xf32>
    %cst_41 = arith.constant 9.99999974E-6 : f32
    %72 = vector.broadcast %cst_41 : f32 to vector<32x1xf32>
    %73 = arith.addf %71, %72 : vector<32x1xf32>
    %74 = math.rsqrt %73 : vector<32x1xf32>
    %75 = vector.broadcast %74 : vector<32x1xf32> to vector<32x256xf32>
    %76 = arith.mulf %66, %75 : vector<32x256xf32>
    %c0_42 = arith.constant 0 : index
    %c0_43 = arith.constant 0 : index
    %c0_44 = arith.constant 0 : index
    %77 = vector.load %arg12[%c0_42, %c0_43, %c0_44] : memref<1x32x256xf32, #tpu.memory_space<vmem>>, vector<1x32x256xf32>
    %78 = vector.shape_cast %77 : vector<1x32x256xf32> to vector<32x256xf32>
    %79 = vector.shape_cast %76 : vector<32x256xf32> to vector<1x32x256xf32>
    tpu.vector_store %arg12[%c0_42, %c0_43, %c0_44], %79 {strides = array<i32>} : memref<1x32x256xf32, #tpu.memory_space<vmem>>, vector<1x32x256xf32>,
    return
  }
  func.func @transform_0(%arg0: i32) -> (i32, i32, i32) {
    %c0_i32 = arith.constant 0 : i32
    %c0_i32_0 = arith.constant 0 : i32
    %c0_i32_1 = arith.constant 0 : i32
    return %arg0, %c0_i32, %c0_i32_0 : i32, i32, i32
  }
  func.func @transform_1(%arg0: i32) -> (i32, i32, i32) {
    %c0_i32 = arith.constant 0 : i32
    %c0_i32_0 = arith.constant 0 : i32
    %c0_i32_1 = arith.constant 0 : i32
    return %arg0, %c0_i32, %c0_i32_0 : i32, i32, i32
  }
  func.func @transform_2(%arg0: i32) -> (i32, i32) {
    %c0_i32 = arith.constant 0 : i32
    %c0_i32_0 = arith.constant 0 : i32
    %c0_i32_1 = arith.constant 0 : i32
    return %c0_i32, %c0_i32_0 : i32, i32
  }
  func.func @transform_3(%arg0: i32) -> (i32, i32) {
    %c0_i32 = arith.constant 0 : i32
    %c0_i32_0 = arith.constant 0 : i32
    %c0_i32_1 = arith.constant 0 : i32
    return %c0_i32, %c0_i32_0 : i32, i32
  }
  func.func @transform_4(%arg0: i32) -> (i32, i32) {
    %c0_i32 = arith.constant 0 : i32
    %c0_i32_0 = arith.constant 0 : i32
    %c0_i32_1 = arith.constant 0 : i32
    return %c0_i32, %c0_i32_0 : i32, i32
  }
  func.func @transform_5(%arg0: i32) -> (i32, i32) {
    %c0_i32 = arith.constant 0 : i32
    %c0_i32_0 = arith.constant 0 : i32
    %c0_i32_1 = arith.constant 0 : i32
    return %c0_i32, %c0_i32_0 : i32, i32
  }
  func.func @transform_6(%arg0: i32) -> (i32, i32) {
    %c0_i32 = arith.constant 0 : i32
    %c0_i32_0 = arith.constant 0 : i32
    %c0_i32_1 = arith.constant 0 : i32
    return %c0_i32, %c0_i32_0 : i32, i32
  }
  func.func @transform_7(%arg0: i32) -> (i32, i32) {
    %c0_i32 = arith.constant 0 : i32
    %c0_i32_0 = arith.constant 0 : i32
    %c0_i32_1 = arith.constant 0 : i32
    return %c0_i32, %c0_i32_0 : i32, i32
  }
  func.func @transform_8(%arg0: i32) -> (i32, i32) {
    %c0_i32 = arith.constant 0 : i32
    %c0_i32_0 = arith.constant 0 : i32
    %c0_i32_1 = arith.constant 0 : i32
    return %c0_i32, %c0_i32_0 : i32, i32
  }
  func.func @transform_9(%arg0: i32) -> (i32, i32) {
    %c0_i32 = arith.constant 0 : i32
    %c0_i32_0 = arith.constant 0 : i32
    %c0_i32_1 = arith.constant 0 : i32
    return %c0_i32, %c0_i32_0 : i32, i32
  }
  func.func @transform_10(%arg0: i32) -> (i32, i32, i32) {
    %c0_i32 = arith.constant 0 : i32
    %c0_i32_0 = arith.constant 0 : i32
    %c0_i32_1 = arith.constant 0 : i32
    return %arg0, %c0_i32, %c0_i32_0 : i32, i32, i32
  }
  func.func @transform_11(%arg0: i32) -> (i32, i32, i32) {
    %c0_i32 = arith.constant 0 : i32
    %c0_i32_0 = arith.constant 0 : i32
    %c0_i32_1 = arith.constant 0 : i32
    return %arg0, %c0_i32, %c0_i32_0 : i32, i32, i32
  }
}

module attributes {stable_mosaic.version = 11 : i64} {
  func.func @_fno_layer_kernel(%arg0: i32, %arg1: memref<1x32x256xf32, #tpu.memory_space<vmem>>, %arg2: memref<1x32x256xbf16, #tpu.memory_space<vmem>>, %arg3: memref<1x1xf32, #tpu.memory_space<vmem>>, %arg4: memref<1x1xf32, #tpu.memory_space<vmem>>, %arg5: memref<32x32xbf16, #tpu.memory_space<vmem>>, %arg6: memref<32x1xf32, #tpu.memory_space<vmem>>, %arg7: memref<32x32xbf16, #tpu.memory_space<vmem>>, %arg8: memref<32x1xf32, #tpu.memory_space<vmem>>, %arg9: memref<32x32xbf16, #tpu.memory_space<vmem>>, %arg10: memref<32x1xf32, #tpu.memory_space<vmem>>, %arg11: memref<1x32x256xbf16, #tpu.memory_space<vmem>>, %arg12: memref<1x32x256xf32, #tpu.memory_space<vmem>>) attributes {dimension_semantics = [#tpu.dimension_semantics<parallel>], iteration_bounds = array<i64: 2>, scalar_prefetch = 0 : i64, scratch_operands = 0 : i64, tpu.core_type = #tpu.core_type<tc>, window_params = [{transform_indices = @transform_0, window_bounds = array<i64: 1, 32, 256>}, {transform_indices = @transform_1, window_bounds = array<i64: 1, 32, 256>}, {pipeline_mode = #tpu.pipeline_mode<synchronous>, transform_indices = @transform_2, window_bounds = array<i64: 1, 1>}, {pipeline_mode = #tpu.pipeline_mode<synchronous>, transform_indices = @transform_3, window_bounds = array<i64: 1, 1>}, {pipeline_mode = #tpu.pipeline_mode<synchronous>, transform_indices = @transform_4, window_bounds = array<i64: 32, 32>}, {pipeline_mode = #tpu.pipeline_mode<synchronous>, transform_indices = @transform_5, window_bounds = array<i64: 32, 1>}, {pipeline_mode = #tpu.pipeline_mode<synchronous>, transform_indices = @transform_6, window_bounds = array<i64: 32, 32>}, {pipeline_mode = #tpu.pipeline_mode<synchronous>, transform_indices = @transform_7, window_bounds = array<i64: 32, 1>}, {pipeline_mode = #tpu.pipeline_mode<synchronous>, transform_indices = @transform_8, window_bounds = array<i64: 32, 32>}, {pipeline_mode = #tpu.pipeline_mode<synchronous>, transform_indices = @transform_9, window_bounds = array<i64: 32, 1>}, {transform_indices = @transform_10, window_bounds = array<i64: 1, 32, 256>}, {transform_indices = @transform_11, window_bounds = array<i64: 1, 32, 256>}]} {
    %c0 = arith.constant 0 : index
    %c0_0 = arith.constant 0 : index
    %0 = vector.load %arg5[%c0, %c0_0] : memref<32x32xbf16, #tpu.memory_space<vmem>>, vector<32x32xbf16>
    %c0_1 = arith.constant 0 : index
    %c0_2 = arith.constant 0 : index
    %1 = vector.load %arg7[%c0_1, %c0_2] : memref<32x32xbf16, #tpu.memory_space<vmem>>, vector<32x32xbf16>
    %c0_3 = arith.constant 0 : index
    %c0_4 = arith.constant 0 : index
    %2 = vector.load %arg9[%c0_3, %c0_4] : memref<32x32xbf16, #tpu.memory_space<vmem>>, vector<32x32xbf16>
    %c0_5 = arith.constant 0 : index
    %c0_6 = arith.constant 0 : index
    %c0_7 = arith.constant 0 : index
    %3 = vector.load %arg1[%c0_5, %c0_6, %c0_7] : memref<1x32x256xf32, #tpu.memory_space<vmem>>, vector<1x32x256xf32>
    %4 = vector.shape_cast %3 : vector<1x32x256xf32> to vector<32x256xf32>
    %cst = arith.constant dense<0.000000e+00> : vector<32xf32>
    %5 = vector.multi_reduction <add>, %4, %cst [1] : vector<32x256xf32> to vector<32xf32>
    %6 = vector.shape_cast %5 : vector<32xf32> to vector<32x1xf32>
    %cst_8 = arith.constant 3.906250e-03 : f32
    %7 = vector.broadcast %cst_8 : f32 to vector<32x1xf32>
    %8 = arith.mulf %6, %7 : vector<32x1xf32>
    %9 = vector.broadcast %8 : vector<32x1xf32> to vector<32x256xf32>
    %10 = arith.subf %4, %9 : vector<32x256xf32>
    %11 = arith.mulf %10, %10 : vector<32x256xf32>
    %cst_9 = arith.constant dense<0.000000e+00> : vector<32xf32>
    %12 = vector.multi_reduction <add>, %11, %cst_9 [1] : vector<32x256xf32> to vector<32xf32>
    %13 = vector.shape_cast %12 : vector<32xf32> to vector<32x1xf32>
    %cst_10 = arith.constant 3.906250e-03 : f32
    %14 = vector.broadcast %cst_10 : f32 to vector<32x1xf32>
    %15 = arith.mulf %13, %14 : vector<32x1xf32>
    %cst_11 = arith.constant 9.99999974E-6 : f32
    %16 = vector.broadcast %cst_11 : f32 to vector<32x1xf32>
    %17 = arith.addf %15, %16 : vector<32x1xf32>
    %18 = math.rsqrt %17 : vector<32x1xf32>
    %19 = vector.broadcast %18 : vector<32x1xf32> to vector<32x256xf32>
    %20 = arith.mulf %10, %19 : vector<32x256xf32>
    %21 = arith.truncf %20 : vector<32x256xf32> to vector<32x256xbf16>
    %cst_12 = arith.constant dense<0.000000e+00> : vector<32x256xf32>
    %22 = tpu.matmul %0, %21, %cst_12 {dimension_numbers = #tpu.dot_dimension_numbers<[1], [0], [0], [1], [0, 0, 1, 1], [], []>} : vector<32x32xbf16>, vector<32x256xbf16>, vector<32x256xf32> -> vector<32x256xf32>
    %c0_13 = arith.constant 0 : index
    %c0_14 = arith.constant 0 : index
    %23 = vector.load %arg6[%c0_13, %c0_14] : memref<32x1xf32, #tpu.memory_space<vmem>>, vector<32x1xf32>
    %24 = vector.broadcast %23 : vector<32x1xf32> to vector<32x256xf32>
    %25 = arith.addf %22, %24 : vector<32x256xf32>
    %cst_15 = arith.constant 5.000000e-01 : f32
    %26 = vector.broadcast %cst_15 : f32 to vector<32x256xf32>
    %27 = arith.mulf %26, %25 : vector<32x256xf32>
    %cst_16 = arith.constant 0.707106769 : f32
    %28 = vector.broadcast %cst_16 : f32 to vector<32x256xf32>
    %29 = arith.mulf %25, %28 : vector<32x256xf32>
    %30 = math.erf %29 : vector<32x256xf32>
    %cst_17 = arith.constant 1.000000e+00 : f32
    %31 = vector.broadcast %cst_17 : f32 to vector<32x256xf32>
    %32 = arith.addf %31, %30 : vector<32x256xf32>
    %33 = arith.mulf %27, %32 : vector<32x256xf32>
    %34 = arith.truncf %33 : vector<32x256xf32> to vector<32x256xbf16>
    %cst_18 = arith.constant dense<0.000000e+00> : vector<32x256xf32>
    %35 = tpu.matmul %1, %34, %cst_18 {dimension_numbers = #tpu.dot_dimension_numbers<[1], [0], [0], [1], [0, 0, 1, 1], [], []>} : vector<32x32xbf16>, vector<32x256xbf16>, vector<32x256xf32> -> vector<32x256xf32>
    %c0_19 = arith.constant 0 : index
    %c0_20 = arith.constant 0 : index
    %36 = vector.load %arg8[%c0_19, %c0_20] : memref<32x1xf32, #tpu.memory_space<vmem>>, vector<32x1xf32>
    %37 = vector.broadcast %36 : vector<32x1xf32> to vector<32x256xf32>
    %38 = arith.addf %35, %37 : vector<32x256xf32>
    %c0_21 = arith.constant 0 : index
    %c0_22 = arith.constant 0 : index
    %c0_23 = arith.constant 0 : index
    %39 = vector.load %arg2[%c0_21, %c0_22, %c0_23] : memref<1x32x256xbf16, #tpu.memory_space<vmem>>, vector<1x32x256xbf16>
    %40 = vector.shape_cast %39 : vector<1x32x256xbf16> to vector<32x256xbf16>
    %cst_24 = arith.constant dense<0.000000e+00> : vector<32x256xf32>
    %41 = tpu.matmul %2, %40, %cst_24 {dimension_numbers = #tpu.dot_dimension_numbers<[1], [0], [0], [1], [0, 0, 1, 1], [], []>} : vector<32x32xbf16>, vector<32x256xbf16>, vector<32x256xf32> -> vector<32x256xf32>
    %c0_25 = arith.constant 0 : index
    %c0_26 = arith.constant 0 : index
    %42 = vector.load %arg10[%c0_25, %c0_26] : memref<32x1xf32, #tpu.memory_space<vmem>>, vector<32x1xf32>
    %43 = vector.broadcast %42 : vector<32x1xf32> to vector<32x256xf32>
    %44 = arith.addf %41, %43 : vector<32x256xf32>
    %45 = arith.addf %38, %44 : vector<32x256xf32>
    %cst_27 = arith.constant 5.000000e-01 : f32
    %46 = vector.broadcast %cst_27 : f32 to vector<32x256xf32>
    %47 = arith.mulf %46, %45 : vector<32x256xf32>
    %cst_28 = arith.constant 0.707106769 : f32
    %48 = vector.broadcast %cst_28 : f32 to vector<32x256xf32>
    %49 = arith.mulf %45, %48 : vector<32x256xf32>
    %50 = math.erf %49 : vector<32x256xf32>
    %cst_29 = arith.constant 1.000000e+00 : f32
    %51 = vector.broadcast %cst_29 : f32 to vector<32x256xf32>
    %52 = arith.addf %51, %50 : vector<32x256xf32>
    %53 = arith.mulf %47, %52 : vector<32x256xf32>
    %54 = arith.truncf %53 : vector<32x256xf32> to vector<32x256xbf16>
    %c0_30 = arith.constant 0 : index
    %c0_31 = arith.constant 0 : index
    %c0_32 = arith.constant 0 : index
    %55 = vector.load %arg11[%c0_30, %c0_31, %c0_32] : memref<1x32x256xbf16, #tpu.memory_space<vmem>>, vector<1x32x256xbf16>
    %56 = vector.shape_cast %55 : vector<1x32x256xbf16> to vector<32x256xbf16>
    %57 = vector.shape_cast %54 : vector<32x256xbf16> to vector<1x32x256xbf16>
    tpu.vector_store %arg11[%c0_30, %c0_31, %c0_32], %57 {strides = array<i32>} : memref<1x32x256xbf16, #tpu.memory_space<vmem>>, vector<1x32x256xbf16>,
    %cst_33 = arith.constant dense<0.000000e+00> : vector<32xf32>
    %58 = vector.multi_reduction <add>, %53, %cst_33 [1] : vector<32x256xf32> to vector<32xf32>
    %59 = vector.shape_cast %58 : vector<32xf32> to vector<32x1xf32>
    %cst_34 = arith.constant 3.906250e-03 : f32
    %60 = vector.broadcast %cst_34 : f32 to vector<32x1xf32>
    %61 = arith.mulf %59, %60 : vector<32x1xf32>
    %62 = vector.broadcast %61 : vector<32x1xf32> to vector<32x256xf32>
    %63 = arith.subf %53, %62 : vector<32x256xf32>
    %64 = arith.mulf %63, %63 : vector<32x256xf32>
    %cst_35 = arith.constant dense<0.000000e+00> : vector<32xf32>
    %65 = vector.multi_reduction <add>, %64, %cst_35 [1] : vector<32x256xf32> to vector<32xf32>
    %66 = vector.shape_cast %65 : vector<32xf32> to vector<32x1xf32>
    %cst_36 = arith.constant 3.906250e-03 : f32
    %67 = vector.broadcast %cst_36 : f32 to vector<32x1xf32>
    %68 = arith.mulf %66, %67 : vector<32x1xf32>
    %cst_37 = arith.constant 9.99999974E-6 : f32
    %69 = vector.broadcast %cst_37 : f32 to vector<32x1xf32>
    %70 = arith.addf %68, %69 : vector<32x1xf32>
    %71 = math.rsqrt %70 : vector<32x1xf32>
    %72 = vector.broadcast %71 : vector<32x1xf32> to vector<32x256xf32>
    %73 = arith.mulf %63, %72 : vector<32x256xf32>
    %c0_38 = arith.constant 0 : index
    %c0_39 = arith.constant 0 : index
    %c0_40 = arith.constant 0 : index
    %74 = vector.load %arg12[%c0_38, %c0_39, %c0_40] : memref<1x32x256xf32, #tpu.memory_space<vmem>>, vector<1x32x256xf32>
    %75 = vector.shape_cast %74 : vector<1x32x256xf32> to vector<32x256xf32>
    %76 = vector.shape_cast %73 : vector<32x256xf32> to vector<1x32x256xf32>
    tpu.vector_store %arg12[%c0_38, %c0_39, %c0_40], %76 {strides = array<i32>} : memref<1x32x256xf32, #tpu.memory_space<vmem>>, vector<1x32x256xf32>,
    return
  }
  func.func @transform_0(%arg0: i32) -> (i32, i32, i32) {
    %c0_i32 = arith.constant 0 : i32
    %c0_i32_0 = arith.constant 0 : i32
    %c0_i32_1 = arith.constant 0 : i32
    return %arg0, %c0_i32, %c0_i32_0 : i32, i32, i32
  }
  func.func @transform_1(%arg0: i32) -> (i32, i32, i32) {
    %c0_i32 = arith.constant 0 : i32
    %c0_i32_0 = arith.constant 0 : i32
    %c0_i32_1 = arith.constant 0 : i32
    return %arg0, %c0_i32, %c0_i32_0 : i32, i32, i32
  }
  func.func @transform_2(%arg0: i32) -> (i32, i32) {
    %c0_i32 = arith.constant 0 : i32
    %c0_i32_0 = arith.constant 0 : i32
    %c0_i32_1 = arith.constant 0 : i32
    return %c0_i32, %c0_i32_0 : i32, i32
  }
  func.func @transform_3(%arg0: i32) -> (i32, i32) {
    %c0_i32 = arith.constant 0 : i32
    %c0_i32_0 = arith.constant 0 : i32
    %c0_i32_1 = arith.constant 0 : i32
    return %c0_i32, %c0_i32_0 : i32, i32
  }
  func.func @transform_4(%arg0: i32) -> (i32, i32) {
    %c0_i32 = arith.constant 0 : i32
    %c0_i32_0 = arith.constant 0 : i32
    %c0_i32_1 = arith.constant 0 : i32
    return %c0_i32, %c0_i32_0 : i32, i32
  }
  func.func @transform_5(%arg0: i32) -> (i32, i32) {
    %c0_i32 = arith.constant 0 : i32
    %c0_i32_0 = arith.constant 0 : i32
    %c0_i32_1 = arith.constant 0 : i32
    return %c0_i32, %c0_i32_0 : i32, i32
  }
  func.func @transform_6(%arg0: i32) -> (i32, i32) {
    %c0_i32 = arith.constant 0 : i32
    %c0_i32_0 = arith.constant 0 : i32
    %c0_i32_1 = arith.constant 0 : i32
    return %c0_i32, %c0_i32_0 : i32, i32
  }
  func.func @transform_7(%arg0: i32) -> (i32, i32) {
    %c0_i32 = arith.constant 0 : i32
    %c0_i32_0 = arith.constant 0 : i32
    %c0_i32_1 = arith.constant 0 : i32
    return %c0_i32, %c0_i32_0 : i32, i32
  }
  func.func @transform_8(%arg0: i32) -> (i32, i32) {
    %c0_i32 = arith.constant 0 : i32
    %c0_i32_0 = arith.constant 0 : i32
    %c0_i32_1 = arith.constant 0 : i32
    return %c0_i32, %c0_i32_0 : i32, i32
  }
  func.func @transform_9(%arg0: i32) -> (i32, i32) {
    %c0_i32 = arith.constant 0 : i32
    %c0_i32_0 = arith.constant 0 : i32
    %c0_i32_1 = arith.constant 0 : i32
    return %c0_i32, %c0_i32_0 : i32, i32
  }
  func.func @transform_10(%arg0: i32) -> (i32, i32, i32) {
    %c0_i32 = arith.constant 0 : i32
    %c0_i32_0 = arith.constant 0 : i32
    %c0_i32_1 = arith.constant 0 : i32
    return %arg0, %c0_i32, %c0_i32_0 : i32, i32, i32
  }
  func.func @transform_11(%arg0: i32) -> (i32, i32, i32) {
    %c0_i32 = arith.constant 0 : i32
    %c0_i32_0 = arith.constant 0 : i32
    %c0_i32_1 = arith.constant 0 : i32
    return %arg0, %c0_i32, %c0_i32_0 : i32, i32, i32
  }
}

module attributes {stable_mosaic.version = 11 : i64} {
  func.func @_fno_layer_kernel(%arg0: i32, %arg1: memref<1x32x256xf32, #tpu.memory_space<vmem>>, %arg2: memref<1x32x256xbf16, #tpu.memory_space<vmem>>, %arg3: memref<1x1xf32, #tpu.memory_space<vmem>>, %arg4: memref<1x1xf32, #tpu.memory_space<vmem>>, %arg5: memref<32x32xbf16, #tpu.memory_space<vmem>>, %arg6: memref<32x1xf32, #tpu.memory_space<vmem>>, %arg7: memref<32x32xbf16, #tpu.memory_space<vmem>>, %arg8: memref<32x1xf32, #tpu.memory_space<vmem>>, %arg9: memref<32x32xbf16, #tpu.memory_space<vmem>>, %arg10: memref<32x1xf32, #tpu.memory_space<vmem>>, %arg11: memref<1x32x256xbf16, #tpu.memory_space<vmem>>) attributes {dimension_semantics = [#tpu.dimension_semantics<parallel>], iteration_bounds = array<i64: 2>, scalar_prefetch = 0 : i64, scratch_operands = 0 : i64, tpu.core_type = #tpu.core_type<tc>, window_params = [{transform_indices = @transform_0, window_bounds = array<i64: 1, 32, 256>}, {transform_indices = @transform_1, window_bounds = array<i64: 1, 32, 256>}, {pipeline_mode = #tpu.pipeline_mode<synchronous>, transform_indices = @transform_2, window_bounds = array<i64: 1, 1>}, {pipeline_mode = #tpu.pipeline_mode<synchronous>, transform_indices = @transform_3, window_bounds = array<i64: 1, 1>}, {pipeline_mode = #tpu.pipeline_mode<synchronous>, transform_indices = @transform_4, window_bounds = array<i64: 32, 32>}, {pipeline_mode = #tpu.pipeline_mode<synchronous>, transform_indices = @transform_5, window_bounds = array<i64: 32, 1>}, {pipeline_mode = #tpu.pipeline_mode<synchronous>, transform_indices = @transform_6, window_bounds = array<i64: 32, 32>}, {pipeline_mode = #tpu.pipeline_mode<synchronous>, transform_indices = @transform_7, window_bounds = array<i64: 32, 1>}, {pipeline_mode = #tpu.pipeline_mode<synchronous>, transform_indices = @transform_8, window_bounds = array<i64: 32, 32>}, {pipeline_mode = #tpu.pipeline_mode<synchronous>, transform_indices = @transform_9, window_bounds = array<i64: 32, 1>}, {transform_indices = @transform_10, window_bounds = array<i64: 1, 32, 256>}]} {
    %c0 = arith.constant 0 : index
    %c0_0 = arith.constant 0 : index
    %0 = vector.load %arg5[%c0, %c0_0] : memref<32x32xbf16, #tpu.memory_space<vmem>>, vector<32x32xbf16>
    %c0_1 = arith.constant 0 : index
    %c0_2 = arith.constant 0 : index
    %1 = vector.load %arg7[%c0_1, %c0_2] : memref<32x32xbf16, #tpu.memory_space<vmem>>, vector<32x32xbf16>
    %c0_3 = arith.constant 0 : index
    %c0_4 = arith.constant 0 : index
    %2 = vector.load %arg9[%c0_3, %c0_4] : memref<32x32xbf16, #tpu.memory_space<vmem>>, vector<32x32xbf16>
    %c0_5 = arith.constant 0 : index
    %c0_6 = arith.constant 0 : index
    %c0_7 = arith.constant 0 : index
    %3 = vector.load %arg1[%c0_5, %c0_6, %c0_7] : memref<1x32x256xf32, #tpu.memory_space<vmem>>, vector<1x32x256xf32>
    %4 = vector.shape_cast %3 : vector<1x32x256xf32> to vector<32x256xf32>
    %cst = arith.constant dense<0.000000e+00> : vector<32xf32>
    %5 = vector.multi_reduction <add>, %4, %cst [1] : vector<32x256xf32> to vector<32xf32>
    %6 = vector.shape_cast %5 : vector<32xf32> to vector<32x1xf32>
    %cst_8 = arith.constant 3.906250e-03 : f32
    %7 = vector.broadcast %cst_8 : f32 to vector<32x1xf32>
    %8 = arith.mulf %6, %7 : vector<32x1xf32>
    %9 = vector.broadcast %8 : vector<32x1xf32> to vector<32x256xf32>
    %10 = arith.subf %4, %9 : vector<32x256xf32>
    %11 = arith.mulf %10, %10 : vector<32x256xf32>
    %cst_9 = arith.constant dense<0.000000e+00> : vector<32xf32>
    %12 = vector.multi_reduction <add>, %11, %cst_9 [1] : vector<32x256xf32> to vector<32xf32>
    %13 = vector.shape_cast %12 : vector<32xf32> to vector<32x1xf32>
    %cst_10 = arith.constant 3.906250e-03 : f32
    %14 = vector.broadcast %cst_10 : f32 to vector<32x1xf32>
    %15 = arith.mulf %13, %14 : vector<32x1xf32>
    %cst_11 = arith.constant 9.99999974E-6 : f32
    %16 = vector.broadcast %cst_11 : f32 to vector<32x1xf32>
    %17 = arith.addf %15, %16 : vector<32x1xf32>
    %18 = math.rsqrt %17 : vector<32x1xf32>
    %19 = vector.broadcast %18 : vector<32x1xf32> to vector<32x256xf32>
    %20 = arith.mulf %10, %19 : vector<32x256xf32>
    %21 = arith.truncf %20 : vector<32x256xf32> to vector<32x256xbf16>
    %cst_12 = arith.constant dense<0.000000e+00> : vector<32x256xf32>
    %22 = tpu.matmul %0, %21, %cst_12 {dimension_numbers = #tpu.dot_dimension_numbers<[1], [0], [0], [1], [0, 0, 1, 1], [], []>} : vector<32x32xbf16>, vector<32x256xbf16>, vector<32x256xf32> -> vector<32x256xf32>
    %c0_13 = arith.constant 0 : index
    %c0_14 = arith.constant 0 : index
    %23 = vector.load %arg6[%c0_13, %c0_14] : memref<32x1xf32, #tpu.memory_space<vmem>>, vector<32x1xf32>
    %24 = vector.broadcast %23 : vector<32x1xf32> to vector<32x256xf32>
    %25 = arith.addf %22, %24 : vector<32x256xf32>
    %cst_15 = arith.constant 5.000000e-01 : f32
    %26 = vector.broadcast %cst_15 : f32 to vector<32x256xf32>
    %27 = arith.mulf %26, %25 : vector<32x256xf32>
    %cst_16 = arith.constant 0.707106769 : f32
    %28 = vector.broadcast %cst_16 : f32 to vector<32x256xf32>
    %29 = arith.mulf %25, %28 : vector<32x256xf32>
    %30 = math.erf %29 : vector<32x256xf32>
    %cst_17 = arith.constant 1.000000e+00 : f32
    %31 = vector.broadcast %cst_17 : f32 to vector<32x256xf32>
    %32 = arith.addf %31, %30 : vector<32x256xf32>
    %33 = arith.mulf %27, %32 : vector<32x256xf32>
    %34 = arith.truncf %33 : vector<32x256xf32> to vector<32x256xbf16>
    %cst_18 = arith.constant dense<0.000000e+00> : vector<32x256xf32>
    %35 = tpu.matmul %1, %34, %cst_18 {dimension_numbers = #tpu.dot_dimension_numbers<[1], [0], [0], [1], [0, 0, 1, 1], [], []>} : vector<32x32xbf16>, vector<32x256xbf16>, vector<32x256xf32> -> vector<32x256xf32>
    %c0_19 = arith.constant 0 : index
    %c0_20 = arith.constant 0 : index
    %36 = vector.load %arg8[%c0_19, %c0_20] : memref<32x1xf32, #tpu.memory_space<vmem>>, vector<32x1xf32>
    %37 = vector.broadcast %36 : vector<32x1xf32> to vector<32x256xf32>
    %38 = arith.addf %35, %37 : vector<32x256xf32>
    %c0_21 = arith.constant 0 : index
    %c0_22 = arith.constant 0 : index
    %c0_23 = arith.constant 0 : index
    %39 = vector.load %arg2[%c0_21, %c0_22, %c0_23] : memref<1x32x256xbf16, #tpu.memory_space<vmem>>, vector<1x32x256xbf16>
    %40 = vector.shape_cast %39 : vector<1x32x256xbf16> to vector<32x256xbf16>
    %cst_24 = arith.constant dense<0.000000e+00> : vector<32x256xf32>
    %41 = tpu.matmul %2, %40, %cst_24 {dimension_numbers = #tpu.dot_dimension_numbers<[1], [0], [0], [1], [0, 0, 1, 1], [], []>} : vector<32x32xbf16>, vector<32x256xbf16>, vector<32x256xf32> -> vector<32x256xf32>
    %c0_25 = arith.constant 0 : index
    %c0_26 = arith.constant 0 : index
    %42 = vector.load %arg10[%c0_25, %c0_26] : memref<32x1xf32, #tpu.memory_space<vmem>>, vector<32x1xf32>
    %43 = vector.broadcast %42 : vector<32x1xf32> to vector<32x256xf32>
    %44 = arith.addf %41, %43 : vector<32x256xf32>
    %45 = arith.addf %38, %44 : vector<32x256xf32>
    %46 = arith.truncf %45 : vector<32x256xf32> to vector<32x256xbf16>
    %c0_27 = arith.constant 0 : index
    %c0_28 = arith.constant 0 : index
    %c0_29 = arith.constant 0 : index
    %47 = vector.load %arg11[%c0_27, %c0_28, %c0_29] : memref<1x32x256xbf16, #tpu.memory_space<vmem>>, vector<1x32x256xbf16>
    %48 = vector.shape_cast %47 : vector<1x32x256xbf16> to vector<32x256xbf16>
    %49 = vector.shape_cast %46 : vector<32x256xbf16> to vector<1x32x256xbf16>
    tpu.vector_store %arg11[%c0_27, %c0_28, %c0_29], %49 {strides = array<i32>} : memref<1x32x256xbf16, #tpu.memory_space<vmem>>, vector<1x32x256xbf16>,
    return
  }
  func.func @transform_0(%arg0: i32) -> (i32, i32, i32) {
    %c0_i32 = arith.constant 0 : i32
    %c0_i32_0 = arith.constant 0 : i32
    %c0_i32_1 = arith.constant 0 : i32
    return %arg0, %c0_i32, %c0_i32_0 : i32, i32, i32
  }
  func.func @transform_1(%arg0: i32) -> (i32, i32, i32) {
    %c0_i32 = arith.constant 0 : i32
    %c0_i32_0 = arith.constant 0 : i32
    %c0_i32_1 = arith.constant 0 : i32
    return %arg0, %c0_i32, %c0_i32_0 : i32, i32, i32
  }
  func.func @transform_2(%arg0: i32) -> (i32, i32) {
    %c0_i32 = arith.constant 0 : i32
    %c0_i32_0 = arith.constant 0 : i32
    %c0_i32_1 = arith.constant 0 : i32
    return %c0_i32, %c0_i32_0 : i32, i32
  }
  func.func @transform_3(%arg0: i32) -> (i32, i32) {
    %c0_i32 = arith.constant 0 : i32
    %c0_i32_0 = arith.constant 0 : i32
    %c0_i32_1 = arith.constant 0 : i32
    return %c0_i32, %c0_i32_0 : i32, i32
  }
  func.func @transform_4(%arg0: i32) -> (i32, i32) {
    %c0_i32 = arith.constant 0 : i32
    %c0_i32_0 = arith.constant 0 : i32
    %c0_i32_1 = arith.constant 0 : i32
    return %c0_i32, %c0_i32_0 : i32, i32
  }
  func.func @transform_5(%arg0: i32) -> (i32, i32) {
    %c0_i32 = arith.constant 0 : i32
    %c0_i32_0 = arith.constant 0 : i32
    %c0_i32_1 = arith.constant 0 : i32
    return %c0_i32, %c0_i32_0 : i32, i32
  }
  func.func @transform_6(%arg0: i32) -> (i32, i32) {
    %c0_i32 = arith.constant 0 : i32
    %c0_i32_0 = arith.constant 0 : i32
    %c0_i32_1 = arith.constant 0 : i32
    return %c0_i32, %c0_i32_0 : i32, i32
  }
  func.func @transform_7(%arg0: i32) -> (i32, i32) {
    %c0_i32 = arith.constant 0 : i32
    %c0_i32_0 = arith.constant 0 : i32
    %c0_i32_1 = arith.constant 0 : i32
    return %c0_i32, %c0_i32_0 : i32, i32
  }
  func.func @transform_8(%arg0: i32) -> (i32, i32) {
    %c0_i32 = arith.constant 0 : i32
    %c0_i32_0 = arith.constant 0 : i32
    %c0_i32_1 = arith.constant 0 : i32
    return %c0_i32, %c0_i32_0 : i32, i32
  }
  func.func @transform_9(%arg0: i32) -> (i32, i32) {
    %c0_i32 = arith.constant 0 : i32
    %c0_i32_0 = arith.constant 0 : i32
    %c0_i32_1 = arith.constant 0 : i32
    return %c0_i32, %c0_i32_0 : i32, i32
  }
  func.func @transform_10(%arg0: i32) -> (i32, i32, i32) {
    %c0_i32 = arith.constant 0 : i32
    %c0_i32_0 = arith.constant 0 : i32
    %c0_i32_1 = arith.constant 0 : i32
    return %arg0, %c0_i32, %c0_i32_0 : i32, i32, i32
  }
}

module attributes {stable_mosaic.version = 11 : i64} {
  func.func @_qhead_kernel(%arg0: i32, %arg1: i32, %arg2: memref<1x32x256xbf16, #tpu.memory_space<vmem>>, %arg3: memref<128x32xbf16, #tpu.memory_space<vmem>>, %arg4: memref<128x1xf32, #tpu.memory_space<vmem>>, %arg5: memref<1x128xbf16, #tpu.memory_space<vmem>>, %arg6: memref<1x1xf32, #tpu.memory_space<vmem>>, %arg7: memref<1x1x256xf32, #tpu.memory_space<vmem>>) attributes {dimension_semantics = [#tpu.dimension_semantics<parallel>, #tpu.dimension_semantics<parallel>], iteration_bounds = array<i64: 2, 1>, scalar_prefetch = 0 : i64, scratch_operands = 0 : i64, tpu.core_type = #tpu.core_type<tc>, window_params = [{transform_indices = @transform_0, window_bounds = array<i64: 1, 32, 256>}, {pipeline_mode = #tpu.pipeline_mode<synchronous>, transform_indices = @transform_1, window_bounds = array<i64: 128, 32>}, {pipeline_mode = #tpu.pipeline_mode<synchronous>, transform_indices = @transform_2, window_bounds = array<i64: 128, 1>}, {pipeline_mode = #tpu.pipeline_mode<synchronous>, transform_indices = @transform_3, window_bounds = array<i64: 1, 128>}, {pipeline_mode = #tpu.pipeline_mode<synchronous>, transform_indices = @transform_4, window_bounds = array<i64: 1, 1>}, {transform_indices = @transform_5, window_bounds = array<i64: 1, 1, 256>}]} {
    %c0 = arith.constant 0 : index
    %c0_0 = arith.constant 0 : index
    %0 = vector.load %arg3[%c0, %c0_0] : memref<128x32xbf16, #tpu.memory_space<vmem>>, vector<128x32xbf16>
    %c0_1 = arith.constant 0 : index
    %c0_2 = arith.constant 0 : index
    %1 = vector.load %arg5[%c0_1, %c0_2] : memref<1x128xbf16, #tpu.memory_space<vmem>>, vector<1x128xbf16>
    %c0_3 = arith.constant 0 : index
    %c0_4 = arith.constant 0 : index
    %c0_5 = arith.constant 0 : index
    %2 = vector.load %arg2[%c0_3, %c0_4, %c0_5] : memref<1x32x256xbf16, #tpu.memory_space<vmem>>, vector<1x32x256xbf16>
    %3 = vector.shape_cast %2 : vector<1x32x256xbf16> to vector<32x256xbf16>
    %cst = arith.constant dense<0.000000e+00> : vector<128x256xf32>
    %4 = tpu.matmul %0, %3, %cst {dimension_numbers = #tpu.dot_dimension_numbers<[1], [0], [0], [1], [0, 0, 1, 1], [], []>} : vector<128x32xbf16>, vector<32x256xbf16>, vector<128x256xf32> -> vector<128x256xf32>
    %c0_6 = arith.constant 0 : index
    %c0_7 = arith.constant 0 : index
    %5 = vector.load %arg4[%c0_6, %c0_7] : memref<128x1xf32, #tpu.memory_space<vmem>>, vector<128x1xf32>
    %6 = vector.broadcast %5 : vector<128x1xf32> to vector<128x256xf32>
    %7 = arith.addf %4, %6 : vector<128x256xf32>
    %cst_8 = arith.constant 5.000000e-01 : f32
    %8 = vector.broadcast %cst_8 : f32 to vector<128x256xf32>
    %9 = arith.mulf %8, %7 : vector<128x256xf32>
    %cst_9 = arith.constant 0.707106769 : f32
    %10 = vector.broadcast %cst_9 : f32 to vector<128x256xf32>
    %11 = arith.mulf %7, %10 : vector<128x256xf32>
    %12 = math.erf %11 : vector<128x256xf32>
    %cst_10 = arith.constant 1.000000e+00 : f32
    %13 = vector.broadcast %cst_10 : f32 to vector<128x256xf32>
    %14 = arith.addf %13, %12 : vector<128x256xf32>
    %15 = arith.mulf %9, %14 : vector<128x256xf32>
    %16 = arith.truncf %15 : vector<128x256xf32> to vector<128x256xbf16>
    %cst_11 = arith.constant dense<0.000000e+00> : vector<1x256xf32>
    %17 = tpu.matmul %1, %16, %cst_11 {dimension_numbers = #tpu.dot_dimension_numbers<[1], [0], [0], [1], [0, 0, 1, 1], [], []>} : vector<1x128xbf16>, vector<128x256xbf16>, vector<1x256xf32> -> vector<1x256xf32>
    %c0_12 = arith.constant 0 : index
    %c0_13 = arith.constant 0 : index
    %18 = vector.load %arg6[%c0_12, %c0_13] : memref<1x1xf32, #tpu.memory_space<vmem>>, vector<1x1xf32>
    %19 = vector.broadcast %18 : vector<1x1xf32> to vector<1x256xf32>
    %20 = arith.addf %17, %19 : vector<1x256xf32>
    %c0_14 = arith.constant 0 : index
    %c0_15 = arith.constant 0 : index
    %c0_16 = arith.constant 0 : index
    %21 = vector.load %arg7[%c0_14, %c0_15, %c0_16] : memref<1x1x256xf32, #tpu.memory_space<vmem>>, vector<1x1x256xf32>
    %22 = vector.shape_cast %21 : vector<1x1x256xf32> to vector<1x256xf32>
    %23 = vector.shape_cast %20 : vector<1x256xf32> to vector<1x1x256xf32>
    tpu.vector_store %arg7[%c0_14, %c0_15, %c0_16], %23 {strides = array<i32>} : memref<1x1x256xf32, #tpu.memory_space<vmem>>, vector<1x1x256xf32>,
    return
  }
  func.func @transform_0(%arg0: i32, %arg1: i32) -> (i32, i32, i32) {
    %c0_i32 = arith.constant 0 : i32
    %c0_i32_0 = arith.constant 0 : i32
    return %arg0, %c0_i32, %arg1 : i32, i32, i32
  }
  func.func @transform_1(%arg0: i32, %arg1: i32) -> (i32, i32) {
    %c0_i32 = arith.constant 0 : i32
    %c0_i32_0 = arith.constant 0 : i32
    %c0_i32_1 = arith.constant 0 : i32
    return %c0_i32, %c0_i32_0 : i32, i32
  }
  func.func @transform_2(%arg0: i32, %arg1: i32) -> (i32, i32) {
    %c0_i32 = arith.constant 0 : i32
    %c0_i32_0 = arith.constant 0 : i32
    %c0_i32_1 = arith.constant 0 : i32
    return %c0_i32, %c0_i32_0 : i32, i32
  }
  func.func @transform_3(%arg0: i32, %arg1: i32) -> (i32, i32) {
    %c0_i32 = arith.constant 0 : i32
    %c0_i32_0 = arith.constant 0 : i32
    %c0_i32_1 = arith.constant 0 : i32
    return %c0_i32, %c0_i32_0 : i32, i32
  }
  func.func @transform_4(%arg0: i32, %arg1: i32) -> (i32, i32) {
    %c0_i32 = arith.constant 0 : i32
    %c0_i32_0 = arith.constant 0 : i32
    %c0_i32_1 = arith.constant 0 : i32
    return %c0_i32, %c0_i32_0 : i32, i32
  }
  func.func @transform_5(%arg0: i32, %arg1: i32) -> (i32, i32, i32) {
    %c0_i32 = arith.constant 0 : i32
    %c0_i32_0 = arith.constant 0 : i32
    return %arg0, %c0_i32, %arg1 : i32, i32, i32
  }
}

</mosaic_0001>

<bundles_post_ra>
// kernel: _lambda_.6
= control target key start
LH: loop header
LB: loop body
LE: loop exit
PB: predicated region body
PF: predicated region fallthrough
CT: control target
= control target key end

     0   :  { %s923_s18 = smov 0   ;;  %s1041_s0 = inlined_call_operand.vmem [shape: f32[2,4,256], index: 0, kind: input, shape index: {}]   ;;  %s1042_s1 = inlined_call_operand.vmem [shape: bf16[32,4], index: 1, kind: input, shape index: {}]   ;;  %s1043_s2 = inlined_call_operand.vmem [shape: f32[32,1], index: 2, kind: input, shape index: {}]   ;;  %s1044_s3 = inlined_call_operand.vmem [shape: f32[32,32], index: 3, kind: input, shape index: {}]   ;;  %s1045_s4 = inlined_call_operand.vmem [shape: bf16[2,32,256], index: 4, kind: output, shape index: {0}]   ;;  %s1046_s5 = inlined_call_operand.vmem [shape: f32[2,32,256], index: 5, kind: output, shape index: {1}]  }
   0x1 LB: > { %s765_s19 = sadd.s32 4294967295, %s890_s18   ;;  %p769_p0 = scmp.ge.s32.totalorder %s890_s18, 1  ;;  %s890_s18 = sphi %s923_s18, %s16_s18  }
   0x2   : > { %p190_p1 = scmp.lt.s32.totalorder %s890_s18, 3 }
   0x4   : > { %p191_p2 = pnand %p769_p0, %p190_p1 }
   0x5   : > { %p223_p3 = scmp.lt.s32.totalorder (!%p191_p2), %s765_s19, 1  ;;  %v892_v0 = vmov (!%p191_p2), 0   ;;  %v249_v1 = vld [vmem:[%s1043_s2] sm:$0xff] (!%p191_p2)  ;;  %v251_v2 = vld [vmem:[%s1043_s2 + $0x10] sm:$0xff] (!%p191_p2)  ;;  %v250_v3 = vld [vmem:[%s1043_s2 + $0x8] sm:$0xff] (!%p191_p2)  ;;  %vm290_vm0 = vcmask (!%p191_p2), 1041408  }
   0x6   : > { %194 = sbr.rel (%p191_p2) target bundleno = 1274 (0x4fa), region = 36  ;;  %329 = vmatprep.mubr.bf16.mxu0 (!%p191_p2), %v892_v0  ;;  %871 = vset.pattern.permute.xlu0 (!%p191_p2), %v892_v0  ;;  %v252_v4 = vld [vmem:[%s1043_s2 + $0x18] sm:$0xff] (!%p191_p2)  ;;  %v874_v10 = vld [vmem:[%s1042_s1] sm:$0xff] (!%p191_p2)   ;;  %vm283_vm1 = vcmask (!%p191_p2), 31744   ;;  %v875_v11 = vld [vmem:[%s1042_s1 + $0x8] sm:$0xff] (!%p191_p2)   ;;  %vm394_vm2 = vcmask (!%p191_p2), 261120  }
   0x7   : > { %872 = vset.pattern.permute.xlu1 (!%p191_p2), %v892_v0  ;;  %255 = vperm.xlu0 (!%p191_p2), %871, %v249_v1   ;;  %v378_v40 = vld [vmem:[%s1044_s3] sm:$0xff] (!%p191_p2)  ;;  %v379_v47 = vld [vmem:[%s1044_s3 + $0x8] sm:$0xff] (!%p191_p2)  ;;  %v380_v48 = vld [vmem:[%s1044_s3 + $0x10] sm:$0xff] (!%p191_p2) }
   0x8   : > { %265 = vperm.xlu1 (!%p191_p2), %872, %v251_v2   ;;  %826 = vmatprep.mubr.msk.f32.mxu1 (!%p191_p2), %vm394_vm2, %v378_v40  ;;  %v381_v49 = vld [vmem:[%s1044_s3 + $0x18] sm:$0xff] (!%p191_p2) }
   0xb   : > { %260 = vperm.xlu0 (!%p191_p2), %871, %v250_v3  }
   0xc   : > { %270 = vperm.xlu1 (!%p191_p2), %872, %v252_v4  }
   0xd   : > { %s1048_s19 = smov (!%p223_p3, %s765_s19), 1 }
   0xe   : > { %s795_s24 = sshll.u32 %s1048_s19, 3  ;;  %s796_s11 = sshll.u32 %s1048_s19, 5 }
   0xf   : > { %s227_s29 = scalar_lea.vmem %s1041_s0, %s795_s24  ;;  %s232_s14 = scalar_lea.vmem %s1045_s4, %s796_s11 }
  0x10   : > { %v243_v5 = vld [vmem:[%s227_s29] sm:$0xff]  ;;  %s797_s25 = sshll.u32 %s1048_s19, 6 }
  0x11   : > { %v245_v6 = vcombine.high %v243_v5, %v243_v5  ;;  %v247_v7 = vpack.c.bf16 %v243_v5, %v243_v5  ;;  %s237_s28 = scalar_lea.vmem %s1046_s5, %s797_s25 }
  0x13   : > { %v248_v8 = vpack.c.bf16 %v245_v6, %v245_v6  ;;  %v292_v9 = vsel %vm290_vm0, %v247_v7, 0 }
  0x15   : > { %778 = vmatprep.subr.msk.bf16.mxu0 %vm290_vm0, %v248_v8 }
  0x16   : > { %298 = vmatpush1.bf16.msra.mxu0 %v292_v9 }
  0x19   : > { %779 = vmatmul.mubr.msk.bf16.vlgmr.msra.gmra.mrb[0].mxu0 %vm283_vm1, %v874_v10 }
  0x1a   : > { %339 = vmatprep.mubr.bf16.mxu0 %v892_v0 }
  0x21   : > { %780 = vmatmul.mubr.msk.bf16.gmra.mrb[4].mxu0 %vm283_vm1, %v875_v11 }
  0x86   : > { %v256_v12 = vpop.permute.xlu0 %255 }
  0x87   : > { %v266_v19 = vpop.permute.xlu1 %265 }
  0x8a   : > { %v261_v14 = vpop.permute.xlu0 %260 }
  0x8b   : > { %v271_v28 = vpop.permute.xlu1 %270 }
  0xec   : > { %v331_v13 = vpop.f32.mrb[0].mxu0 }
  0xed   : > { %v956_v15 = vadd.f32 %v331_v13, %v256_v12  ;;  %v333_v16 = vpop.f32.mrb[1].mxu0 }
  0xee   : > { %v958_v17 = vadd.f32 %v333_v16, %v256_v12  ;;  %v335_v18 = vpop.f32.mrb[2].mxu0 }
  0xef   : > { %v336_v20 = vadd.f32 %v335_v18, %v261_v14  ;;  %v337_v21 = vpop.f32.mrb[3].mxu0 }
  0xf0   : > { %v798_v22 = vpack.c.bf16 %v958_v17, %v956_v15  ;;  %v338_v23 = vadd.f32 %v337_v21, %v261_v14  ;;  %v382_v24 = vadd.f32 %v958_v17, %v956_v15 }
  0xf2   : > { %374 = vst [vmem:[%s232_s14] sm:$0xff] %v798_v22  ;;  %v799_v25 = vpack.c.bf16 %v338_v23, %v336_v20  ;;  %383 = vadd.xlane.f32.xlu0 %v382_v24  ;;  %v385_v26 = vadd.f32 %v338_v23, %v336_v20 }
  0xf4   : > { %375 = vst [vmem:[%s232_s14 + $0x8] sm:$0xff] %v799_v25  ;;  %v341_v27 = vpop.f32.mrb[4].mxu0  ;;  %386 = vadd.xlane.f32.xlu1 %v385_v26 }
  0xf5   : > { %v342_v29 = vadd.f32 %v341_v27, %v266_v19  ;;  %v343_v30 = vpop.f32.mrb[5].mxu0 }
  0xf6   : > { %v344_v31 = vadd.f32 %v343_v30, %v266_v19  ;;  %v345_v32 = vpop.f32.mrb[6].mxu0 }
  0xf7   : > { %v967_v33 = vadd.f32 %v345_v32, %v271_v28  ;;  %v347_v34 = vpop.f32.mrb[7].mxu0 }
  0xf8   : > { %v800_v35 = vpack.c.bf16 %v344_v31, %v342_v29  ;;  %v348_v36 = vadd.f32 %v347_v34, %v271_v28  ;;  %v388_v37 = vadd.f32 %v344_v31, %v342_v29 }
  0xfa   : > { %376 = vst [vmem:[%s232_s14 + $0x10] sm:$0xff] %v800_v35  ;;  %v801_v38 = vpack.c.bf16 %v348_v36, %v967_v33  ;;  %389 = vadd.xlane.f32.xlu0 %v388_v37  ;;  %v391_v39 = vadd.f32 %v348_v36, %v967_v33 }
  0xfc   : > { %377 = vst [vmem:[%s232_s14 + $0x18] sm:$0xff] %v801_v38 }
  0xfe   : > { %392 = vadd.xlane.f32.xlu0 %v391_v39 }
 0x17f   : > { %v384_v41 = vpop.xlane.xlu0 %383 }
 0x181   : > { %v387_v42 = vpop.xlane.xlu1 %386 }
 0x182   : > { %v846_v43 = vpack.c.bf16 %v387_v42, %v384_v41 }
 0x184   : > { %847 = vmatprep.subr.bf16.mxu1 %v846_v43 }
 0x185   : > { %849 = vmatpush3.bf16.msra.mxu1 %v846_v43 }
 0x187   : > { %v390_v44 = vpop.xlane.xlu0 %389 }
 0x18b   : > { %v393_v45 = vpop.xlane.xlu0 %392 }
 0x18c   : > { %v850_v46 = vpack.c.bf16 %v393_v45, %v390_v44 }
 0x18e   : > { %851 = vmatprep.subr.bf16.mxu1 %v850_v46 }
 0x18f   : > { %853 = vmatpush3.bf16.msra.mxu1 %v850_v46 }
 0x192   : > { %827 = vmatmul.mubr.msk.f32.vlgmr.msra.gmra.mrb[0].mxu1 %vm394_vm2, %v379_v47 }
 0x193   : > { %829 = vmatprep.mubr.msk.f32.mxu1 %vm394_vm2, %v380_v48 }
 0x196   : > { %830 = vmatmul.mubr.msk.f32.gmra.mrb[2].mxu1 %vm394_vm2, %v381_v49 }
 0x197   : > { %840 = vmatprep.mubr.msk.f32.mxu1 %vm394_vm2, %v378_v40 }
 0x265   : > { %v828_v50 = vpop.f32.mrb[0].mxu1 }
 0x266   : > { %v493_v51 = vmul.f32 0.0009765625, %v828_v50  ;;  %v473_v52 = vpop.f32.mrb[1].mxu1 }
 0x267   : > { %v492_v53 = vmul.f32 0.0009765625, %v473_v52 }
 0x268   : > { %503 = vperm.xlu0 %871, %v493_v51  }
 0x269   : > { %498 = vperm.xlu1 %872, %v492_v53   ;;  %v831_v54 = vpop.f32.mrb[2].mxu1 }
 0x26a   : > { %v483_v55 = vpop.f32.mrb[3].mxu1  ;;  %v495_v57 = vmul.f32 0.0009765625, %v831_v54 }
 0x26b   : > { %v494_v56 = vmul.f32 0.0009765625, %v483_v55 }
 0x26d   : > { %508 = vperm.xlu1 %872, %v494_v56  }
 0x271   : > { %513 = vperm.xlu1 %872, %v495_v57  }
 0x2e7   : > { %v504_v58 = vpop.permute.xlu0 %503 }
 0x2e8   : > { %v988_v59 = vsub.f32 %v336_v20, %v504_v58  ;;  %v990_v60 = vsub.f32 %v338_v23, %v504_v58  ;;  %v499_v61 = vpop.permute.xlu1 %498 }
 0x2e9   : > { %v993_v62 = vsub.f32 %v956_v15, %v499_v61  ;;  %v996_v63 = vsub.f32 %v958_v17, %v499_v61 }
 0x2ea   : > { %v526_v0 = vmul.f32 %v988_v59, %v988_v59  ;;  %v527_v1 = vmul.f32 %v990_v60, %v990_v60 }
 0x2eb   : > { %v524_v2 = vmul.f32 %v993_v62, %v993_v62  ;;  %v525_v3 = vmul.f32 %v996_v63, %v996_v63 }
 0x2ec   : > { %v509_v4 = vpop.permute.xlu1 %508  ;;  %v535_v5 = vadd.f32 %v527_v1, %v526_v0 }
 0x2ed   : > { %v1006_v6 = vsub.f32 %v342_v29, %v509_v4  ;;  %v1008_v7 = vsub.f32 %v344_v31, %v509_v4  ;;  %v532_v8 = vadd.f32 %v525_v3, %v524_v2 }
 0x2ee   : > { %536 = vadd.xlane.f32.xlu1 %v535_v5 }
 0x2ef   : > { %533 = vadd.xlane.f32.xlu0 %v532_v8  ;;  %v528_v9 = vmul.f32 %v1006_v6, %v1006_v6  ;;  %v529_v10 = vmul.f32 %v1008_v7, %v1008_v7 }
 0x2f0   : > { %v514_v11 = vpop.permute.xlu1 %513 }
 0x2f1   : > { %v1015_v12 = vsub.f32 %v967_v33, %v514_v11  ;;  %v1017_v13 = vsub.f32 %v348_v36, %v514_v11  ;;  %v538_v14 = vadd.f32 %v529_v10, %v528_v9 }
 0x2f3   : > { %539 = vadd.xlane.f32.xlu0 %v538_v14  ;;  %v530_v15 = vmul.f32 %v1015_v12, %v1015_v12  ;;  %v531_v16 = vmul.f32 %v1017_v13, %v1017_v13 }
 0x2f5   : > { %v541_v17 = vadd.f32 %v531_v16, %v530_v15 }
 0x2f7   : > { %542 = vadd.xlane.f32.xlu0 %v541_v17 }
 0x37b   : > { %v537_v18 = vpop.xlane.xlu1 %536 }
 0x37c   : > { %v534_v19 = vpop.xlane.xlu0 %533 }
 0x37d   : > { %v854_v20 = vpack.c.bf16 %v537_v18, %v534_v19 }
 0x37f   : > { %855 = vmatprep.subr.bf16.mxu1 %v854_v20 }
 0x380   : > { %v540_v21 = vpop.xlane.xlu0 %539  ;;  %857 = vmatpush3.bf16.msra.mxu1 %v854_v20 }
 0x384   : > { %v543_v22 = vpop.xlane.xlu0 %542 }
 0x385   : > { %v858_v23 = vpack.c.bf16 %v543_v22, %v540_v21 }
 0x387   : > { %859 = vmatprep.subr.bf16.mxu1 %v858_v23 }
 0x388   : > { %861 = vmatpush3.bf16.msra.mxu1 %v858_v23 }
 0x38b   : > { %841 = vmatmul.mubr.msk.f32.vlgmr.msra.gmra.mrb[4].mxu1 %vm394_vm2, %v379_v47 }
 0x38c   : > { %843 = vmatprep.mubr.msk.f32.mxu1 %vm394_vm2, %v380_v48 }
 0x38f   : > { %844 = vmatmul.mubr.msk.f32.gmra.mrb[6].mxu1 %vm394_vm2, %v381_v49 }
 0x45e   : > { %v842_v24 = vpop.f32.mrb[4].mxu1 }
 0x45f   : > { %v630_v25 = vmul.f32 0.0009765625, %v842_v24  ;;  %v610_v26 = vpop.f32.mrb[5].mxu1 }
 0x460   : > { %v629_v27 = vmul.f32 0.0009765625, %v610_v26 }
 0x461   : > { %v634_v28 = vadd.f32 1e-05, %v630_v25 }
 0x462   : > { %v633_v29 = vadd.f32 1e-05, %v629_v27  ;;  %v845_v30 = vpop.f32.mrb[6].mxu1 }
 0x463   : > { %876 = vrsqrt.f32 %v634_v28  ;;  %v620_v31 = vpop.f32.mrb[7].mxu1  ;;  %v632_v32 = vmul.f32 0.0009765625, %v845_v30 }
 0x464   : > { %878 = vrsqrt.f32 %v633_v29  ;;  %v631_v33 = vmul.f32 0.0009765625, %v620_v31 }
 0x465   : > { %v636_v35 = vadd.f32 1e-05, %v632_v32 }
 0x466   : > { %v635_v34 = vadd.f32 1e-05, %v631_v33 }
 0x468   : > { %880 = vrsqrt.f32 %v635_v34 }
 0x469   : > { %882 = vrsqrt.f32 %v636_v35 }
 0x46d   : > { %v877_v36 = vpop.eup %876 }
 0x46e   : > { %v879_v37 = vpop.eup %878  ;;  %648 = vperm.xlu0 %871, %v877_v36  }
 0x46f   : > { %643 = vperm.xlu1 %872, %v879_v37  }
 0x472   : > { %v881_v38 = vpop.eup %880 }
 0x473   : > { %653 = vperm.xlu1 %872, %v881_v38   ;;  %v883_v39 = vpop.eup %882 }
 0x477   : > { %658 = vperm.xlu1 %872, %v883_v39  }
 0x4ed   : > { %v649_v40 = vpop.permute.xlu0 %648 }
 0x4ee   : > { %v663_v41 = vmul.f32 %v649_v40, %v988_v59  ;;  %v664_v42 = vmul.f32 %v649_v40, %v990_v60  ;;  %v644_v43 = vpop.permute.xlu1 %643 }
 0x4ef   : > { %v661_v44 = vmul.f32 %v644_v43, %v993_v62  ;;  %v662_v45 = vmul.f32 %v644_v43, %v996_v63 }
 0x4f0   : > { %671 = vst [vmem:[%s237_s28 + $0x10] sm:$0xff] %v663_v41  ;;  %672 = vst [vmem:[%s237_s28 + $0x18] sm:$0xff] %v664_v42 }
 0x4f1   : > { %669 = vst [vmem:[%s237_s28] sm:$0xff] %v661_v44  ;;  %670 = vst [vmem:[%s237_s28 + $0x8] sm:$0xff] %v662_v45 }
 0x4f2   : > { %v654_v46 = vpop.permute.xlu1 %653 }
 0x4f3   : > { %v665_v47 = vmul.f32 %v654_v46, %v1006_v6  ;;  %v666_v48 = vmul.f32 %v654_v46, %v1008_v7 }
 0x4f5   : > { %673 = vst [vmem:[%s237_s28 + $0x20] sm:$0xff] %v665_v47  ;;  %674 = vst [vmem:[%s237_s28 + $0x28] sm:$0xff] %v666_v48 }
 0x4f6   : > { %v659_v49 = vpop.permute.xlu1 %658 }
 0x4f7   : > { %v667_v50 = vmul.f32 %v659_v49, %v1015_v12  ;;  %v668_v51 = vmul.f32 %v659_v49, %v1017_v13 }
 0x4f9   : > { %675 = vst [vmem:[%s237_s28 + $0x30] sm:$0xff] %v667_v50  ;;  %676 = vst [vmem:[%s237_s28 + $0x38] sm:$0xff] %v668_v51 }
 0x4fa PF: > { %s16_s18 = sadd.s32 1, %s890_s18  }
 0x4fb   : > { %p13_p4 = scmp.ge.s32.totalorder %s16_s18, 4  }
 0x4fd   :  { %15 = sbr.rel (!%p13_p4) target bundleno = 1 (0x1), region = 78 }

// kernel: reverse.8
= control target key start
LH: loop header
LB: loop body
LE: loop exit
PB: predicated region body
PF: predicated region fallthrough
CT: control target
= control target key end

     0   :  { %s344_s0 = inlined_call_operand.vmem [shape: f32[2,32,16,7], index: 0, kind: input, shape index: {}]   ;;  %s345_s1 = inlined_call_operand.vmem [shape: f32[2,32,16,7], index: 1, kind: output, shape index: {}]  }
   0x1   :  { %v112_v0 = vld [vmem:[%s344_s0 + $0x60] sm:$0xff]  ;;  %v113_v1 = vld [vmem:[%s344_s0 + $0xd0] sm:$0xff]  ;;  %v138_v14 = vld [vmem:[%s344_s0 + $0x68] sm:$0xff] }
   0x2   :  { %v115_v2 = vld [vmem:[%s344_s0 + $0x50] sm:$0xff]  ;;  %4 = vst [vmem:[%s345_s1] sm:$0xff] %v112_v0  ;;  %114 = vst [vmem:[%s345_s1 + $0x70] sm:$0xff] %v113_v1  ;;  %v117_v3 = vld [vmem:[%s344_s0 + $0xc0] sm:$0xff] }
   0x3   :  { %116 = vst [vmem:[%s345_s1 + $0x10] sm:$0xff] %v115_v2  ;;  %v119_v4 = vld [vmem:[%s344_s0 + $0x40] sm:$0xff]  ;;  %v121_v5 = vld [vmem:[%s344_s0 + $0xb0] sm:$0xff]  ;;  %118 = vst [vmem:[%s345_s1 + $0x80] sm:$0xff] %v117_v3 }
   0x4   :  { %120 = vst [vmem:[%s345_s1 + $0x20] sm:$0xff] %v119_v4  ;;  %122 = vst [vmem:[%s345_s1 + $0x90] sm:$0xff] %v121_v5  ;;  %v123_v6 = vld [vmem:[%s344_s0 + $0x30] sm:$0xff]  ;;  %v125_v7 = vld [vmem:[%s344_s0 + $0xa0] sm:$0xff] }
   0x5   :  { %v127_v8 = vld [vmem:[%s344_s0 + $0x20] sm:$0xff]  ;;  %124 = vst [vmem:[%s345_s1 + $0x30] sm:$0xff] %v123_v6  ;;  %126 = vst [vmem:[%s345_s1 + $0xa0] sm:$0xff] %v125_v7  ;;  %v129_v9 = vld [vmem:[%s344_s0 + $0x90] sm:$0xff] }
   0x6   :  { %128 = vst [vmem:[%s345_s1 + $0x40] sm:$0xff] %v127_v8  ;;  %v131_v10 = vld [vmem:[%s344_s0 + $0x10] sm:$0xff]  ;;  %v133_v11 = vld [vmem:[%s344_s0 + $0x80] sm:$0xff]  ;;  %130 = vst [vmem:[%s345_s1 + $0xb0] sm:$0xff] %v129_v9 }
   0x7   :  { %132 = vst [vmem:[%s345_s1 + $0x50] sm:$0xff] %v131_v10  ;;  %134 = vst [vmem:[%s345_s1 + $0xc0] sm:$0xff] %v133_v11  ;;  %v49_v12 = vld [vmem:[%s344_s0] sm:$0xff]  ;;  %v136_v13 = vld [vmem:[%s344_s0 + $0x70] sm:$0xff] }
   0x8   :  { %135 = vst [vmem:[%s345_s1 + $0x60] sm:$0xff] %v49_v12  ;;  %137 = vst [vmem:[%s345_s1 + $0xd0] sm:$0xff] %v136_v13  ;;  %v140_v15 = vld [vmem:[%s344_s0 + $0xd8] sm:$0xff]  ;;  %v144_v17 = vld [vmem:[%s344_s0 + $0xc8] sm:$0xff] }
   0x9   :  { %139 = vst [vmem:[%s345_s1 + $0x8] sm:$0xff] %v138_v14  ;;  %v142_v16 = vld [vmem:[%s344_s0 + $0x58] sm:$0xff]  ;;  %141 = vst [vmem:[%s345_s1 + $0x78] sm:$0xff] %v140_v15  ;;  %v146_v18 = vld [vmem:[%s344_s0 + $0x48] sm:$0xff] }
   0xa   :  { %143 = vst [vmem:[%s345_s1 + $0x18] sm:$0xff] %v142_v16  ;;  %145 = vst [vmem:[%s345_s1 + $0x88] sm:$0xff] %v144_v17  ;;  %v148_v19 = vld [vmem:[%s344_s0 + $0xb8] sm:$0xff]  ;;  %v152_v21 = vld [vmem:[%s344_s0 + $0xa8] sm:$0xff] }
   0xb   :  { %v150_v20 = vld [vmem:[%s344_s0 + $0x38] sm:$0xff]  ;;  %147 = vst [vmem:[%s345_s1 + $0x28] sm:$0xff] %v146_v18  ;;  %149 = vst [vmem:[%s345_s1 + $0x98] sm:$0xff] %v148_v19  ;;  %v154_v22 = vld [vmem:[%s344_s0 + $0x28] sm:$0xff] }
   0xc   :  { %151 = vst [vmem:[%s345_s1 + $0x38] sm:$0xff] %v150_v20  ;;  %v156_v23 = vld [vmem:[%s344_s0 + $0x98] sm:$0xff]  ;;  %153 = vst [vmem:[%s345_s1 + $0xa8] sm:$0xff] %v152_v21  ;;  %v160_v25 = vld [vmem:[%s344_s0 + $0x88] sm:$0xff] }
   0xd   :  { %155 = vst [vmem:[%s345_s1 + $0x48] sm:$0xff] %v154_v22  ;;  %157 = vst [vmem:[%s345_s1 + $0xb8] sm:$0xff] %v156_v23  ;;  %v158_v24 = vld [vmem:[%s344_s0 + $0x18] sm:$0xff]  ;;  %v162_v26 = vld [vmem:[%s344_s0 + $0x8] sm:$0xff] }
   0xe   :  { %159 = vst [vmem:[%s345_s1 + $0x58] sm:$0xff] %v158_v24  ;;  %161 = vst [vmem:[%s345_s1 + $0xc8] sm:$0xff] %v160_v25  ;;  %v164_v27 = vld [vmem:[%s344_s0 + $0x78] sm:$0xff] }
   0xf   :  { %163 = vst [vmem:[%s345_s1 + $0x68] sm:$0xff] %v162_v26  ;;  %165 = vst [vmem:[%s345_s1 + $0xd8] sm:$0xff] %v164_v27 }

// kernel: _lambda_.7
= control target key start
LH: loop header
LB: loop body
LE: loop exit
PB: predicated region body
PF: predicated region fallthrough
CT: control target
= control target key end

     0   :  { %s1900_s17 = smov 0   ;;  %s2171_s0 = inlined_call_operand.vmem [shape: f32[2,32,256], index: 0, kind: input, shape index: {}]   ;;  %s2172_s1 = inlined_call_operand.vmem [shape: bf16[2,32,256], index: 1, kind: input, shape index: {}]   ;;  %s2173_s2 = inlined_call_operand.vmem [shape: f32[32,32], index: 2, kind: input, shape index: {}, may-alias: {2,3}]   ;;  %s2174_s3 = inlined_call_operand.vmem [shape: f32[32,32], index: 3, kind: input, shape index: {}, may-alias: {2,3}]   ;;  %s2175_s4 = inlined_call_operand.vmem [shape: bf16[32,32], index: 4, kind: input, shape index: {}]   ;;  %s2176_s5 = inlined_call_operand.vmem [shape: f32[32,1], index: 5, kind: input, shape index: {}]   ;;  %s2177_s6 = inlined_call_operand.vmem [shape: bf16[32,32], index: 6, kind: input, shape index: {}]   ;;  %s2178_s7 = inlined_call_operand.vmem [shape: f32[32,1], index: 7, kind: input, shape index: {}]   ;;  %s2179_s8 = inlined_call_operand.vmem [shape: bf16[32,32], index: 8, kind: input, shape index: {}]   ;;  %s2180_s9 = inlined_call_operand.vmem [shape: f32[32,1], index: 9, kind: input, shape index: {}]   ;;  %s2181_s10 = inlined_call_operand.vmem [shape: bf16[2,32,256], index: 10, kind: output, shape index: {0}]   ;;  %s2182_s11 = inlined_call_operand.vmem [shape: f32[2,32,256], index: 11, kind: output, shape index: {1}]  }
   0x1 LB: > { %s1557_s18 = sadd.s32 4294967295, %s1837_s17   ;;  %p1561_p0 = scmp.ge.s32.totalorder %s1837_s17, 1  ;;  %s1837_s17 = sphi %s1900_s17, %s22_s17  }
   0x2   : > { %p350_p1 = scmp.lt.s32.totalorder %s1837_s17, 3 }
   0x4   : > { %p351_p2 = pnand %p1561_p0, %p350_p1 }
   0x5   : > { %p400_p3 = scmp.lt.s32.totalorder (!%p351_p2), %s1557_s18, 1  ;;  %v433_v12 = vld [vmem:[%s2173_s2] sm:$0xff] (!%p351_p2)  ;;  %vm457_vm0 = vcmask (!%p351_p2), 261120   ;;  %v434_v19 = vld [vmem:[%s2173_s2 + $0x8] sm:$0xff] (!%p351_p2)  ;;  %v435_v20 = vld [vmem:[%s2173_s2 + $0x10] sm:$0xff] (!%p351_p2)  ;;  %v1839_v22 = vmov (!%p351_p2), 0  }
   0x6   : > { %354 = sbr.rel (%p351_p2) target bundleno = 2575 (0xa0f), region = 60  ;;  %1656 = vmatprep.mubr.msk.f32.mxu0 (!%p351_p2), %vm457_vm0, %v433_v12  ;;  %1670 = vmatprep.mubr.msk.f32.mxu1 (!%p351_p2), %vm457_vm0, %v433_v12  ;;  %v436_v21 = vld [vmem:[%s2173_s2 + $0x18] sm:$0xff] (!%p351_p2) }
   0x7   : > { %1770 = vset.pattern.permute.xlu1 (!%p351_p2), %v1839_v22  ;;  %1769 = vset.pattern.permute.xlu0 (!%p351_p2), %v1839_v22 }
   0xd   : > { %s2184_s18 = smov (!%p400_p3, %s1557_s18), 1 }
   0xe   : > { %s1608_s19 = sshll.u32 %s2184_s18, 6  ;;  %s1609_s27 = sshll.u32 %s2184_s18, 5 }
   0xf   : > { %s404_s22 = scalar_lea.vmem %s2171_s0, %s1608_s19  ;;  %s2047_s30 = scalar_lea.vmem %s2172_s1, %s1609_s27 }
  0x10   : > { %v1916_v0 = vld [vmem:[%s404_s22 + $0x20] sm:$0xff]  ;;  %v1918_v1 = vld [vmem:[%s404_s22 + $0x28] sm:$0xff]  ;;  %v1922_v5 = vld [vmem:[%s404_s22 + $0x30] sm:$0xff]  ;;  %s2081_s25 = scalar_lea.vmem %s2181_s10, %s1609_s27  ;;  %s419_s20 = scalar_lea.vmem %s2182_s11, %s1608_s19 }
  0x11   : > { %v437_v2 = vld [vmem:[%s404_s22] sm:$0xff]  ;;  %v451_v3 = vadd.f32 %v1918_v1, %v1916_v0  ;;  %v438_v4 = vld [vmem:[%s404_s22 + $0x8] sm:$0xff]  ;;  %v1924_v6 = vld [vmem:[%s404_s22 + $0x38] sm:$0xff] }
  0x12   : > { %v445_v7 = vadd.f32 %v438_v4, %v437_v2  ;;  %v439_v8 = vld [vmem:[%s404_s22 + $0x10] sm:$0xff]  ;;  %v440_v9 = vld [vmem:[%s404_s22 + $0x18] sm:$0xff]  ;;  %v454_v10 = vadd.f32 %v1924_v6, %v1922_v5 }
  0x13   : > { %452 = vadd.xlane.f32.xlu1 %v451_v3  ;;  %v448_v11 = vadd.f32 %v440_v9, %v439_v8 }
  0x14   : > { %446 = vadd.xlane.f32.xlu0 %v445_v7 }
  0x17   : > { %455 = vadd.xlane.f32.xlu1 %v454_v10 }
  0x18   : > { %449 = vadd.xlane.f32.xlu0 %v448_v11  ;;  %v737_v11 = vld [vmem:[%s2176_s5 + $0x8] sm:$0xff] }
  0xa0   : > { %v453_v13 = vpop.xlane.xlu1 %452 }
  0xa1   : > { %v447_v14 = vpop.xlane.xlu0 %446 }
  0xa4   : > { %v456_v15 = vpop.xlane.xlu1 %455 }
  0xa5   : > { %v450_v16 = vpop.xlane.xlu0 %449  ;;  %v1708_v18 = vpack.c.bf16 %v456_v15, %v453_v13  ;;  %v739_v13 = vld [vmem:[%s2176_s5 + $0x18] sm:$0xff]  ;;  %v874_v15 = vld [vmem:[%s2178_s7 + $0x8] sm:$0xff] }
  0xa6   : > { %v1704_v17 = vpack.c.bf16 %v450_v16, %v447_v14  ;;  %v736_v16 = vld [vmem:[%s2176_s5] sm:$0xff] }
  0xa8   : > { %1705 = vmatprep.subr.bf16.mxu0 %v1704_v17 }
  0xa9   : > { %1707 = vmatpush3.bf16.msra.mxu0 %v1704_v17  ;;  %v971_v17 = vld [vmem:[%s2180_s9 + $0x8] sm:$0xff] }
  0xaa   : > { %1709 = vmatprep.subr.bf16.mxu0 %v1708_v18 }
  0xad   : > { %1711 = vmatpush3.bf16.msra.mxu0 %v1708_v18  ;;  %v738_v18 = vld [vmem:[%s2176_s5 + $0x10] sm:$0xff] }
  0xb0   : > { %1657 = vmatmul.mubr.msk.f32.vlgmr.msra.gmra.mrb[0].mxu0 %vm457_vm0, %v434_v19 }
  0xb1   : > { %1659 = vmatprep.mubr.msk.f32.mxu0 %vm457_vm0, %v435_v20 }
  0xb4   : > { %1660 = vmatmul.mubr.msk.f32.gmra.mrb[2].mxu0 %vm457_vm0, %v436_v21 }
  0xb5   : > { %808 = vmatprep.mubr.bf16.mxu0 %v1839_v22 }
 0x183   : > { %v1658_v23 = vpop.f32.mrb[0].mxu0 }
 0x184   : > { %v556_v24 = vmul.f32 0.0009765625, %v1658_v23  ;;  %v536_v25 = vpop.f32.mrb[1].mxu0  ;;  %v970_v23 = vld [vmem:[%s2180_s9] sm:$0xff] }
 0x185   : > { %v555_v26 = vmul.f32 0.0009765625, %v536_v25  ;;  %v972_v25 = vld [vmem:[%s2180_s9 + $0x10] sm:$0xff] }
 0x186   : > { %566 = vperm.xlu1 %1770, %v556_v24   ;;  %v875_v24 = vld [vmem:[%s2178_s7 + $0x10] sm:$0xff] }
 0x187   : > { %561 = vperm.xlu0 %1769, %v555_v26   ;;  %v1661_v27 = vpop.f32.mrb[2].mxu0 }
 0x188   : > { %v546_v28 = vpop.f32.mrb[3].mxu0  ;;  %v558_v30 = vmul.f32 0.0009765625, %v1661_v27 }
 0x189   : > { %v557_v29 = vmul.f32 0.0009765625, %v546_v28 }
 0x18b   : > { %571 = vperm.xlu1 %1770, %v557_v29  }
 0x18f   : > { %576 = vperm.xlu1 %1770, %v558_v30  }
 0x205   : > { %v567_v31 = vpop.permute.xlu1 %566 }
 0x206   : > { %v1948_v32 = vsub.f32 %v439_v8, %v567_v31  ;;  %v1950_v33 = vsub.f32 %v440_v9, %v567_v31  ;;  %v562_v34 = vpop.permute.xlu0 %561 }
 0x207   : > { %v1952_v35 = vsub.f32 %v437_v2, %v562_v34  ;;  %v1954_v36 = vsub.f32 %v438_v4, %v562_v34 }
 0x208   : > { %v589_v37 = vmul.f32 %v1948_v32, %v1948_v32  ;;  %v590_v38 = vmul.f32 %v1950_v33, %v1950_v33 }
 0x209   : > { %v587_v39 = vmul.f32 %v1952_v35, %v1952_v35  ;;  %v588_v40 = vmul.f32 %v1954_v36, %v1954_v36 }
 0x20a   : > { %v572_v41 = vpop.permute.xlu1 %571  ;;  %v598_v42 = vadd.f32 %v590_v38, %v589_v37 }
 0x20b   : > { %v1965_v43 = vsub.f32 %v1916_v0, %v572_v41  ;;  %v1968_v44 = vsub.f32 %v1918_v1, %v572_v41  ;;  %v595_v45 = vadd.f32 %v588_v40, %v587_v39 }
 0x20c   : > { %599 = vadd.xlane.f32.xlu0 %v598_v42 }
 0x20d   : > { %596 = vadd.xlane.f32.xlu1 %v595_v45  ;;  %v591_v46 = vmul.f32 %v1965_v43, %v1965_v43  ;;  %v592_v47 = vmul.f32 %v1968_v44, %v1968_v44 }
 0x20e   : > { %v577_v48 = vpop.permute.xlu1 %576 }
 0x20f   : > { %v1975_v49 = vsub.f32 %v1922_v5, %v577_v48  ;;  %v1978_v50 = vsub.f32 %v1924_v6, %v577_v48  ;;  %v601_v51 = vadd.f32 %v592_v47, %v591_v46 }
 0x211   : > { %602 = vadd.xlane.f32.xlu1 %v601_v51  ;;  %v593_v52 = vmul.f32 %v1975_v49, %v1975_v49  ;;  %v594_v53 = vmul.f32 %v1978_v50, %v1978_v50 }
 0x213   : > { %v604_v54 = vadd.f32 %v594_v53, %v593_v52 }
 0x215   : > { %605 = vadd.xlane.f32.xlu1 %v604_v54 }
 0x299   : > { %v600_v55 = vpop.xlane.xlu0 %599 }
 0x29a   : > { %v597_v56 = vpop.xlane.xlu1 %596 }
 0x29b   : > { %v1712_v57 = vpack.c.bf16 %v600_v55, %v597_v56 }
 0x29d   : > { %1713 = vmatprep.subr.bf16.mxu1 %v1712_v57 }
 0x29e   : > { %1715 = vmatpush3.bf16.msra.mxu1 %v1712_v57  ;;  %v603_v58 = vpop.xlane.xlu1 %602 }
 0x2a2   : > { %v606_v59 = vpop.xlane.xlu1 %605 }
 0x2a3   : > { %v1716_v60 = vpack.c.bf16 %v606_v59, %v603_v58 }
 0x2a5   : > { %1717 = vmatprep.subr.bf16.mxu1 %v1716_v60 }
 0x2a6   : > { %1719 = vmatpush3.bf16.msra.mxu1 %v1716_v60 }
 0x2a9   : > { %1671 = vmatmul.mubr.msk.f32.vlgmr.msra.gmra.mrb[0].mxu1 %vm457_vm0, %v434_v19  ;;  %v876_v19 = vld [vmem:[%s2178_s7 + $0x18] sm:$0xff] }
 0x2aa   : > { %1673 = vmatprep.mubr.msk.f32.mxu1 %vm457_vm0, %v435_v20  ;;  %v873_v20 = vld [vmem:[%s2178_s7] sm:$0xff] }
 0x2ad   : > { %1674 = vmatmul.mubr.msk.f32.gmra.mrb[2].mxu1 %vm457_vm0, %v436_v21  ;;  %v973_v21 = vld [vmem:[%s2180_s9 + $0x18] sm:$0xff] }
 0x2ae   : > { %945 = vmatprep.mubr.bf16.mxu1 %v1839_v22 }
 0x37c   : > { %v1672_v61 = vpop.f32.mrb[0].mxu1 }
 0x37d   : > { %v693_v62 = vmul.f32 0.0009765625, %v1672_v61  ;;  %v673_v63 = vpop.f32.mrb[1].mxu1 }
 0x37e   : > { %v692_v0 = vmul.f32 0.0009765625, %v673_v63 }
 0x37f   : > { %v697_v1 = vadd.f32 1e-05, %v693_v62 }
 0x380   : > { %v696_v2 = vadd.f32 1e-05, %v692_v0  ;;  %v1675_v3 = vpop.f32.mrb[2].mxu1 }
 0x381   : > { %1783 = vrsqrt.f32 %v697_v1  ;;  %v683_v4 = vpop.f32.mrb[3].mxu1  ;;  %v695_v5 = vmul.f32 0.0009765625, %v1675_v3 }
 0x382   : > { %1785 = vrsqrt.f32 %v696_v2  ;;  %v694_v6 = vmul.f32 0.0009765625, %v683_v4 }
 0x383   : > { %v699_v8 = vadd.f32 1e-05, %v695_v5 }
 0x384   : > { %v698_v7 = vadd.f32 1e-05, %v694_v6 }
 0x386   : > { %1787 = vrsqrt.f32 %v698_v7 }
 0x387   : > { %1789 = vrsqrt.f32 %v699_v8 }
 0x38b   : > { %v1784_v9 = vpop.eup %1783 }
 0x38c   : > { %v1786_v10 = vpop.eup %1785  ;;  %711 = vperm.xlu0 %1769, %v1784_v9  }
 0x38d   : > { %706 = vperm.xlu1 %1770, %v1786_v10  }
 0x390   : > { %v1788_v12 = vpop.eup %1787  ;;  %747 = vperm.xlu0 %1769, %v737_v11  }
 0x391   : > { %716 = vperm.xlu1 %1770, %v1788_v12   ;;  %v1790_v14 = vpop.eup %1789 }
 0x394   : > { %757 = vperm.xlu0 %1769, %v739_v13  }
 0x395   : > { %721 = vperm.xlu1 %1770, %v1790_v14  }
 0x398   : > { %884 = vperm.xlu0 %1769, %v874_v15  }
 0x399   : > { %742 = vperm.xlu1 %1770, %v736_v16  }
 0x39c   : > { %981 = vperm.xlu0 %1769, %v971_v17  }
 0x39d   : > { %752 = vperm.xlu1 %1770, %v738_v18  }
 0x3a0   : > { %894 = vperm.xlu0 %1769, %v876_v19  }
 0x3a1   : > { %879 = vperm.xlu1 %1770, %v873_v20  }
 0x3a4   : > { %991 = vperm.xlu0 %1769, %v973_v21  }
 0x3a5   : > { %976 = vperm.xlu1 %1770, %v970_v23  }
 0x3a9   : > { %889 = vperm.xlu1 %1770, %v875_v24  }
 0x3ad   : > { %986 = vperm.xlu1 %1770, %v972_v25  }
 0x40b   : > { %v712_v26 = vpop.permute.xlu0 %711 }
 0x40c   : > { %v726_v27 = vmul.f32 %v712_v26, %v1948_v32  ;;  %v727_v28 = vmul.f32 %v712_v26, %v1950_v33  ;;  %v707_v29 = vpop.permute.xlu1 %706 }
 0x40d   : > { %v724_v30 = vmul.f32 %v707_v29, %v1952_v35  ;;  %v725_v31 = vmul.f32 %v707_v29, %v1954_v36  ;;  %v1771_v36 = vld [vmem:[%s2175_s4] sm:$0xff]  }
 0x40f   : > { %v732_v34 = vpack.c.bf16 %v726_v27, %v724_v30  ;;  %v733_v37 = vpack.c.bf16 %v727_v28, %v725_v31  ;;  %v748_v48 = vpop.permute.xlu0 %747 }
 0x410   : > { %v717_v38 = vpop.permute.xlu1 %716 }
 0x411   : > { %776 = vmatprep.subr.bf16.mxu0 %v733_v37  ;;  %v728_v40 = vmul.f32 %v717_v38, %v1965_v43  ;;  %v729_v41 = vmul.f32 %v717_v38, %v1968_v44  ;;  %v1772_v43 = vld [vmem:[%s2175_s4 + $0x8] sm:$0xff]  }
 0x412   : > { %777 = vmatpush1.bf16.msra.mxu0 %v732_v34 }
 0x413   : > { %v758_v62 = vpop.permute.xlu0 %757 }
 0x414   : > { %v722_v39 = vpop.permute.xlu1 %721 }
 0x415   : > { %v730_v32 = vmul.f32 %v722_v39, %v1975_v49  ;;  %v731_v33 = vmul.f32 %v722_v39, %v1978_v50 }
 0x417   : > { %v734_v42 = vpack.c.bf16 %v730_v32, %v728_v40  ;;  %v735_v35 = vpack.c.bf16 %v731_v33, %v729_v41 }
 0x418   : > { %v743_v44 = vpop.permute.xlu1 %742 }
 0x419   : > { %778 = vmatprep.subr.bf16.mxu0 %v735_v35 }
 0x41a   : > { %779 = vmatpush1.bf16.msra.mxu0 %v734_v42 }
 0x41c   : > { %v753_v58 = vpop.permute.xlu1 %752 }
 0x41d   : > { %1580 = vmatmul.mubr.msk.bf16.vlgmr.msra.gmra.mrb[4].mxu0 %vm457_vm0, %v1771_v36 }
 0x41e   : > { %818 = vmatprep.mubr.bf16.mxu0 %v1839_v22 }
 0x425   : > { %1581 = vmatmul.mubr.msk.bf16.gmra.mrb[8].mxu0 %vm457_vm0, %v1772_v43 }
 0x4f0   : > { %v810_v45 = vpop.f32.mrb[4].mxu0 }
 0x4f1   : > { %v811_v46 = vadd.f32 %v810_v45, %v743_v44  ;;  %v812_v47 = vpop.f32.mrb[5].mxu0  ;;  %v1776_v45 = vld [vmem:[%s2047_s30 + $0x4] ss:$8 sps:$4 sm:$0xff]  }
 0x4f2   : > { %v813_v49 = vadd.f32 %v812_v47, %v743_v44  ;;  %v814_v50 = vpop.f32.mrb[6].mxu0  ;;  %v1774_v47 = vld [vmem:[%s2047_s30] ss:$8 sps:$4 sm:$0xff]  }
 0x4f3   : > { %v837_v51 = vmul.f32 0.70710677, %v811_v46  ;;  %v815_v52 = vadd.f32 %v814_v50, %v748_v48  ;;  %v816_v53 = vpop.f32.mrb[7].mxu0  ;;  %v829_v14 = vmul.f32 0.5, %v811_v46  ;;  %v1773_v46 = vld [vmem:[%s2177_s6] sm:$0xff]   ;;  %v1777_v50 = vld [vmem:[%s2177_s6 + $0x8] sm:$0xff]  }
 0x4f4   : > { %v838_v54 = vmul.f32 0.70710677, %v813_v49  ;;  %v817_v55 = vadd.f32 %v816_v53, %v748_v48  ;;  %v830_v17 = vmul.f32 0.5, %v813_v49  ;;  %v1780_v48 = vld [vmem:[%s2047_s30 + $0x14] ss:$8 sps:$4 sm:$0xff]   ;;  %v880_v53 = vpop.permute.xlu1 %879 }
 0x4f5   : > { %1791 = verf.f32 %v837_v51  ;;  %v839_v56 = vmul.f32 0.70710677, %v815_v52  ;;  %v831_v15 = vmul.f32 0.5, %v815_v52  ;;  %v1778_v49 = vld [vmem:[%s2047_s30 + $0x10] ss:$8 sps:$4 sm:$0xff]   ;;  %v1781_v51 = vld [vmem:[%s2179_s8] sm:$0xff]  }
 0x4f6   : > { %1793 = verf.f32 %v838_v54  ;;  %v840_v57 = vmul.f32 0.70710677, %v817_v55  ;;  %v832_v18 = vmul.f32 0.5, %v817_v55  ;;  %v1782_v52 = vld [vmem:[%s2179_s8 + $0x8] sm:$0xff]   ;;  %v885_v54 = vpop.permute.xlu0 %884 }
 0x4f7   : > { %1795 = verf.f32 %v839_v56 }
 0x4f8   : > { %1797 = verf.f32 %v840_v57  ;;  %v820_v59 = vpop.f32.mrb[8].mxu0  ;;  %v977_v55 = vpop.permute.xlu1 %976 }
 0x4f9   : > { %v821_v60 = vadd.f32 %v820_v59, %v753_v58  ;;  %v822_v61 = vpop.f32.mrb[9].mxu0 }
 0x4fa   : > { %v823_v63 = vadd.f32 %v822_v61, %v753_v58  ;;  %v824_v0 = vpop.f32.mrb[10].mxu0  ;;  %v982_v56 = vpop.permute.xlu0 %981  ;;  %v1736_v58 = vadd.f32 %v977_v55, %v880_v53 }
 0x4fb   : > { %v841_v1 = vmul.f32 0.70710677, %v821_v60  ;;  %v825_v2 = vadd.f32 %v824_v0, %v758_v62  ;;  %v826_v3 = vpop.f32.mrb[11].mxu0  ;;  %v833_v37 = vmul.f32 0.5, %v821_v60  ;;  %v1740_v61 = vadd.f32 %v982_v56, %v885_v54 }
 0x4fc   : > { %v842_v4 = vmul.f32 0.70710677, %v823_v63  ;;  %v827_v5 = vadd.f32 %v826_v3, %v758_v62  ;;  %v834_v40 = vmul.f32 0.5, %v823_v63  ;;  %v890_v57 = vpop.permute.xlu1 %889 }
 0x4fd   : > { %1799 = verf.f32 %v841_v1  ;;  %v843_v6 = vmul.f32 0.70710677, %v825_v2  ;;  %v835_v38 = vmul.f32 0.5, %v825_v2 }
 0x4fe   : > { %1801 = verf.f32 %v842_v4  ;;  %v844_v7 = vmul.f32 0.70710677, %v827_v5  ;;  %v836_v41 = vmul.f32 0.5, %v827_v5  ;;  %v895_v59 = vpop.permute.xlu0 %894 }
 0x4ff   : > { %v1792_v8 = vpop.eup %1791  ;;  %1803 = verf.f32 %v843_v6 }
 0x500   : > { %v1794_v9 = vpop.eup %1793  ;;  %v853_v10 = vadd.f32 1.0, %v1792_v8  ;;  %1805 = verf.f32 %v844_v7  ;;  %v987_v4 = vpop.permute.xlu1 %986 }
 0x501   : > { %v1796_v11 = vpop.eup %1795  ;;  %v854_v12 = vadd.f32 1.0, %v1794_v9 }
 0x502   : > { %v1798_v13 = vpop.eup %1797  ;;  %v855_v16 = vadd.f32 1.0, %v1796_v11  ;;  %v861_v20 = vmul.f32 %v853_v10, %v829_v14  ;;  %v992_v8 = vpop.permute.xlu0 %991  ;;  %v1744_v10 = vadd.f32 %v987_v4, %v890_v57 }
 0x503   : > { %v856_v19 = vadd.f32 1.0, %v1798_v13  ;;  %v862_v23 = vmul.f32 %v854_v12, %v830_v17  ;;  %v1748_v12 = vadd.f32 %v992_v8, %v895_v59  ;;  %v1161_v8 = vld [vmem:[%s2174_s3 + $0x10] sm:$0xff] }
 0x504   : > { %v863_v21 = vmul.f32 %v855_v16, %v831_v15 }
 0x505   : > { %v864_v24 = vmul.f32 %v856_v19, %v832_v18 }
 0x506   : > { %v869_v25 = vpack.c.bf16 %v863_v21, %v861_v20 }
 0x507   : > { %v1800_v26 = vpop.eup %1799  ;;  %v870_v27 = vpack.c.bf16 %v864_v24, %v862_v23 }
 0x508   : > { %v1802_v28 = vpop.eup %1801  ;;  %v857_v29 = vadd.f32 1.0, %v1800_v26 }
 0x509   : > { %v1804_v30 = vpop.eup %1803  ;;  %v858_v31 = vadd.f32 1.0, %v1802_v28  ;;  %913 = vmatprep.subr.bf16.mxu1 %v870_v27 }
 0x50a   : > { %v1806_v34 = vpop.eup %1805  ;;  %v859_v39 = vadd.f32 1.0, %v1804_v30  ;;  %914 = vmatpush1.bf16.msra.mxu1 %v869_v25  ;;  %v865_v33 = vmul.f32 %v857_v29, %v833_v37 }
 0x50b   : > { %v860_v32 = vadd.f32 1.0, %v1806_v34  ;;  %v866_v35 = vmul.f32 %v858_v31, %v834_v40 }
 0x50c   : > { %v867_v42 = vmul.f32 %v859_v39, %v835_v38 }
 0x50d   : > { %v868_v36 = vmul.f32 %v860_v32, %v836_v41 }
 0x50e   : > { %v871_v43 = vpack.c.bf16 %v867_v42, %v865_v33 }
 0x50f   : > { %v872_v44 = vpack.c.bf16 %v868_v36, %v866_v35 }
 0x511   : > { %915 = vmatprep.subr.bf16.mxu1 %v872_v44 }
 0x512   : > { %916 = vmatpush1.bf16.msra.mxu1 %v871_v43 }
 0x513   : > { %1030 = vmatprep.subr.bf16.mxu1 %v1776_v45 }
 0x515   : > { %1584 = vmatmul.mubr.msk.bf16.vlgmr.msra.gmra.mrb[4].mxu1 %vm457_vm0, %v1773_v46 }
 0x516   : > { %1031 = vmatpush1.bf16.msra.mxu1 %v1774_v47  ;;  %955 = vmatprep.mubr.bf16.mxu1 %v1839_v22 }
 0x517   : > { %1032 = vmatprep.subr.bf16.mxu1 %v1780_v48 }
 0x51a   : > { %1033 = vmatpush1.bf16.msra.mxu1 %v1778_v49 }
 0x51d   : > { %1585 = vmatmul.mubr.msk.bf16.gmra.mrb[8].mxu1 %vm457_vm0, %v1777_v50 }
 0x51e   : > { %1062 = vmatprep.mubr.bf16.mxu1 %v1839_v22 }
 0x525   : > { %1592 = vmatmul.mubr.msk.bf16.vlgmr.msra.gmra.mrb[4].mxu1 %vm457_vm0, %v1781_v51 }
 0x526   : > { %1072 = vmatprep.mubr.bf16.mxu1 %v1839_v22 }
 0x52d   : > { %1593 = vmatmul.mubr.msk.bf16.gmra.mrb[8].mxu1 %vm457_vm0, %v1782_v52 }
 0x5f8   : > { %v1064_v60 = vpop.f32.mrb[4].mxu1 }
 0x5f9   : > { %v1737_v62 = vadd.f32 %v1736_v58, %v1064_v60  ;;  %v1066_v63 = vpop.f32.mrb[5].mxu1 }
 0x5fa   : > { %v1739_v0 = vadd.f32 %v1736_v58, %v1066_v63  ;;  %v1068_v1 = vpop.f32.mrb[6].mxu1 }
 0x5fb   : > { %v1099_v22 = vmul.f32 0.70710677, %v1737_v62  ;;  %v1741_v2 = vadd.f32 %v1740_v61, %v1068_v1  ;;  %v1070_v3 = vpop.f32.mrb[7].mxu1  ;;  %v1091_v27 = vmul.f32 0.5, %v1737_v62  ;;  %v1159_v1 = vld [vmem:[%s2174_s3] sm:$0xff] }
 0x5fc   : > { %v1100_v5 = vmul.f32 0.70710677, %v1739_v0  ;;  %v1743_v6 = vadd.f32 %v1740_v61, %v1070_v3  ;;  %v1092_v30 = vmul.f32 0.5, %v1739_v0  ;;  %1684 = vmatprep.mubr.msk.f32.mxu0 %vm457_vm0, %v1159_v1 }
 0x5fd   : > { %1807 = verf.f32 %v1099_v22  ;;  %v1101_v7 = vmul.f32 0.70710677, %v1741_v2  ;;  %v1093_v38 = vmul.f32 0.5, %v1741_v2 }
 0x5fe   : > { %1809 = verf.f32 %v1100_v5  ;;  %v1102_v9 = vmul.f32 0.70710677, %v1743_v6  ;;  %v1094_v41 = vmul.f32 0.5, %v1743_v6 }
 0x5ff   : > { %1811 = verf.f32 %v1101_v7  ;;  %v1160_v7 = vld [vmem:[%s2174_s3 + $0x8] sm:$0xff] }
 0x600   : > { %1813 = verf.f32 %v1102_v9  ;;  %v1074_v11 = vpop.f32.mrb[8].mxu1  ;;  %v1162_v9 = vld [vmem:[%s2174_s3 + $0x18] sm:$0xff] }
 0x601   : > { %v1745_v13 = vadd.f32 %v1744_v10, %v1074_v11  ;;  %v1076_v14 = vpop.f32.mrb[9].mxu1 }
 0x602   : > { %v1747_v15 = vadd.f32 %v1744_v10, %v1076_v14  ;;  %v1078_v16 = vpop.f32.mrb[10].mxu1 }
 0x603   : > { %v1103_v17 = vmul.f32 0.70710677, %v1745_v13  ;;  %v1749_v18 = vadd.f32 %v1748_v12, %v1078_v16  ;;  %v1080_v19 = vpop.f32.mrb[11].mxu1  ;;  %v1095_v47 = vmul.f32 0.5, %v1745_v13 }
 0x604   : > { %v1104_v20 = vmul.f32 0.70710677, %v1747_v15  ;;  %v1751_v21 = vadd.f32 %v1748_v12, %v1080_v19  ;;  %v1096_v50 = vmul.f32 0.5, %v1747_v15 }
 0x605   : > { %1815 = verf.f32 %v1103_v17  ;;  %v1105_v23 = vmul.f32 0.70710677, %v1749_v18  ;;  %v1097_v54 = vmul.f32 0.5, %v1749_v18 }
 0x606   : > { %1817 = verf.f32 %v1104_v20  ;;  %v1106_v24 = vmul.f32 0.70710677, %v1751_v21  ;;  %v1098_v57 = vmul.f32 0.5, %v1751_v21 }
 0x607   : > { %v1808_v25 = vpop.eup %1807  ;;  %1819 = verf.f32 %v1105_v23 }
 0x608   : > { %v1810_v26 = vpop.eup %1809  ;;  %v1115_v28 = vadd.f32 1.0, %v1808_v25  ;;  %1821 = verf.f32 %v1106_v24 }
 0x609   : > { %v1812_v29 = vpop.eup %1811  ;;  %v1116_v31 = vadd.f32 1.0, %v1810_v26 }
 0x60a   : > { %v1814_v34 = vpop.eup %1813  ;;  %v2072_v37 = vmul.f32 %v1115_v28, %v1091_v27  ;;  %v1117_v39 = vadd.f32 1.0, %v1812_v29 }
 0x60b   : > { %v2074_v40 = vmul.f32 %v1116_v31, %v1092_v30  ;;  %v1118_v32 = vadd.f32 1.0, %v1814_v34 }
 0x60c   : > { %v2083_v33 = vmul.f32 %v1117_v39, %v1093_v38 }
 0x60d   : > { %v1612_v42 = vpack.c.bf16 %v2074_v40, %v2072_v37  ;;  %v2087_v35 = vmul.f32 %v1118_v32, %v1094_v41  ;;  %v1163_v36 = vadd.f32 %v2074_v40, %v2072_v37 }
 0x60f   : > { %v1816_v43 = vpop.eup %1815  ;;  %1155 = vst [vmem:[%s2081_s25] sm:$0xff] %v1612_v42  ;;  %v1613_v44 = vpack.c.bf16 %v2087_v35, %v2083_v33  ;;  %1164 = vadd.xlane.f32.xlu1 %v1163_v36  ;;  %v1166_v45 = vadd.f32 %v2087_v35, %v2083_v33 }
 0x610   : > { %v1818_v46 = vpop.eup %1817  ;;  %v1119_v48 = vadd.f32 1.0, %v1816_v43 }
 0x611   : > { %v1820_v49 = vpop.eup %1819  ;;  %1156 = vst [vmem:[%s2081_s25 + $0x8] sm:$0xff] %v1613_v44  ;;  %v1120_v51 = vadd.f32 1.0, %v1818_v46  ;;  %1167 = vadd.xlane.f32.xlu0 %v1166_v45 }
 0x612   : > { %v1822_v52 = vpop.eup %1821  ;;  %v1127_v53 = vmul.f32 %v1119_v48, %v1095_v47  ;;  %v1121_v55 = vadd.f32 1.0, %v1820_v49 }
 0x613   : > { %v1128_v56 = vmul.f32 %v1120_v51, %v1096_v50  ;;  %v1122_v58 = vadd.f32 1.0, %v1822_v52 }
 0x614   : > { %v1129_v59 = vmul.f32 %v1121_v55, %v1097_v54 }
 0x615   : > { %v1614_v60 = vpack.c.bf16 %v1128_v56, %v1127_v53  ;;  %v1130_v61 = vmul.f32 %v1122_v58, %v1098_v57  ;;  %v1169_v62 = vadd.f32 %v1128_v56, %v1127_v53 }
 0x617   : > { %1157 = vst [vmem:[%s2081_s25 + $0x10] sm:$0xff] %v1614_v60  ;;  %v1615_v63 = vpack.c.bf16 %v1130_v61, %v1129_v59  ;;  %1170 = vadd.xlane.f32.xlu0 %v1169_v62  ;;  %v1172_v0 = vadd.f32 %v1130_v61, %v1129_v59 }
 0x619   : > { %1158 = vst [vmem:[%s2081_s25 + $0x18] sm:$0xff] %v1615_v63  ;;  %1173 = vadd.xlane.f32.xlu1 %v1172_v0 }
 0x69c   : > { %v1165_v22 = vpop.xlane.xlu1 %1164 }
 0x69e   : > { %v1168_v2 = vpop.xlane.xlu0 %1167 }
 0x69f   : > { %v1720_v3 = vpack.c.bf16 %v1168_v2, %v1165_v22 }
 0x6a1   : > { %1721 = vmatprep.subr.bf16.mxu0 %v1720_v3 }
 0x6a2   : > { %1723 = vmatpush3.bf16.msra.mxu0 %v1720_v3 }
 0x6a4   : > { %v1171_v4 = vpop.xlane.xlu0 %1170 }
 0x6a6   : > { %v1174_v5 = vpop.xlane.xlu1 %1173 }
 0x6a7   : > { %v1724_v6 = vpack.c.bf16 %v1174_v5, %v1171_v4 }
 0x6a9   : > { %1725 = vmatprep.subr.bf16.mxu0 %v1724_v6 }
 0x6aa   : > { %1727 = vmatpush3.bf16.msra.mxu0 %v1724_v6 }
 0x6ad   : > { %1685 = vmatmul.mubr.msk.f32.vlgmr.msra.gmra.mrb[12].mxu0 %vm457_vm0, %v1160_v7 }
 0x6ae   : > { %1687 = vmatprep.mubr.msk.f32.mxu0 %vm457_vm0, %v1161_v8 }
 0x6b1   : > { %1688 = vmatmul.mubr.msk.f32.gmra.mrb[14].mxu0 %vm457_vm0, %v1162_v9 }
 0x6b2   : > { %1698 = vmatprep.mubr.msk.f32.mxu0 %vm457_vm0, %v1159_v1 }
 0x780   : > { %v1686_v10 = vpop.f32.mrb[12].mxu0 }
 0x781   : > { %v1273_v11 = vmul.f32 0.0009765625, %v1686_v10  ;;  %v1253_v12 = vpop.f32.mrb[13].mxu0 }
 0x782   : > { %v1272_v13 = vmul.f32 0.0009765625, %v1253_v12 }
 0x783   : > { %1283 = vperm.xlu1 %1770, %v1273_v11  }
 0x784   : > { %1278 = vperm.xlu0 %1769, %v1272_v13   ;;  %v1689_v14 = vpop.f32.mrb[14].mxu0 }
 0x785   : > { %v1275_v15 = vmul.f32 0.0009765625, %v1689_v14  ;;  %v1263_v16 = vpop.f32.mrb[15].mxu0 }
 0x786   : > { %v1274_v17 = vmul.f32 0.0009765625, %v1263_v16 }
 0x788   : > { %1293 = vperm.xlu0 %1769, %v1275_v15   ;;  %1288 = vperm.xlu1 %1770, %v1274_v17  }
 0x802   : > { %v1284_v18 = vpop.permute.xlu1 %1283 }
 0x803   : > { %v2117_v19 = vsub.f32 %v2083_v33, %v1284_v18  ;;  %v2120_v20 = vsub.f32 %v2087_v35, %v1284_v18  ;;  %v1279_v21 = vpop.permute.xlu0 %1278 }
 0x804   : > { %v2123_v23 = vsub.f32 %v2072_v37, %v1279_v21  ;;  %v2126_v24 = vsub.f32 %v2074_v40, %v1279_v21 }
 0x805   : > { %v1306_v25 = vmul.f32 %v2117_v19, %v2117_v19  ;;  %v1307_v26 = vmul.f32 %v2120_v20, %v2120_v20 }
 0x806   : > { %v1304_v27 = vmul.f32 %v2123_v23, %v2123_v23  ;;  %v1305_v28 = vmul.f32 %v2126_v24, %v2126_v24 }
 0x807   : > { %v1294_v29 = vpop.permute.xlu0 %1293  ;;  %v1289_v30 = vpop.permute.xlu1 %1288  ;;  %v1315_v31 = vadd.f32 %v1307_v26, %v1306_v25 }
 0x808   : > { %v2136_v34 = vsub.f32 %v1129_v59, %v1294_v29  ;;  %v2138_v37 = vsub.f32 %v1130_v61, %v1294_v29  ;;  %v2140_v38 = vsub.f32 %v1127_v53, %v1289_v30  ;;  %v2142_v39 = vsub.f32 %v1128_v56, %v1289_v30 }
 0x809   : > { %1316 = vadd.xlane.f32.xlu0 %v1315_v31  ;;  %v1312_v40 = vadd.f32 %v1305_v28, %v1304_v27 }
 0x80a   : > { %v1310_v41 = vmul.f32 %v2136_v34, %v2136_v34  ;;  %v1311_v32 = vmul.f32 %v2138_v37, %v2138_v37  ;;  %v1308_v33 = vmul.f32 %v2140_v38, %v2140_v38  ;;  %v1309_v42 = vmul.f32 %v2142_v39, %v2142_v39 }
 0x80b   : > { %1313 = vadd.xlane.f32.xlu1 %v1312_v40 }
 0x80c   : > { %v1321_v35 = vadd.f32 %v1311_v32, %v1310_v41  ;;  %v1318_v36 = vadd.f32 %v1309_v42, %v1308_v33 }
 0x80e   : > { %1319 = vadd.xlane.f32.xlu0 %v1318_v36 }
 0x80f   : > { %1322 = vadd.xlane.f32.xlu1 %v1321_v35 }
 0x896   : > { %v1317_v43 = vpop.xlane.xlu0 %1316 }
 0x898   : > { %v1314_v44 = vpop.xlane.xlu1 %1313 }
 0x899   : > { %v1728_v45 = vpack.c.bf16 %v1317_v43, %v1314_v44 }
 0x89b   : > { %1729 = vmatprep.subr.bf16.mxu0 %v1728_v45  ;;  %v1320_v46 = vpop.xlane.xlu0 %1319 }
 0x89c   : > { %1731 = vmatpush3.bf16.msra.mxu0 %v1728_v45  ;;  %v1323_v47 = vpop.xlane.xlu1 %1322 }
 0x89d   : > { %v1732_v48 = vpack.c.bf16 %v1323_v47, %v1320_v46 }
 0x89f   : > { %1733 = vmatprep.subr.bf16.mxu0 %v1732_v48 }
 0x8a0   : > { %1735 = vmatpush3.bf16.msra.mxu0 %v1732_v48 }
 0x8a3   : > { %1699 = vmatmul.mubr.msk.f32.vlgmr.msra.gmra.mrb[16].mxu0 %vm457_vm0, %v1160_v7 }
 0x8a4   : > { %1701 = vmatprep.mubr.msk.f32.mxu0 %vm457_vm0, %v1161_v8 }
 0x8a7   : > { %1702 = vmatmul.mubr.msk.f32.gmra.mrb[18].mxu0 %vm457_vm0, %v1162_v9 }
 0x976   : > { %v1700_v49 = vpop.f32.mrb[16].mxu0 }
 0x977   : > { %v1410_v50 = vmul.f32 0.0009765625, %v1700_v49  ;;  %v1390_v51 = vpop.f32.mrb[17].mxu0 }
 0x978   : > { %v1409_v52 = vmul.f32 0.0009765625, %v1390_v51 }
 0x979   : > { %v1414_v53 = vadd.f32 1e-05, %v1410_v50 }
 0x97a   : > { %v1413_v54 = vadd.f32 1e-05, %v1409_v52  ;;  %v1703_v55 = vpop.f32.mrb[18].mxu0 }
 0x97b   : > { %1823 = vrsqrt.f32 %v1414_v53  ;;  %v1412_v56 = vmul.f32 0.0009765625, %v1703_v55  ;;  %v1400_v57 = vpop.f32.mrb[19].mxu0 }
 0x97c   : > { %1825 = vrsqrt.f32 %v1413_v54  ;;  %v1411_v58 = vmul.f32 0.0009765625, %v1400_v57 }
 0x97d   : > { %v1416_v59 = vadd.f32 1e-05, %v1412_v56 }
 0x97e   : > { %v1415_v60 = vadd.f32 1e-05, %v1411_v58 }
 0x97f   : > { %1827 = vrsqrt.f32 %v1416_v59 }
 0x980   : > { %1829 = vrsqrt.f32 %v1415_v60 }
 0x985   : > { %v1824_v61 = vpop.eup %1823 }
 0x986   : > { %v1826_v62 = vpop.eup %1825  ;;  %1428 = vperm.xlu1 %1770, %v1824_v61  }
 0x987   : > { %1423 = vperm.xlu0 %1769, %v1826_v62  }
 0x989   : > { %v1828_v63 = vpop.eup %1827 }
 0x98a   : > { %v1830_v0 = vpop.eup %1829 }
 0x98b   : > { %1438 = vperm.xlu0 %1769, %v1828_v63   ;;  %1433 = vperm.xlu1 %1770, %v1830_v0  }
 0xa05   : > { %v1429_v1 = vpop.permute.xlu1 %1428 }
 0xa06   : > { %v1443_v22 = vmul.f32 %v1429_v1, %v2117_v19  ;;  %v1444_v2 = vmul.f32 %v1429_v1, %v2120_v20  ;;  %v1424_v3 = vpop.permute.xlu0 %1423 }
 0xa07   : > { %v1441_v4 = vmul.f32 %v1424_v3, %v2123_v23  ;;  %v1442_v5 = vmul.f32 %v1424_v3, %v2126_v24 }
 0xa08   : > { %1451 = vst [vmem:[%s419_s20 + $0x10] sm:$0xff] %v1443_v22  ;;  %1452 = vst [vmem:[%s419_s20 + $0x18] sm:$0xff] %v1444_v2 }
 0xa09   : > { %1449 = vst [vmem:[%s419_s20] sm:$0xff] %v1441_v4  ;;  %1450 = vst [vmem:[%s419_s20 + $0x8] sm:$0xff] %v1442_v5 }
 0xa0a   : > { %v1439_v6 = vpop.permute.xlu0 %1438  ;;  %v1434_v7 = vpop.permute.xlu1 %1433 }
 0xa0b   : > { %v1447_v8 = vmul.f32 %v1439_v6, %v2136_v34  ;;  %v1448_v9 = vmul.f32 %v1439_v6, %v2138_v37  ;;  %v1445_v10 = vmul.f32 %v1434_v7, %v2140_v38  ;;  %v1446_v11 = vmul.f32 %v1434_v7, %v2142_v39 }
 0xa0d   : > { %1455 = vst [vmem:[%s419_s20 + $0x30] sm:$0xff] %v1447_v8  ;;  %1456 = vst [vmem:[%s419_s20 + $0x38] sm:$0xff] %v1448_v9 }
 0xa0e   : > { %1453 = vst [vmem:[%s419_s20 + $0x20] sm:$0xff] %v1445_v10  ;;  %1454 = vst [vmem:[%s419_s20 + $0x28] sm:$0xff] %v1446_v11 }
 0xa0f PF: > { %s22_s17 = sadd.s32 1, %s1837_s17  }
 0xa10   : > { %p19_p4 = scmp.ge.s32.totalorder %s22_s17, 4  }
 0xa12   :  { %21 = sbr.rel (!%p19_p4) target bundleno = 1 (0x1), region = 105 }

// kernel: _lambda_.9
= control target key start
LH: loop header
LB: loop body
LE: loop exit
PB: predicated region body
PF: predicated region fallthrough
CT: control target
= control target key end

     0   :  { %s1320_s16 = smov 0   ;;  %s1475_s0 = inlined_call_operand.vmem [shape: f32[2,32,256], index: 0, kind: input, shape index: {}]   ;;  %s1476_s1 = inlined_call_operand.vmem [shape: bf16[2,32,256], index: 1, kind: input, shape index: {}]   ;;  %s1477_s2 = inlined_call_operand.<no memory space> [shape: f32[1,1], index: 2, kind: input, shape index: {}, may-alias: {2,3}]   ;;  %s1478_s4 = inlined_call_operand.vmem [shape: bf16[32,32], index: 4, kind: input, shape index: {}]   ;;  %s1479_s5 = inlined_call_operand.vmem [shape: f32[32,1], index: 5, kind: input, shape index: {}]   ;;  %s1480_s6 = inlined_call_operand.vmem [shape: bf16[32,32], index: 6, kind: input, shape index: {}]   ;;  %s1481_s7 = inlined_call_operand.vmem [shape: f32[32,1], index: 7, kind: input, shape index: {}]   ;;  %s1482_s8 = inlined_call_operand.vmem [shape: bf16[32,32], index: 8, kind: input, shape index: {}]   ;;  %s1483_s9 = inlined_call_operand.vmem [shape: f32[32,1], index: 9, kind: input, shape index: {}]   ;;  %s1484_s10 = inlined_call_operand.vmem [shape: bf16[2,32,256], index: 10, kind: output, shape index: {0}]   ;;  %s1485_s11 = inlined_call_operand.vmem [shape: f32[2,32,256], index: 11, kind: output, shape index: {1}]   ;;  %s1486_s3 = inlined_call_operand.<no memory space> [shape: f32[1,1], index: 3, kind: input, shape index: {}, may-alias: {2,3}]  }
   0x1 LB: > { %s1109_s17 = sadd.s32 4294967295, %s1257_s16   ;;  %p1113_p0 = scmp.ge.s32.totalorder %s1257_s16, 1  ;;  %s1257_s16 = sphi %s1320_s16, %s26_s16  }
   0x2   : > { %p354_p1 = scmp.lt.s32.totalorder %s1257_s16, 3 }
   0x4   : > { %p355_p2 = pnand %p1113_p0, %p354_p1 }
   0x5   : > { %p404_p3 = scmp.lt.s32.totalorder (!%p355_p2), %s1109_s17, 1  ;;  %v1259_v40 = vmov (!%p355_p2), 0   ;;  %v514_v41 = vld [vmem:[%s1479_s5 + $0x8] sm:$0xff] (!%p355_p2)  ;;  %v515_v42 = vld [vmem:[%s1479_s5 + $0x10] sm:$0xff] (!%p355_p2)  ;;  %v513_v43 = vld [vmem:[%s1479_s5] sm:$0xff] (!%p355_p2)  ;;  %vm547_vm0 = vcmask (!%p355_p2), 261120  }
   0x6   : > { %358 = sbr.rel (%p355_p2) target bundleno = 1152 (0x480), region = 60  ;;  %586 = vmatprep.mubr.bf16.mxu0 (!%p355_p2), %v1259_v40  ;;  %1190 = vset.pattern.permute.xlu1 (!%p355_p2), %v1259_v40  ;;  %v749_v44 = vld [vmem:[%s1483_s9 + $0x8] sm:$0xff] (!%p355_p2)  ;;  %v516_v45 = vld [vmem:[%s1479_s5 + $0x18] sm:$0xff] (!%p355_p2)  ;;  %v651_v47 = vld [vmem:[%s1481_s7] sm:$0xff] (!%p355_p2) }
   0x7   : > { %1189 = vset.pattern.permute.xlu0 (!%p355_p2), %v1259_v40  ;;  %733 = vmatprep.mubr.bf16.mxu1 (!%p355_p2), %v1259_v40  ;;  %v751_v46 = vld [vmem:[%s1483_s9 + $0x18] sm:$0xff] (!%p355_p2)  ;;  %v652_v48 = vld [vmem:[%s1481_s7 + $0x8] sm:$0xff] (!%p355_p2)  ;;  %v653_v49 = vld [vmem:[%s1481_s7 + $0x10] sm:$0xff] (!%p355_p2) }
   0x8   : > { %v654_v50 = vld [vmem:[%s1481_s7 + $0x18] sm:$0xff] (!%p355_p2)  ;;  %v748_v51 = vld [vmem:[%s1483_s9] sm:$0xff] (!%p355_p2)  ;;  %v750_v52 = vld [vmem:[%s1483_s9 + $0x10] sm:$0xff] (!%p355_p2) }
   0xd   : > { %s1488_s17 = smov (!%p404_p3, %s1109_s17), 1 }
   0xe   : > { %s1144_s3 = sshll.u32 %s1488_s17, 6  ;;  %s1145_s2 = sshll.u32 %s1488_s17, 5 }
   0xf   : > { %s408_s20 = scalar_lea.vmem %s1475_s0, %s1144_s3  ;;  %s1432_s14 = scalar_lea.vmem %s1476_s1, %s1145_s2 }
  0x10   : > { %v437_v0 = vld [vmem:[%s408_s20] sm:$0xff]  ;;  %v438_v1 = vld [vmem:[%s408_s20 + $0x8] sm:$0xff]  ;;  %v439_v5 = vld [vmem:[%s408_s20 + $0x10] sm:$0xff]  ;;  %s1461_s27 = scalar_lea.vmem %s1484_s10, %s1145_s2  ;;  %s423_s30 = scalar_lea.vmem %s1485_s11, %s1144_s3 }
  0x11   : > { %v441_v2 = vld [vmem:[%s408_s20 + $0x20] sm:$0xff]  ;;  %v445_v3 = vadd.f32 %v438_v1, %v437_v0  ;;  %v442_v4 = vld [vmem:[%s408_s20 + $0x28] sm:$0xff]  ;;  %v440_v6 = vld [vmem:[%s408_s20 + $0x18] sm:$0xff] }
  0x12   : > { %v451_v7 = vadd.f32 %v442_v4, %v441_v2  ;;  %v443_v8 = vld [vmem:[%s408_s20 + $0x30] sm:$0xff]  ;;  %v444_v9 = vld [vmem:[%s408_s20 + $0x38] sm:$0xff]  ;;  %v448_v10 = vadd.f32 %v440_v6, %v439_v5 }
  0x13   : > { %446 = vadd.xlane.f32.xlu0 %v445_v3  ;;  %v454_v11 = vadd.f32 %v444_v9, %v443_v8 }
  0x14   : > { %452 = vadd.xlane.f32.xlu1 %v451_v7 }
  0x17   : > { %449 = vadd.xlane.f32.xlu0 %v448_v10 }
  0x18   : > { %455 = vadd.xlane.f32.xlu1 %v454_v11 }
  0xa0   : > { %v447_v12 = vpop.xlane.xlu0 %446 }
  0xa1   : > { %v457_v13 = vmul.f32 0.00390625, %v447_v12  ;;  %v453_v14 = vpop.xlane.xlu1 %452 }
  0xa2   : > { %v459_v15 = vmul.f32 0.00390625, %v453_v14 }
  0xa3   : > { %v1336_v16 = vsub.f32 %v437_v0, %v457_v13  ;;  %v1338_v17 = vsub.f32 %v438_v1, %v457_v13 }
  0xa4   : > { %v1340_v18 = vsub.f32 %v441_v2, %v459_v15  ;;  %v1342_v19 = vsub.f32 %v442_v4, %v459_v15  ;;  %v450_v20 = vpop.xlane.xlu0 %449 }
  0xa5   : > { %v458_v21 = vmul.f32 0.00390625, %v450_v20  ;;  %v456_v22 = vpop.xlane.xlu1 %455  ;;  %v469_v23 = vmul.f32 %v1336_v16, %v1336_v16  ;;  %v470_v24 = vmul.f32 %v1338_v17, %v1338_v17 }
  0xa6   : > { %v460_v25 = vmul.f32 0.00390625, %v456_v22  ;;  %v473_v26 = vmul.f32 %v1340_v18, %v1340_v18  ;;  %v474_v27 = vmul.f32 %v1342_v19, %v1342_v19 }
  0xa7   : > { %v1352_v28 = vsub.f32 %v439_v5, %v458_v21  ;;  %v1354_v29 = vsub.f32 %v440_v6, %v458_v21  ;;  %v477_v30 = vadd.f32 %v470_v24, %v469_v23 }
  0xa8   : > { %v1356_v31 = vsub.f32 %v443_v8, %v460_v25  ;;  %v1358_v32 = vsub.f32 %v444_v9, %v460_v25  ;;  %v483_v33 = vadd.f32 %v474_v27, %v473_v26 }
  0xa9   : > { %478 = vadd.xlane.f32.xlu0 %v477_v30  ;;  %v471_v34 = vmul.f32 %v1352_v28, %v1352_v28  ;;  %v472_v35 = vmul.f32 %v1354_v29, %v1354_v29 }
  0xaa   : > { %v475_v36 = vmul.f32 %v1356_v31, %v1356_v31  ;;  %v476_v37 = vmul.f32 %v1358_v32, %v1358_v32 }
  0xab   : > { %v480_v38 = vadd.f32 %v472_v35, %v471_v34 }
  0xac   : > { %v486_v39 = vadd.f32 %v476_v37, %v475_v36 }
  0xad   : > { %484 = vadd.xlane.f32.xlu0 %v483_v33  ;;  %481 = vadd.xlane.f32.xlu1 %v480_v38 }
  0xb1   : > { %487 = vadd.xlane.f32.xlu1 %v486_v39 }
  0xc2   : > { %524 = vperm.xlu1 %1190, %v514_v41  }
  0xc3   : > { %519 = vperm.xlu0 %1189, %v513_v43  }
  0xc6   : > { %529 = vperm.xlu1 %1190, %v515_v42  }
  0xc7   : > { %759 = vperm.xlu0 %1189, %v749_v44  }
  0xca   : > { %534 = vperm.xlu1 %1190, %v516_v45  }
  0xcb   : > { %769 = vperm.xlu0 %1189, %v751_v46  }
  0xce   : > { %657 = vperm.xlu1 %1190, %v651_v47  }
  0xd2   : > { %662 = vperm.xlu1 %1190, %v652_v48  }
  0xd6   : > { %667 = vperm.xlu1 %1190, %v653_v49  }
  0xda   : > { %672 = vperm.xlu1 %1190, %v654_v50  }
  0xde   : > { %754 = vperm.xlu1 %1190, %v748_v51  }
  0xe2   : > { %764 = vperm.xlu1 %1190, %v750_v52  }
 0x136   : > { %v479_v53 = vpop.xlane.xlu0 %478 }
 0x137   : > { %v489_v54 = vmul.f32 0.00390625, %v479_v53 }
 0x139   : > { %v493_v55 = vadd.f32 1e-05, %v489_v54 }
 0x13a   : > { %v482_v56 = vpop.xlane.xlu1 %481  ;;  %v485_v57 = vpop.xlane.xlu0 %484 }
 0x13b   : > { %v490_v58 = vmul.f32 0.00390625, %v482_v56  ;;  %v491_v59 = vmul.f32 0.00390625, %v485_v57  ;;  %1203 = vrsqrt.f32 %v493_v55 }
 0x13d   : > { %v494_v60 = vadd.f32 1e-05, %v490_v58  ;;  %v495_v61 = vadd.f32 1e-05, %v491_v59 }
 0x13e   : > { %v488_v62 = vpop.xlane.xlu1 %487 }
 0x13f   : > { %1205 = vrsqrt.f32 %v494_v60  ;;  %v492_v63 = vmul.f32 0.00390625, %v488_v62 }
 0x140   : > { %1207 = vrsqrt.f32 %v495_v61 }
 0x141   : > { %v496_v0 = vadd.f32 1e-05, %v492_v63 }
 0x142   : > { %v520_v20 = vpop.permute.xlu0 %519 }
 0x143   : > { %1209 = vrsqrt.f32 %v496_v0 }
 0x145   : > { %v1204_v1 = vpop.eup %1203 }
 0x146   : > { %v502_v3 = vmul.f32 %v1204_v1, %v1338_v17  ;;  %v501_v5 = vmul.f32 %v1204_v1, %v1336_v16  ;;  %v1191_v17 = vld [vmem:[%s1478_s4] sm:$0xff]  }
 0x149   : > { %v1206_v2 = vpop.eup %1205 }
 0x14a   : > { %v504_v4 = vmul.f32 %v1206_v2, %v1354_v29  ;;  %v503_v6 = vmul.f32 %v1206_v2, %v1352_v28  ;;  %v1208_v7 = vpop.eup %1207 }
 0x14b   : > { %v506_v11 = vmul.f32 %v1208_v7, %v1342_v19  ;;  %v505_v13 = vmul.f32 %v1208_v7, %v1340_v18  ;;  %v1192_v18 = vld [vmem:[%s1478_s4 + $0x8] sm:$0xff]   ;;  %v525_v19 = vpop.permute.xlu1 %524 }
 0x14c   : > { %v510_v8 = vpack.c.bf16 %v504_v4, %v502_v3  ;;  %v509_v9 = vpack.c.bf16 %v503_v6, %v501_v5 }
 0x14d   : > { %v1210_v10 = vpop.eup %1209 }
 0x14e   : > { %554 = vmatprep.subr.bf16.mxu0 %v510_v8  ;;  %v508_v12 = vmul.f32 %v1210_v10, %v1358_v32  ;;  %v507_v14 = vmul.f32 %v1210_v10, %v1356_v31 }
 0x14f   : > { %555 = vmatpush1.bf16.msra.mxu0 %v509_v9  ;;  %v530_v29 = vpop.permute.xlu1 %529 }
 0x150   : > { %v512_v15 = vpack.c.bf16 %v508_v12, %v506_v11  ;;  %v511_v16 = vpack.c.bf16 %v507_v14, %v505_v13 }
 0x152   : > { %556 = vmatprep.subr.bf16.mxu0 %v512_v15 }
 0x153   : > { %557 = vmatpush1.bf16.msra.mxu0 %v511_v16  ;;  %v535_v37 = vpop.permute.xlu1 %534 }
 0x156   : > { %1124 = vmatmul.mubr.msk.bf16.vlgmr.msra.gmra.mrb[0].mxu0 %vm547_vm0, %v1191_v17 }
 0x157   : > { %596 = vmatprep.mubr.bf16.mxu0 %v1259_v40 }
 0x15e   : > { %1125 = vmatmul.mubr.msk.bf16.gmra.mrb[4].mxu0 %vm547_vm0, %v1192_v18 }
 0x15f   : > { %723 = vmatprep.mubr.bf16.mxu0 %v1259_v40 }
 0x229   : > { %v588_v21 = vpop.f32.mrb[0].mxu0 }
 0x22a   : > { %v589_v22 = vadd.f32 %v588_v21, %v520_v20  ;;  %v590_v23 = vpop.f32.mrb[1].mxu0  ;;  %v1193_v21 = vld [vmem:[%s1480_s6] sm:$0xff]  }
 0x22b   : > { %v591_v24 = vadd.f32 %v590_v23, %v520_v20  ;;  %v592_v25 = vpop.f32.mrb[2].mxu0  ;;  %v1197_v20 = vld [vmem:[%s1432_s14 + $0x4] ss:$8 sps:$4 sm:$0xff]   ;;  %v1195_v23 = vld [vmem:[%s1432_s14] ss:$8 sps:$4 sm:$0xff]  }
 0x22c   : > { %v615_v26 = vmul.f32 0.70710677, %v589_v22  ;;  %v593_v27 = vadd.f32 %v592_v25, %v525_v19  ;;  %v594_v28 = vpop.f32.mrb[3].mxu0  ;;  %v607_v54 = vmul.f32 0.5, %v589_v22  ;;  %v1194_v22 = vld [vmem:[%s1480_s6 + $0x8] sm:$0xff]  }
 0x22d   : > { %v616_v30 = vmul.f32 0.70710677, %v591_v24  ;;  %v595_v31 = vadd.f32 %v594_v28, %v525_v19  ;;  %v608_v57 = vmul.f32 0.5, %v591_v24  ;;  %v1200_v24 = vld [vmem:[%s1432_s14 + $0x14] ss:$8 sps:$4 sm:$0xff]   ;;  %v658_v28 = vpop.permute.xlu1 %657 }
 0x22e   : > { %1211 = verf.f32 %v615_v26  ;;  %v617_v32 = vmul.f32 0.70710677, %v593_v27  ;;  %v609_v55 = vmul.f32 0.5, %v593_v27  ;;  %v1198_v25 = vld [vmem:[%s1432_s14 + $0x10] ss:$8 sps:$4 sm:$0xff]   ;;  %v1201_v26 = vld [vmem:[%s1482_s8] sm:$0xff]  }
 0x22f   : > { %1213 = verf.f32 %v616_v30  ;;  %v618_v33 = vmul.f32 0.70710677, %v595_v31  ;;  %v610_v58 = vmul.f32 0.5, %v595_v31  ;;  %v1202_v27 = vld [vmem:[%s1482_s8 + $0x8] sm:$0xff]  }
 0x230   : > { %1215 = verf.f32 %v617_v32 }
 0x231   : > { %1217 = verf.f32 %v618_v33  ;;  %v598_v34 = vpop.f32.mrb[4].mxu0 }
 0x232   : > { %v599_v35 = vadd.f32 %v598_v34, %v530_v29  ;;  %v600_v36 = vpop.f32.mrb[5].mxu0 }
 0x233   : > { %v601_v38 = vadd.f32 %v600_v36, %v530_v29  ;;  %v602_v39 = vpop.f32.mrb[6].mxu0  ;;  %v663_v29 = vpop.permute.xlu1 %662 }
 0x234   : > { %v619_v41 = vmul.f32 0.70710677, %v599_v35  ;;  %v603_v42 = vadd.f32 %v602_v39, %v535_v37  ;;  %v604_v43 = vpop.f32.mrb[7].mxu0  ;;  %v611_v8 = vmul.f32 0.5, %v599_v35 }
 0x235   : > { %v620_v44 = vmul.f32 0.70710677, %v601_v38  ;;  %v605_v45 = vadd.f32 %v604_v43, %v535_v37  ;;  %v612_v11 = vmul.f32 0.5, %v601_v38 }
 0x236   : > { %1219 = verf.f32 %v619_v41  ;;  %v621_v46 = vmul.f32 0.70710677, %v603_v42  ;;  %v613_v9 = vmul.f32 0.5, %v603_v42  ;;  %v760_v42 = vpop.permute.xlu0 %759 }
 0x237   : > { %1221 = verf.f32 %v620_v44  ;;  %v622_v47 = vmul.f32 0.70710677, %v605_v45  ;;  %v614_v12 = vmul.f32 0.5, %v605_v45  ;;  %v668_v30 = vpop.permute.xlu1 %667 }
 0x238   : > { %v1212_v48 = vpop.eup %1211  ;;  %1223 = verf.f32 %v621_v46 }
 0x239   : > { %v1214_v49 = vpop.eup %1213  ;;  %v631_v50 = vadd.f32 1.0, %v1212_v48  ;;  %1225 = verf.f32 %v622_v47 }
 0x23a   : > { %v1216_v51 = vpop.eup %1215  ;;  %v632_v52 = vadd.f32 1.0, %v1214_v49 }
 0x23b   : > { %v1218_v53 = vpop.eup %1217  ;;  %v633_v56 = vadd.f32 1.0, %v1216_v51  ;;  %v639_v60 = vmul.f32 %v631_v50, %v607_v54  ;;  %v673_v31 = vpop.permute.xlu1 %672 }
 0x23c   : > { %v634_v59 = vadd.f32 1.0, %v1218_v53  ;;  %v640_v62 = vmul.f32 %v632_v52, %v608_v57 }
 0x23d   : > { %v641_v61 = vmul.f32 %v633_v56, %v609_v55 }
 0x23e   : > { %v642_v63 = vmul.f32 %v634_v59, %v610_v58  ;;  %v770_v58 = vpop.permute.xlu0 %769 }
 0x23f   : > { %v647_v0 = vpack.c.bf16 %v641_v61, %v639_v60  ;;  %v755_v39 = vpop.permute.xlu1 %754 }
 0x240   : > { %v1220_v1 = vpop.eup %1219  ;;  %v648_v2 = vpack.c.bf16 %v642_v63, %v640_v62  ;;  %v1172_v62 = vadd.f32 %v770_v58, %v673_v31 }
 0x241   : > { %v1222_v3 = vpop.eup %1221  ;;  %v635_v4 = vadd.f32 1.0, %v1220_v1 }
 0x242   : > { %v1224_v5 = vpop.eup %1223  ;;  %v636_v6 = vadd.f32 1.0, %v1222_v3  ;;  %691 = vmatprep.subr.bf16.mxu0 %v648_v2  ;;  %1152 = vmatprep.subr.bf16.mxu1 %v648_v2 }
 0x243   : > { %v1226_v7 = vpop.eup %1225  ;;  %v637_v10 = vadd.f32 1.0, %v1224_v5  ;;  %692 = vmatpush1.bf16.msra.mxu0 %v647_v0  ;;  %1154 = vmatpush1.bf16.msra.mxu1 %v647_v0  ;;  %v643_v14 = vmul.f32 %v635_v4, %v611_v8  ;;  %v765_v54 = vpop.permute.xlu1 %764 }
 0x244   : > { %v638_v13 = vadd.f32 1.0, %v1226_v7  ;;  %v644_v16 = vmul.f32 %v636_v6, %v612_v11  ;;  %v1168_v60 = vadd.f32 %v765_v54, %v668_v30 }
 0x245   : > { %v645_v15 = vmul.f32 %v637_v10, %v613_v9 }
 0x246   : > { %v646_v17 = vmul.f32 %v638_v13, %v614_v12 }
 0x247   : > { %v649_v18 = vpack.c.bf16 %v645_v15, %v643_v14 }
 0x248   : > { %v650_v19 = vpack.c.bf16 %v646_v17, %v644_v16 }
 0x24a   : > { %693 = vmatprep.subr.bf16.mxu0 %v650_v19  ;;  %1153 = vmatprep.subr.bf16.mxu1 %v650_v19 }
 0x24b   : > { %694 = vmatpush1.bf16.msra.mxu0 %v649_v18  ;;  %1155 = vmatpush1.bf16.msra.mxu1 %v649_v18 }
 0x24c   : > { %808 = vmatprep.subr.bf16.mxu1 %v1197_v20 }
 0x24e   : > { %1128 = vmatmul.mubr.msk.bf16.vlgmr.msra.gmra.mrb[8].mxu0 %vm547_vm0, %v1193_v21  ;;  %1129 = vmatmul.mubr.msk.bf16.vlgmr.msra.gmra.mrb[0].mxu1 %vm547_vm0, %v1194_v22 }
 0x24f   : > { %809 = vmatpush1.bf16.msra.mxu1 %v1195_v23  ;;  %840 = vmatprep.mubr.bf16.mxu1 %v1259_v40 }
 0x250   : > { %810 = vmatprep.subr.bf16.mxu1 %v1200_v24 }
 0x253   : > { %811 = vmatpush1.bf16.msra.mxu1 %v1198_v25 }
 0x256   : > { %1136 = vmatmul.mubr.msk.bf16.vlgmr.msra.gmra.mrb[4].mxu1 %vm547_vm0, %v1201_v26 }
 0x257   : > { %850 = vmatprep.mubr.bf16.mxu1 %v1259_v40 }
 0x25e   : > { %1137 = vmatmul.mubr.msk.bf16.gmra.mrb[0].mxu1 %vm547_vm0, %v1202_v27 }
 0x321   : > { %v725_v32 = vpop.f32.mrb[8].mxu0 }
 0x322   : > { %v727_v33 = vpop.f32.mrb[9].mxu0  ;;  %v726_v35 = vadd.f32 %v725_v32, %v658_v28 }
 0x323   : > { %v729_v34 = vpop.f32.mrb[10].mxu0  ;;  %v728_v37 = vadd.f32 %v727_v33, %v658_v28 }
 0x324   : > { %v731_v36 = vpop.f32.mrb[11].mxu0  ;;  %v730_v38 = vadd.f32 %v729_v34, %v663_v29  ;;  %v1157_v40 = vadd.f32 %v755_v39, %v726_v35 }
 0x325   : > { %v732_v41 = vadd.f32 %v731_v36, %v663_v29  ;;  %v1160_v44 = vadd.f32 %v755_v39, %v728_v37 }
 0x326   : > { %v1163_v47 = vadd.f32 %v760_v42, %v730_v38 }
 0x327   : > { %v1166_v50 = vadd.f32 %v760_v42, %v732_v41 }
 0x329   : > { %v842_v43 = vpop.f32.mrb[4].mxu1 }
 0x32a   : > { %v1158_v45 = vadd.f32 %v1157_v40, %v842_v43  ;;  %v844_v46 = vpop.f32.mrb[5].mxu1 }
 0x32b   : > { %v1161_v48 = vadd.f32 %v1160_v44, %v844_v46  ;;  %v846_v49 = vpop.f32.mrb[6].mxu1 }
 0x32c   : > { %v877_v51 = vmul.f32 0.70710677, %v1158_v45  ;;  %v1164_v52 = vadd.f32 %v1163_v47, %v846_v49  ;;  %v848_v53 = vpop.f32.mrb[7].mxu1  ;;  %v869_v12 = vmul.f32 0.5, %v1158_v45 }
 0x32d   : > { %v878_v55 = vmul.f32 0.70710677, %v1161_v48  ;;  %v1167_v56 = vadd.f32 %v1166_v50, %v848_v53  ;;  %v870_v15 = vmul.f32 0.5, %v1161_v48 }
 0x32e   : > { %1227 = verf.f32 %v877_v51  ;;  %v879_v57 = vmul.f32 0.70710677, %v1164_v52  ;;  %v871_v19 = vmul.f32 0.5, %v1164_v52 }
 0x32f   : > { %1229 = verf.f32 %v878_v55  ;;  %v880_v59 = vmul.f32 0.70710677, %v1167_v56  ;;  %v872_v22 = vmul.f32 0.5, %v1167_v56 }
 0x330   : > { %1231 = verf.f32 %v879_v57 }
 0x331   : > { %1233 = verf.f32 %v880_v59  ;;  %v852_v61 = vpop.f32.mrb[0].mxu1 }
 0x332   : > { %v1169_v63 = vadd.f32 %v1168_v60, %v852_v61  ;;  %v854_v0 = vpop.f32.mrb[1].mxu1 }
 0x333   : > { %v1171_v1 = vadd.f32 %v1168_v60, %v854_v0  ;;  %v856_v2 = vpop.f32.mrb[2].mxu1 }
 0x334   : > { %v881_v3 = vmul.f32 0.70710677, %v1169_v63  ;;  %v1173_v4 = vadd.f32 %v1172_v62, %v856_v2  ;;  %v858_v5 = vpop.f32.mrb[3].mxu1  ;;  %v873_v32 = vmul.f32 0.5, %v1169_v63 }
 0x335   : > { %v882_v6 = vmul.f32 0.70710677, %v1171_v1  ;;  %v1175_v7 = vadd.f32 %v1172_v62, %v858_v5  ;;  %v874_v35 = vmul.f32 0.5, %v1171_v1 }
 0x336   : > { %1235 = verf.f32 %v881_v3  ;;  %v883_v8 = vmul.f32 0.70710677, %v1173_v4  ;;  %v875_v39 = vmul.f32 0.5, %v1173_v4 }
 0x337   : > { %1237 = verf.f32 %v882_v6  ;;  %v884_v9 = vmul.f32 0.70710677, %v1175_v7  ;;  %v876_v42 = vmul.f32 0.5, %v1175_v7 }
 0x338   : > { %v1228_v10 = vpop.eup %1227  ;;  %1239 = verf.f32 %v883_v8 }
 0x339   : > { %v1230_v11 = vpop.eup %1229  ;;  %v893_v13 = vadd.f32 1.0, %v1228_v10  ;;  %1241 = verf.f32 %v884_v9 }
 0x33a   : > { %v1232_v14 = vpop.eup %1231  ;;  %v894_v16 = vadd.f32 1.0, %v1230_v11 }
 0x33b   : > { %v1234_v17 = vpop.eup %1233  ;;  %v901_v18 = vmul.f32 %v893_v13, %v869_v12  ;;  %v895_v20 = vadd.f32 1.0, %v1232_v14 }
 0x33c   : > { %v902_v21 = vmul.f32 %v894_v16, %v870_v15  ;;  %v896_v23 = vadd.f32 1.0, %v1234_v17 }
 0x33d   : > { %v903_v24 = vmul.f32 %v895_v20, %v871_v19 }
 0x33e   : > { %v1148_v25 = vpack.c.bf16 %v902_v21, %v901_v18  ;;  %v904_v26 = vmul.f32 %v896_v23, %v872_v22  ;;  %v937_v27 = vadd.f32 %v902_v21, %v901_v18 }
 0x340   : > { %v1236_v28 = vpop.eup %1235  ;;  %933 = vst [vmem:[%s1461_s27] sm:$0xff] %v1148_v25  ;;  %v1149_v29 = vpack.c.bf16 %v904_v26, %v903_v24  ;;  %938 = vadd.xlane.f32.xlu1 %v937_v27  ;;  %v940_v30 = vadd.f32 %v904_v26, %v903_v24 }
 0x341   : > { %v1238_v31 = vpop.eup %1237  ;;  %v897_v33 = vadd.f32 1.0, %v1236_v28 }
 0x342   : > { %v1240_v34 = vpop.eup %1239  ;;  %934 = vst [vmem:[%s1461_s27 + $0x8] sm:$0xff] %v1149_v29  ;;  %v898_v36 = vadd.f32 1.0, %v1238_v31  ;;  %941 = vadd.xlane.f32.xlu0 %v940_v30 }
 0x343   : > { %v1242_v37 = vpop.eup %1241  ;;  %v905_v38 = vmul.f32 %v897_v33, %v873_v32  ;;  %v899_v41 = vadd.f32 1.0, %v1240_v34 }
 0x344   : > { %v906_v40 = vmul.f32 %v898_v36, %v874_v35  ;;  %v900_v43 = vadd.f32 1.0, %v1242_v37 }
 0x345   : > { %v907_v44 = vmul.f32 %v899_v41, %v875_v39 }
 0x346   : > { %v1150_v45 = vpack.c.bf16 %v906_v40, %v905_v38  ;;  %v908_v46 = vmul.f32 %v900_v43, %v876_v42  ;;  %v943_v47 = vadd.f32 %v906_v40, %v905_v38 }
 0x348   : > { %935 = vst [vmem:[%s1461_s27 + $0x10] sm:$0xff] %v1150_v45  ;;  %v1151_v48 = vpack.c.bf16 %v908_v46, %v907_v44  ;;  %944 = vadd.xlane.f32.xlu0 %v943_v47  ;;  %v946_v49 = vadd.f32 %v908_v46, %v907_v44 }
 0x34a   : > { %936 = vst [vmem:[%s1461_s27 + $0x18] sm:$0xff] %v1151_v48  ;;  %947 = vadd.xlane.f32.xlu1 %v946_v49 }
 0x3cd   : > { %v939_v50 = vpop.xlane.xlu1 %938 }
 0x3ce   : > { %v949_v51 = vmul.f32 0.00390625, %v939_v50 }
 0x3cf   : > { %v942_v52 = vpop.xlane.xlu0 %941 }
 0x3d0   : > { %v953_v53 = vsub.f32 %v901_v18, %v949_v51  ;;  %v954_v54 = vsub.f32 %v902_v21, %v949_v51  ;;  %v950_v55 = vmul.f32 0.00390625, %v942_v52 }
 0x3d2   : > { %v955_v56 = vsub.f32 %v903_v24, %v950_v55  ;;  %v956_v57 = vsub.f32 %v904_v26, %v950_v55  ;;  %v961_v58 = vmul.f32 %v953_v53, %v953_v53  ;;  %v962_v59 = vmul.f32 %v954_v54, %v954_v54 }
 0x3d4   : > { %v969_v60 = vadd.f32 %v962_v59, %v961_v58  ;;  %v963_v61 = vmul.f32 %v955_v56, %v955_v56  ;;  %v964_v62 = vmul.f32 %v956_v57, %v956_v57 }
 0x3d5   : > { %v945_v63 = vpop.xlane.xlu0 %944 }
 0x3d6   : > { %v951_v0 = vmul.f32 0.00390625, %v945_v63  ;;  %970 = vadd.xlane.f32.xlu0 %v969_v60  ;;  %v972_v1 = vadd.f32 %v964_v62, %v963_v61 }
 0x3d7   : > { %v948_v2 = vpop.xlane.xlu1 %947 }
 0x3d8   : > { %v957_v3 = vsub.f32 %v905_v38, %v951_v0  ;;  %v958_v4 = vsub.f32 %v906_v40, %v951_v0  ;;  %v952_v5 = vmul.f32 0.00390625, %v948_v2  ;;  %973 = vadd.xlane.f32.xlu1 %v972_v1 }
 0x3da   : > { %v959_v6 = vsub.f32 %v907_v44, %v952_v5  ;;  %v960_v7 = vsub.f32 %v908_v46, %v952_v5  ;;  %v965_v8 = vmul.f32 %v957_v3, %v957_v3  ;;  %v966_v9 = vmul.f32 %v958_v4, %v958_v4 }
 0x3dc   : > { %v975_v10 = vadd.f32 %v966_v9, %v965_v8  ;;  %v967_v11 = vmul.f32 %v959_v6, %v959_v6  ;;  %v968_v12 = vmul.f32 %v960_v7, %v960_v7 }
 0x3de   : > { %976 = vadd.xlane.f32.xlu0 %v975_v10  ;;  %v978_v13 = vadd.f32 %v968_v12, %v967_v11 }
 0x3e0   : > { %979 = vadd.xlane.f32.xlu1 %v978_v13 }
 0x463   : > { %v971_v14 = vpop.xlane.xlu0 %970 }
 0x464   : > { %v981_v15 = vmul.f32 0.00390625, %v971_v14 }
 0x465   : > { %v974_v16 = vpop.xlane.xlu1 %973 }
 0x466   : > { %v985_v17 = vadd.f32 1e-05, %v981_v15  ;;  %v982_v18 = vmul.f32 0.00390625, %v974_v16 }
 0x468   : > { %1243 = vrsqrt.f32 %v985_v17  ;;  %v986_v19 = vadd.f32 1e-05, %v982_v18 }
 0x46a   : > { %1245 = vrsqrt.f32 %v986_v19 }
 0x46b   : > { %v977_v20 = vpop.xlane.xlu0 %976 }
 0x46c   : > { %v983_v21 = vmul.f32 0.00390625, %v977_v20 }
 0x46d   : > { %v980_v22 = vpop.xlane.xlu1 %979 }
 0x46e   : > { %v987_v23 = vadd.f32 1e-05, %v983_v21  ;;  %v984_v24 = vmul.f32 0.00390625, %v980_v22 }
 0x470   : > { %1247 = vrsqrt.f32 %v987_v23  ;;  %v988_v25 = vadd.f32 1e-05, %v984_v24 }
 0x472   : > { %v1244_v26 = vpop.eup %1243  ;;  %1249 = vrsqrt.f32 %v988_v25 }
 0x473   : > { %v993_v27 = vmul.f32 %v1244_v26, %v953_v53  ;;  %v994_v28 = vmul.f32 %v1244_v26, %v954_v54 }
 0x474   : > { %v1246_v29 = vpop.eup %1245 }
 0x475   : > { %1001 = vst [vmem:[%s423_s30] sm:$0xff] %v993_v27  ;;  %1002 = vst [vmem:[%s423_s30 + $0x8] sm:$0xff] %v994_v28  ;;  %v995_v30 = vmul.f32 %v1246_v29, %v955_v56  ;;  %v996_v31 = vmul.f32 %v1246_v29, %v956_v57 }
 0x477   : > { %1003 = vst [vmem:[%s423_s30 + $0x10] sm:$0xff] %v995_v30  ;;  %1004 = vst [vmem:[%s423_s30 + $0x18] sm:$0xff] %v996_v31 }
 0x47a   : > { %v1248_v32 = vpop.eup %1247 }
 0x47b   : > { %v997_v33 = vmul.f32 %v1248_v32, %v957_v3  ;;  %v998_v34 = vmul.f32 %v1248_v32, %v958_v4 }
 0x47c   : > { %v1250_v35 = vpop.eup %1249 }
 0x47d   : > { %1005 = vst [vmem:[%s423_s30 + $0x20] sm:$0xff] %v997_v33  ;;  %1006 = vst [vmem:[%s423_s30 + $0x28] sm:$0xff] %v998_v34  ;;  %v999_v36 = vmul.f32 %v1250_v35, %v959_v6  ;;  %v1000_v37 = vmul.f32 %v1250_v35, %v960_v7 }
 0x47f   : > { %1007 = vst [vmem:[%s423_s30 + $0x30] sm:$0xff] %v999_v36  ;;  %1008 = vst [vmem:[%s423_s30 + $0x38] sm:$0xff] %v1000_v37 }
 0x480 PF: > { %s26_s16 = sadd.s32 1, %s1257_s16  }
 0x481   : > { %p23_p4 = scmp.ge.s32.totalorder %s26_s16, 4  }
 0x483   :  { %25 = sbr.rel (!%p23_p4) target bundleno = 1 (0x1), region = 105 }

// kernel: _lambda_.8
= control target key start
LH: loop header
LB: loop body
LE: loop exit
PB: predicated region body
PF: predicated region fallthrough
CT: control target
= control target key end

     0   :  { %s1608_s16 = smov 0   ;;  %s1799_s0 = inlined_call_operand.vmem [shape: f32[2,32,256], index: 0, kind: input, shape index: {}]   ;;  %s1800_s1 = inlined_call_operand.vmem [shape: bf16[2,32,256], index: 1, kind: input, shape index: {}]   ;;  %s1801_s2 = inlined_call_operand.vmem [shape: f32[32,32], index: 2, kind: input, shape index: {}]   ;;  %s1802_s3 = inlined_call_operand.<no memory space> [shape: f32[1,1], index: 3, kind: input, shape index: {}]   ;;  %s1803_s4 = inlined_call_operand.vmem [shape: bf16[32,32], index: 4, kind: input, shape index: {}]   ;;  %s1804_s5 = inlined_call_operand.vmem [shape: f32[32,1], index: 5, kind: input, shape index: {}]   ;;  %s1805_s6 = inlined_call_operand.vmem [shape: bf16[32,32], index: 6, kind: input, shape index: {}]   ;;  %s1806_s7 = inlined_call_operand.vmem [shape: f32[32,1], index: 7, kind: input, shape index: {}]   ;;  %s1807_s8 = inlined_call_operand.vmem [shape: bf16[32,32], index: 8, kind: input, shape index: {}]   ;;  %s1808_s9 = inlined_call_operand.vmem [shape: f32[32,1], index: 9, kind: input, shape index: {}]   ;;  %s1809_s10 = inlined_call_operand.vmem [shape: bf16[2,32,256], index: 10, kind: output, shape index: {0}]   ;;  %s1810_s11 = inlined_call_operand.vmem [shape: f32[2,32,256], index: 11, kind: output, shape index: {1}]  }
   0x1 LB: > { %s1333_s17 = sadd.s32 4294967295, %s1545_s16   ;;  %p1337_p0 = scmp.ge.s32.totalorder %s1545_s16, 1  ;;  %s1545_s16 = sphi %s1608_s16, %s24_s16  }
   0x2   : > { %p352_p1 = scmp.lt.s32.totalorder %s1545_s16, 3 }
   0x4   : > { %p353_p2 = pnand %p1337_p0, %p352_p1 }
   0x5   : > { %p402_p3 = scmp.lt.s32.totalorder (!%p353_p2), %s1333_s17, 1  ;;  %v435_v12 = vld [vmem:[%s1801_s2] sm:$0xff] (!%p353_p2)  ;;  %vm459_vm0 = vcmask (!%p353_p2), 261120   ;;  %v436_v19 = vld [vmem:[%s1801_s2 + $0x8] sm:$0xff] (!%p353_p2)  ;;  %v437_v20 = vld [vmem:[%s1801_s2 + $0x10] sm:$0xff] (!%p353_p2)  ;;  %v1547_v22 = vmov (!%p353_p2), 0  }
   0x6   : > { %356 = sbr.rel (%p353_p2) target bundleno = 1871 (0x74f), region = 60  ;;  %1408 = vmatprep.mubr.msk.f32.mxu0 (!%p353_p2), %vm459_vm0, %v435_v12  ;;  %v438_v21 = vld [vmem:[%s1801_s2 + $0x18] sm:$0xff] (!%p353_p2)  ;;  %1478 = vset.pattern.permute.xlu1 (!%p353_p2), %v1547_v22 }
   0x7   : > { %1477 = vset.pattern.permute.xlu0 (!%p353_p2), %v1547_v22  ;;  %947 = vmatprep.mubr.bf16.mxu1 (!%p353_p2), %v1547_v22 }
   0xd   : > { %s1812_s17 = smov (!%p402_p3, %s1333_s17), 1 }
   0xe   : > { %s1376_s18 = sshll.u32 %s1812_s17, 6  ;;  %s1377_s24 = sshll.u32 %s1812_s17, 5 }
   0xf   : > { %s406_s21 = scalar_lea.vmem %s1799_s0, %s1376_s18  ;;  %s1755_s27 = scalar_lea.vmem %s1800_s1, %s1377_s24 }
  0x10   : > { %v1624_v0 = vld [vmem:[%s406_s21 + $0x20] sm:$0xff]  ;;  %v1626_v1 = vld [vmem:[%s406_s21 + $0x28] sm:$0xff]  ;;  %v1630_v5 = vld [vmem:[%s406_s21 + $0x30] sm:$0xff] }
  0x11   : > { %v439_v2 = vld [vmem:[%s406_s21] sm:$0xff]  ;;  %v453_v3 = vadd.f32 %v1626_v1, %v1624_v0  ;;  %v440_v4 = vld [vmem:[%s406_s21 + $0x8] sm:$0xff]  ;;  %v1632_v6 = vld [vmem:[%s406_s21 + $0x38] sm:$0xff] }
  0x12   : > { %v447_v7 = vadd.f32 %v440_v4, %v439_v2  ;;  %v441_v8 = vld [vmem:[%s406_s21 + $0x10] sm:$0xff]  ;;  %v442_v9 = vld [vmem:[%s406_s21 + $0x18] sm:$0xff]  ;;  %v456_v10 = vadd.f32 %v1632_v6, %v1630_v5  ;;  %s1785_s21 = scalar_lea.vmem %s1809_s10, %s1377_s24  ;;  %s421_s24 = scalar_lea.vmem %s1810_s11, %s1376_s18 }
  0x13   : > { %454 = vadd.xlane.f32.xlu1 %v453_v3  ;;  %v450_v11 = vadd.f32 %v442_v9, %v441_v8 }
  0x14   : > { %448 = vadd.xlane.f32.xlu0 %v447_v7 }
  0x17   : > { %457 = vadd.xlane.f32.xlu1 %v456_v10 }
  0x18   : > { %451 = vadd.xlane.f32.xlu0 %v450_v11  ;;  %v739_v11 = vld [vmem:[%s1804_s5 + $0x8] sm:$0xff] }
  0xa0   : > { %v455_v13 = vpop.xlane.xlu1 %454 }
  0xa1   : > { %v449_v14 = vpop.xlane.xlu0 %448 }
  0xa4   : > { %v458_v15 = vpop.xlane.xlu1 %457 }
  0xa5   : > { %v452_v16 = vpop.xlane.xlu0 %451  ;;  %v1432_v18 = vpack.c.bf16 %v458_v15, %v455_v13  ;;  %v741_v13 = vld [vmem:[%s1804_s5 + $0x18] sm:$0xff]  ;;  %v876_v15 = vld [vmem:[%s1806_s7 + $0x8] sm:$0xff] }
  0xa6   : > { %v1428_v17 = vpack.c.bf16 %v452_v16, %v449_v14  ;;  %v738_v16 = vld [vmem:[%s1804_s5] sm:$0xff] }
  0xa8   : > { %1429 = vmatprep.subr.bf16.mxu0 %v1428_v17 }
  0xa9   : > { %1431 = vmatpush3.bf16.msra.mxu0 %v1428_v17  ;;  %v878_v17 = vld [vmem:[%s1806_s7 + $0x18] sm:$0xff] }
  0xaa   : > { %1433 = vmatprep.subr.bf16.mxu0 %v1432_v18 }
  0xad   : > { %1435 = vmatpush3.bf16.msra.mxu0 %v1432_v18  ;;  %v740_v18 = vld [vmem:[%s1804_s5 + $0x10] sm:$0xff] }
  0xb0   : > { %1409 = vmatmul.mubr.msk.f32.vlgmr.msra.gmra.mrb[0].mxu0 %vm459_vm0, %v436_v19 }
  0xb1   : > { %1411 = vmatprep.mubr.msk.f32.mxu0 %vm459_vm0, %v437_v20 }
  0xb4   : > { %1412 = vmatmul.mubr.msk.f32.gmra.mrb[2].mxu0 %vm459_vm0, %v438_v21 }
  0xb5   : > { %1422 = vmatprep.mubr.msk.f32.mxu0 %vm459_vm0, %v435_v12 }
 0x183   : > { %v1410_v23 = vpop.f32.mrb[0].mxu0 }
 0x184   : > { %v558_v24 = vmul.f32 0.0009765625, %v1410_v23  ;;  %v538_v25 = vpop.f32.mrb[1].mxu0  ;;  %v877_v23 = vld [vmem:[%s1806_s7 + $0x10] sm:$0xff] }
 0x185   : > { %v557_v26 = vmul.f32 0.0009765625, %v538_v25  ;;  %v974_v25 = vld [vmem:[%s1808_s9 + $0x10] sm:$0xff] }
 0x186   : > { %568 = vperm.xlu1 %1478, %v558_v24   ;;  %v972_v24 = vld [vmem:[%s1808_s9] sm:$0xff] }
 0x187   : > { %563 = vperm.xlu0 %1477, %v557_v26   ;;  %v1413_v27 = vpop.f32.mrb[2].mxu0 }
 0x188   : > { %v548_v28 = vpop.f32.mrb[3].mxu0  ;;  %v560_v30 = vmul.f32 0.0009765625, %v1413_v27 }
 0x189   : > { %v559_v29 = vmul.f32 0.0009765625, %v548_v28 }
 0x18b   : > { %573 = vperm.xlu1 %1478, %v559_v29  }
 0x18f   : > { %578 = vperm.xlu1 %1478, %v560_v30  }
 0x205   : > { %v569_v31 = vpop.permute.xlu1 %568 }
 0x206   : > { %v1656_v32 = vsub.f32 %v441_v8, %v569_v31  ;;  %v1658_v33 = vsub.f32 %v442_v9, %v569_v31  ;;  %v564_v34 = vpop.permute.xlu0 %563 }
 0x207   : > { %v1660_v35 = vsub.f32 %v439_v2, %v564_v34  ;;  %v1662_v36 = vsub.f32 %v440_v4, %v564_v34 }
 0x208   : > { %v591_v37 = vmul.f32 %v1656_v32, %v1656_v32  ;;  %v592_v38 = vmul.f32 %v1658_v33, %v1658_v33 }
 0x209   : > { %v589_v39 = vmul.f32 %v1660_v35, %v1660_v35  ;;  %v590_v40 = vmul.f32 %v1662_v36, %v1662_v36 }
 0x20a   : > { %v574_v41 = vpop.permute.xlu1 %573  ;;  %v600_v42 = vadd.f32 %v592_v38, %v591_v37 }
 0x20b   : > { %v1673_v43 = vsub.f32 %v1624_v0, %v574_v41  ;;  %v1676_v44 = vsub.f32 %v1626_v1, %v574_v41  ;;  %v597_v45 = vadd.f32 %v590_v40, %v589_v39 }
 0x20c   : > { %601 = vadd.xlane.f32.xlu0 %v600_v42 }
 0x20d   : > { %598 = vadd.xlane.f32.xlu1 %v597_v45  ;;  %v593_v46 = vmul.f32 %v1673_v43, %v1673_v43  ;;  %v594_v47 = vmul.f32 %v1676_v44, %v1676_v44 }
 0x20e   : > { %v579_v48 = vpop.permute.xlu1 %578 }
 0x20f   : > { %v1683_v49 = vsub.f32 %v1630_v5, %v579_v48  ;;  %v1686_v50 = vsub.f32 %v1632_v6, %v579_v48  ;;  %v603_v51 = vadd.f32 %v594_v47, %v593_v46 }
 0x211   : > { %604 = vadd.xlane.f32.xlu1 %v603_v51  ;;  %v595_v52 = vmul.f32 %v1683_v49, %v1683_v49  ;;  %v596_v53 = vmul.f32 %v1686_v50, %v1686_v50 }
 0x213   : > { %v606_v54 = vadd.f32 %v596_v53, %v595_v52 }
 0x215   : > { %607 = vadd.xlane.f32.xlu1 %v606_v54 }
 0x299   : > { %v602_v55 = vpop.xlane.xlu0 %601 }
 0x29a   : > { %v599_v56 = vpop.xlane.xlu1 %598 }
 0x29b   : > { %v1436_v57 = vpack.c.bf16 %v602_v55, %v599_v56 }
 0x29d   : > { %1437 = vmatprep.subr.bf16.mxu0 %v1436_v57 }
 0x29e   : > { %1439 = vmatpush3.bf16.msra.mxu0 %v1436_v57  ;;  %v605_v58 = vpop.xlane.xlu1 %604 }
 0x2a2   : > { %v608_v59 = vpop.xlane.xlu1 %607 }
 0x2a3   : > { %v1440_v60 = vpack.c.bf16 %v608_v59, %v605_v58 }
 0x2a5   : > { %1441 = vmatprep.subr.bf16.mxu0 %v1440_v60 }
 0x2a6   : > { %1443 = vmatpush3.bf16.msra.mxu0 %v1440_v60 }
 0x2a9   : > { %1423 = vmatmul.mubr.msk.f32.vlgmr.msra.gmra.mrb[4].mxu0 %vm459_vm0, %v436_v19  ;;  %v973_v19 = vld [vmem:[%s1808_s9 + $0x8] sm:$0xff] }
 0x2aa   : > { %1425 = vmatprep.mubr.msk.f32.mxu0 %vm459_vm0, %v437_v20  ;;  %v875_v20 = vld [vmem:[%s1806_s7] sm:$0xff] }
 0x2ad   : > { %1426 = vmatmul.mubr.msk.f32.gmra.mrb[6].mxu0 %vm459_vm0, %v438_v21  ;;  %v975_v21 = vld [vmem:[%s1808_s9 + $0x18] sm:$0xff] }
 0x2ae   : > { %810 = vmatprep.mubr.bf16.mxu0 %v1547_v22 }
 0x37c   : > { %v1424_v61 = vpop.f32.mrb[4].mxu0 }
 0x37d   : > { %v695_v62 = vmul.f32 0.0009765625, %v1424_v61  ;;  %v675_v63 = vpop.f32.mrb[5].mxu0 }
 0x37e   : > { %v694_v0 = vmul.f32 0.0009765625, %v675_v63 }
 0x37f   : > { %v699_v1 = vadd.f32 1e-05, %v695_v62 }
 0x380   : > { %v698_v2 = vadd.f32 1e-05, %v694_v0  ;;  %v1427_v3 = vpop.f32.mrb[6].mxu0 }
 0x381   : > { %1491 = vrsqrt.f32 %v699_v1  ;;  %v685_v4 = vpop.f32.mrb[7].mxu0  ;;  %v697_v5 = vmul.f32 0.0009765625, %v1427_v3 }
 0x382   : > { %1493 = vrsqrt.f32 %v698_v2  ;;  %v696_v6 = vmul.f32 0.0009765625, %v685_v4 }
 0x383   : > { %v701_v8 = vadd.f32 1e-05, %v697_v5 }
 0x384   : > { %v700_v7 = vadd.f32 1e-05, %v696_v6 }
 0x386   : > { %1495 = vrsqrt.f32 %v700_v7 }
 0x387   : > { %1497 = vrsqrt.f32 %v701_v8 }
 0x38b   : > { %v1492_v9 = vpop.eup %1491 }
 0x38c   : > { %v1494_v10 = vpop.eup %1493  ;;  %713 = vperm.xlu0 %1477, %v1492_v9  }
 0x38d   : > { %708 = vperm.xlu1 %1478, %v1494_v10  }
 0x390   : > { %v1496_v12 = vpop.eup %1495  ;;  %749 = vperm.xlu0 %1477, %v739_v11  }
 0x391   : > { %718 = vperm.xlu1 %1478, %v1496_v12   ;;  %v1498_v14 = vpop.eup %1497 }
 0x394   : > { %759 = vperm.xlu0 %1477, %v741_v13  }
 0x395   : > { %723 = vperm.xlu1 %1478, %v1498_v14  }
 0x398   : > { %886 = vperm.xlu0 %1477, %v876_v15  }
 0x399   : > { %744 = vperm.xlu1 %1478, %v738_v16  }
 0x39c   : > { %896 = vperm.xlu0 %1477, %v878_v17  }
 0x39d   : > { %754 = vperm.xlu1 %1478, %v740_v18  }
 0x3a0   : > { %983 = vperm.xlu0 %1477, %v973_v19  }
 0x3a1   : > { %881 = vperm.xlu1 %1478, %v875_v20  }
 0x3a4   : > { %993 = vperm.xlu0 %1477, %v975_v21  }
 0x3a5   : > { %891 = vperm.xlu1 %1478, %v877_v23  }
 0x3a9   : > { %978 = vperm.xlu1 %1478, %v972_v24  }
 0x3ad   : > { %988 = vperm.xlu1 %1478, %v974_v25  }
 0x40b   : > { %v714_v26 = vpop.permute.xlu0 %713 }
 0x40c   : > { %v728_v27 = vmul.f32 %v714_v26, %v1656_v32  ;;  %v729_v28 = vmul.f32 %v714_v26, %v1658_v33  ;;  %v709_v29 = vpop.permute.xlu1 %708 }
 0x40d   : > { %v726_v30 = vmul.f32 %v709_v29, %v1660_v35  ;;  %v727_v31 = vmul.f32 %v709_v29, %v1662_v36  ;;  %v1479_v36 = vld [vmem:[%s1803_s4] sm:$0xff]  }
 0x40f   : > { %v734_v34 = vpack.c.bf16 %v728_v27, %v726_v30  ;;  %v735_v37 = vpack.c.bf16 %v729_v28, %v727_v31  ;;  %v750_v48 = vpop.permute.xlu0 %749 }
 0x410   : > { %v719_v38 = vpop.permute.xlu1 %718 }
 0x411   : > { %778 = vmatprep.subr.bf16.mxu0 %v735_v37  ;;  %v730_v40 = vmul.f32 %v719_v38, %v1673_v43  ;;  %v731_v41 = vmul.f32 %v719_v38, %v1676_v44  ;;  %v1480_v43 = vld [vmem:[%s1803_s4 + $0x8] sm:$0xff]  }
 0x412   : > { %779 = vmatpush1.bf16.msra.mxu0 %v734_v34 }
 0x413   : > { %v760_v62 = vpop.permute.xlu0 %759 }
 0x414   : > { %v724_v39 = vpop.permute.xlu1 %723 }
 0x415   : > { %v732_v32 = vmul.f32 %v724_v39, %v1683_v49  ;;  %v733_v33 = vmul.f32 %v724_v39, %v1686_v50 }
 0x417   : > { %v736_v42 = vpack.c.bf16 %v732_v32, %v730_v40  ;;  %v737_v35 = vpack.c.bf16 %v733_v33, %v731_v41 }
 0x418   : > { %v745_v44 = vpop.permute.xlu1 %744 }
 0x419   : > { %780 = vmatprep.subr.bf16.mxu0 %v737_v35 }
 0x41a   : > { %781 = vmatpush1.bf16.msra.mxu0 %v736_v42 }
 0x41c   : > { %v755_v58 = vpop.permute.xlu1 %754 }
 0x41d   : > { %1356 = vmatmul.mubr.msk.bf16.vlgmr.msra.gmra.mrb[8].mxu0 %vm459_vm0, %v1479_v36 }
 0x41e   : > { %820 = vmatprep.mubr.bf16.mxu0 %v1547_v22 }
 0x425   : > { %1357 = vmatmul.mubr.msk.bf16.gmra.mrb[12].mxu0 %vm459_vm0, %v1480_v43 }
 0x4f0   : > { %v812_v45 = vpop.f32.mrb[8].mxu0 }
 0x4f1   : > { %v813_v46 = vadd.f32 %v812_v45, %v745_v44  ;;  %v814_v47 = vpop.f32.mrb[9].mxu0  ;;  %v1484_v45 = vld [vmem:[%s1755_s27 + $0x4] ss:$8 sps:$4 sm:$0xff]  }
 0x4f2   : > { %v815_v49 = vadd.f32 %v814_v47, %v745_v44  ;;  %v816_v50 = vpop.f32.mrb[10].mxu0  ;;  %v1482_v47 = vld [vmem:[%s1755_s27] ss:$8 sps:$4 sm:$0xff]  }
 0x4f3   : > { %v839_v51 = vmul.f32 0.70710677, %v813_v46  ;;  %v817_v52 = vadd.f32 %v816_v50, %v750_v48  ;;  %v818_v53 = vpop.f32.mrb[11].mxu0  ;;  %v831_v14 = vmul.f32 0.5, %v813_v46  ;;  %v1481_v46 = vld [vmem:[%s1805_s6] sm:$0xff]   ;;  %v1485_v50 = vld [vmem:[%s1805_s6 + $0x8] sm:$0xff]  }
 0x4f4   : > { %v840_v54 = vmul.f32 0.70710677, %v815_v49  ;;  %v819_v55 = vadd.f32 %v818_v53, %v750_v48  ;;  %v832_v17 = vmul.f32 0.5, %v815_v49  ;;  %v1488_v48 = vld [vmem:[%s1755_s27 + $0x14] ss:$8 sps:$4 sm:$0xff]   ;;  %v882_v53 = vpop.permute.xlu1 %881 }
 0x4f5   : > { %1499 = verf.f32 %v839_v51  ;;  %v841_v56 = vmul.f32 0.70710677, %v817_v52  ;;  %v833_v15 = vmul.f32 0.5, %v817_v52  ;;  %v1486_v49 = vld [vmem:[%s1755_s27 + $0x10] ss:$8 sps:$4 sm:$0xff]   ;;  %v1489_v51 = vld [vmem:[%s1807_s8] sm:$0xff]  }
 0x4f6   : > { %1501 = verf.f32 %v840_v54  ;;  %v842_v57 = vmul.f32 0.70710677, %v819_v55  ;;  %v834_v18 = vmul.f32 0.5, %v819_v55  ;;  %v1490_v52 = vld [vmem:[%s1807_s8 + $0x8] sm:$0xff]   ;;  %v887_v54 = vpop.permute.xlu0 %886 }
 0x4f7   : > { %1503 = verf.f32 %v841_v56 }
 0x4f8   : > { %1505 = verf.f32 %v842_v57  ;;  %v822_v59 = vpop.f32.mrb[12].mxu0  ;;  %v892_v55 = vpop.permute.xlu1 %891 }
 0x4f9   : > { %v823_v60 = vadd.f32 %v822_v59, %v755_v58  ;;  %v824_v61 = vpop.f32.mrb[13].mxu0 }
 0x4fa   : > { %v825_v63 = vadd.f32 %v824_v61, %v755_v58  ;;  %v826_v0 = vpop.f32.mrb[14].mxu0  ;;  %v897_v56 = vpop.permute.xlu0 %896 }
 0x4fb   : > { %v843_v1 = vmul.f32 0.70710677, %v823_v60  ;;  %v827_v2 = vadd.f32 %v826_v0, %v760_v62  ;;  %v828_v3 = vpop.f32.mrb[15].mxu0  ;;  %v835_v37 = vmul.f32 0.5, %v823_v60 }
 0x4fc   : > { %v844_v4 = vmul.f32 0.70710677, %v825_v63  ;;  %v829_v5 = vadd.f32 %v828_v3, %v760_v62  ;;  %v836_v40 = vmul.f32 0.5, %v825_v63  ;;  %v979_v57 = vpop.permute.xlu1 %978 }
 0x4fd   : > { %1507 = verf.f32 %v843_v1  ;;  %v845_v6 = vmul.f32 0.70710677, %v827_v2  ;;  %v837_v38 = vmul.f32 0.5, %v827_v2  ;;  %v1444_v59 = vadd.f32 %v979_v57, %v882_v53 }
 0x4fe   : > { %1509 = verf.f32 %v844_v4  ;;  %v846_v7 = vmul.f32 0.70710677, %v829_v5  ;;  %v838_v41 = vmul.f32 0.5, %v829_v5  ;;  %v984_v58 = vpop.permute.xlu0 %983 }
 0x4ff   : > { %v1500_v8 = vpop.eup %1499  ;;  %1511 = verf.f32 %v845_v6  ;;  %v1448_v61 = vadd.f32 %v984_v58, %v887_v54 }
 0x500   : > { %v1502_v9 = vpop.eup %1501  ;;  %1513 = verf.f32 %v846_v7  ;;  %v855_v10 = vadd.f32 1.0, %v1500_v8  ;;  %v989_v4 = vpop.permute.xlu1 %988 }
 0x501   : > { %v1504_v11 = vpop.eup %1503  ;;  %v856_v12 = vadd.f32 1.0, %v1502_v9 }
 0x502   : > { %v1506_v13 = vpop.eup %1505  ;;  %v857_v16 = vadd.f32 1.0, %v1504_v11  ;;  %v863_v20 = vmul.f32 %v855_v10, %v831_v14  ;;  %v994_v8 = vpop.permute.xlu0 %993  ;;  %v1452_v10 = vadd.f32 %v989_v4, %v892_v55 }
 0x503   : > { %v858_v19 = vadd.f32 1.0, %v1506_v13  ;;  %v864_v23 = vmul.f32 %v856_v12, %v832_v17  ;;  %v1456_v12 = vadd.f32 %v994_v8, %v897_v56 }
 0x504   : > { %v865_v21 = vmul.f32 %v857_v16, %v833_v15 }
 0x505   : > { %v866_v24 = vmul.f32 %v858_v19, %v834_v18 }
 0x506   : > { %v871_v25 = vpack.c.bf16 %v865_v21, %v863_v20 }
 0x507   : > { %v1508_v26 = vpop.eup %1507  ;;  %v872_v27 = vpack.c.bf16 %v866_v24, %v864_v23 }
 0x508   : > { %v1510_v28 = vpop.eup %1509  ;;  %v859_v29 = vadd.f32 1.0, %v1508_v26 }
 0x509   : > { %v1512_v30 = vpop.eup %1511  ;;  %v860_v31 = vadd.f32 1.0, %v1510_v28  ;;  %915 = vmatprep.subr.bf16.mxu1 %v872_v27 }
 0x50a   : > { %v1514_v34 = vpop.eup %1513  ;;  %v861_v39 = vadd.f32 1.0, %v1512_v30  ;;  %916 = vmatpush1.bf16.msra.mxu1 %v871_v25  ;;  %v867_v33 = vmul.f32 %v859_v29, %v835_v37 }
 0x50b   : > { %v862_v32 = vadd.f32 1.0, %v1514_v34  ;;  %v868_v35 = vmul.f32 %v860_v31, %v836_v40 }
 0x50c   : > { %v869_v42 = vmul.f32 %v861_v39, %v837_v38 }
 0x50d   : > { %v870_v36 = vmul.f32 %v862_v32, %v838_v41 }
 0x50e   : > { %v873_v43 = vpack.c.bf16 %v869_v42, %v867_v33 }
 0x50f   : > { %v874_v44 = vpack.c.bf16 %v870_v36, %v868_v35 }
 0x511   : > { %917 = vmatprep.subr.bf16.mxu1 %v874_v44 }
 0x512   : > { %918 = vmatpush1.bf16.msra.mxu1 %v873_v43 }
 0x513   : > { %1032 = vmatprep.subr.bf16.mxu1 %v1484_v45 }
 0x515   : > { %1360 = vmatmul.mubr.msk.bf16.vlgmr.msra.gmra.mrb[0].mxu1 %vm459_vm0, %v1481_v46 }
 0x516   : > { %1033 = vmatpush1.bf16.msra.mxu1 %v1482_v47  ;;  %957 = vmatprep.mubr.bf16.mxu1 %v1547_v22 }
 0x517   : > { %1034 = vmatprep.subr.bf16.mxu1 %v1488_v48 }
 0x51a   : > { %1035 = vmatpush1.bf16.msra.mxu1 %v1486_v49 }
 0x51d   : > { %1361 = vmatmul.mubr.msk.bf16.gmra.mrb[4].mxu1 %vm459_vm0, %v1485_v50 }
 0x51e   : > { %1064 = vmatprep.mubr.bf16.mxu1 %v1547_v22 }
 0x525   : > { %1368 = vmatmul.mubr.msk.bf16.vlgmr.msra.gmra.mrb[0].mxu1 %vm459_vm0, %v1489_v51 }
 0x526   : > { %1074 = vmatprep.mubr.bf16.mxu1 %v1547_v22 }
 0x52d   : > { %1369 = vmatmul.mubr.msk.bf16.gmra.mrb[4].mxu1 %vm459_vm0, %v1490_v52 }
 0x5f8   : > { %v1066_v60 = vpop.f32.mrb[0].mxu1 }
 0x5f9   : > { %v1445_v62 = vadd.f32 %v1444_v59, %v1066_v60  ;;  %v1068_v63 = vpop.f32.mrb[1].mxu1 }
 0x5fa   : > { %v1447_v0 = vadd.f32 %v1444_v59, %v1068_v63  ;;  %v1070_v1 = vpop.f32.mrb[2].mxu1 }
 0x5fb   : > { %v1101_v22 = vmul.f32 0.70710677, %v1445_v62  ;;  %v1449_v2 = vadd.f32 %v1448_v61, %v1070_v1  ;;  %v1072_v3 = vpop.f32.mrb[3].mxu1  ;;  %v1093_v27 = vmul.f32 0.5, %v1445_v62 }
 0x5fc   : > { %v1102_v5 = vmul.f32 0.70710677, %v1447_v0  ;;  %v1451_v6 = vadd.f32 %v1448_v61, %v1072_v3  ;;  %v1094_v30 = vmul.f32 0.5, %v1447_v0 }
 0x5fd   : > { %1515 = verf.f32 %v1101_v22  ;;  %v1103_v7 = vmul.f32 0.70710677, %v1449_v2  ;;  %v1095_v38 = vmul.f32 0.5, %v1449_v2 }
 0x5fe   : > { %1517 = verf.f32 %v1102_v5  ;;  %v1104_v9 = vmul.f32 0.70710677, %v1451_v6  ;;  %v1096_v41 = vmul.f32 0.5, %v1451_v6 }
 0x5ff   : > { %1519 = verf.f32 %v1103_v7 }
 0x600   : > { %1521 = verf.f32 %v1104_v9  ;;  %v1076_v11 = vpop.f32.mrb[4].mxu1 }
 0x601   : > { %v1453_v13 = vadd.f32 %v1452_v10, %v1076_v11  ;;  %v1078_v14 = vpop.f32.mrb[5].mxu1 }
 0x602   : > { %v1455_v15 = vadd.f32 %v1452_v10, %v1078_v14  ;;  %v1080_v16 = vpop.f32.mrb[6].mxu1 }
 0x603   : > { %v1105_v17 = vmul.f32 0.70710677, %v1453_v13  ;;  %v1457_v18 = vadd.f32 %v1456_v12, %v1080_v16  ;;  %v1082_v19 = vpop.f32.mrb[7].mxu1  ;;  %v1097_v47 = vmul.f32 0.5, %v1453_v13 }
 0x604   : > { %v1106_v20 = vmul.f32 0.70710677, %v1455_v15  ;;  %v1459_v21 = vadd.f32 %v1456_v12, %v1082_v19  ;;  %v1098_v50 = vmul.f32 0.5, %v1455_v15 }
 0x605   : > { %1523 = verf.f32 %v1105_v17  ;;  %v1107_v23 = vmul.f32 0.70710677, %v1457_v18  ;;  %v1099_v54 = vmul.f32 0.5, %v1457_v18 }
 0x606   : > { %1525 = verf.f32 %v1106_v20  ;;  %v1108_v24 = vmul.f32 0.70710677, %v1459_v21  ;;  %v1100_v57 = vmul.f32 0.5, %v1459_v21 }
 0x607   : > { %v1516_v25 = vpop.eup %1515  ;;  %1527 = verf.f32 %v1107_v23 }
 0x608   : > { %v1518_v26 = vpop.eup %1517  ;;  %v1117_v28 = vadd.f32 1.0, %v1516_v25  ;;  %1529 = verf.f32 %v1108_v24 }
 0x609   : > { %v1520_v29 = vpop.eup %1519  ;;  %v1118_v31 = vadd.f32 1.0, %v1518_v26 }
 0x60a   : > { %v1522_v34 = vpop.eup %1521  ;;  %v1125_v37 = vmul.f32 %v1117_v28, %v1093_v27  ;;  %v1119_v39 = vadd.f32 1.0, %v1520_v29 }
 0x60b   : > { %v1126_v40 = vmul.f32 %v1118_v31, %v1094_v30  ;;  %v1120_v32 = vadd.f32 1.0, %v1522_v34 }
 0x60c   : > { %v1127_v33 = vmul.f32 %v1119_v39, %v1095_v38 }
 0x60d   : > { %v1380_v42 = vpack.c.bf16 %v1126_v40, %v1125_v37  ;;  %v1128_v35 = vmul.f32 %v1120_v32, %v1096_v41  ;;  %v1161_v36 = vadd.f32 %v1126_v40, %v1125_v37 }
 0x60f   : > { %v1524_v43 = vpop.eup %1523  ;;  %1157 = vst [vmem:[%s1785_s21] sm:$0xff] %v1380_v42  ;;  %v1381_v44 = vpack.c.bf16 %v1128_v35, %v1127_v33  ;;  %1162 = vadd.xlane.f32.xlu1 %v1161_v36  ;;  %v1164_v45 = vadd.f32 %v1128_v35, %v1127_v33 }
 0x610   : > { %v1526_v46 = vpop.eup %1525  ;;  %v1121_v48 = vadd.f32 1.0, %v1524_v43 }
 0x611   : > { %v1528_v49 = vpop.eup %1527  ;;  %1158 = vst [vmem:[%s1785_s21 + $0x8] sm:$0xff] %v1381_v44  ;;  %v1122_v51 = vadd.f32 1.0, %v1526_v46  ;;  %1165 = vadd.xlane.f32.xlu0 %v1164_v45 }
 0x612   : > { %v1530_v52 = vpop.eup %1529  ;;  %v1129_v53 = vmul.f32 %v1121_v48, %v1097_v47  ;;  %v1123_v55 = vadd.f32 1.0, %v1528_v49 }
 0x613   : > { %v1130_v56 = vmul.f32 %v1122_v51, %v1098_v50  ;;  %v1124_v58 = vadd.f32 1.0, %v1530_v52 }
 0x614   : > { %v1131_v59 = vmul.f32 %v1123_v55, %v1099_v54 }
 0x615   : > { %v1382_v60 = vpack.c.bf16 %v1130_v56, %v1129_v53  ;;  %v1132_v61 = vmul.f32 %v1124_v58, %v1100_v57  ;;  %v1167_v62 = vadd.f32 %v1130_v56, %v1129_v53 }
 0x617   : > { %1159 = vst [vmem:[%s1785_s21 + $0x10] sm:$0xff] %v1382_v60  ;;  %v1383_v63 = vpack.c.bf16 %v1132_v61, %v1131_v59  ;;  %1168 = vadd.xlane.f32.xlu0 %v1167_v62  ;;  %v1170_v0 = vadd.f32 %v1132_v61, %v1131_v59 }
 0x619   : > { %1160 = vst [vmem:[%s1785_s21 + $0x18] sm:$0xff] %v1383_v63  ;;  %1171 = vadd.xlane.f32.xlu1 %v1170_v0 }
 0x69c   : > { %v1163_v1 = vpop.xlane.xlu1 %1162 }
 0x69d   : > { %v1173_v22 = vmul.f32 0.00390625, %v1163_v1 }
 0x69e   : > { %v1166_v2 = vpop.xlane.xlu0 %1165 }
 0x69f   : > { %v1177_v3 = vsub.f32 %v1125_v37, %v1173_v22  ;;  %v1178_v4 = vsub.f32 %v1126_v40, %v1173_v22  ;;  %v1174_v5 = vmul.f32 0.00390625, %v1166_v2 }
 0x6a1   : > { %v1179_v6 = vsub.f32 %v1127_v33, %v1174_v5  ;;  %v1180_v7 = vsub.f32 %v1128_v35, %v1174_v5  ;;  %v1185_v8 = vmul.f32 %v1177_v3, %v1177_v3  ;;  %v1186_v9 = vmul.f32 %v1178_v4, %v1178_v4 }
 0x6a3   : > { %v1193_v10 = vadd.f32 %v1186_v9, %v1185_v8  ;;  %v1187_v11 = vmul.f32 %v1179_v6, %v1179_v6  ;;  %v1188_v12 = vmul.f32 %v1180_v7, %v1180_v7 }
 0x6a4   : > { %v1169_v13 = vpop.xlane.xlu0 %1168 }
 0x6a5   : > { %v1175_v14 = vmul.f32 0.00390625, %v1169_v13  ;;  %1194 = vadd.xlane.f32.xlu0 %v1193_v10  ;;  %v1196_v15 = vadd.f32 %v1188_v12, %v1187_v11 }
 0x6a6   : > { %v1172_v16 = vpop.xlane.xlu1 %1171 }
 0x6a7   : > { %v1181_v17 = vsub.f32 %v1129_v53, %v1175_v14  ;;  %v1182_v18 = vsub.f32 %v1130_v56, %v1175_v14  ;;  %v1176_v19 = vmul.f32 0.00390625, %v1172_v16  ;;  %1197 = vadd.xlane.f32.xlu1 %v1196_v15 }
 0x6a9   : > { %v1183_v20 = vsub.f32 %v1131_v59, %v1176_v19  ;;  %v1184_v21 = vsub.f32 %v1132_v61, %v1176_v19  ;;  %v1189_v23 = vmul.f32 %v1181_v17, %v1181_v17  ;;  %v1190_v24 = vmul.f32 %v1182_v18, %v1182_v18 }
 0x6ab   : > { %v1199_v25 = vadd.f32 %v1190_v24, %v1189_v23  ;;  %v1191_v26 = vmul.f32 %v1183_v20, %v1183_v20  ;;  %v1192_v27 = vmul.f32 %v1184_v21, %v1184_v21 }
 0x6ad   : > { %1200 = vadd.xlane.f32.xlu0 %v1199_v25  ;;  %v1202_v28 = vadd.f32 %v1192_v27, %v1191_v26 }
 0x6af   : > { %1203 = vadd.xlane.f32.xlu1 %v1202_v28 }
 0x732   : > { %v1195_v29 = vpop.xlane.xlu0 %1194 }
 0x733   : > { %v1205_v30 = vmul.f32 0.00390625, %v1195_v29 }
 0x734   : > { %v1198_v31 = vpop.xlane.xlu1 %1197 }
 0x735   : > { %v1209_v34 = vadd.f32 1e-05, %v1205_v30  ;;  %v1206_v37 = vmul.f32 0.00390625, %v1198_v31 }
 0x737   : > { %1531 = vrsqrt.f32 %v1209_v34  ;;  %v1210_v38 = vadd.f32 1e-05, %v1206_v37 }
 0x739   : > { %1533 = vrsqrt.f32 %v1210_v38 }
 0x73a   : > { %v1201_v39 = vpop.xlane.xlu0 %1200 }
 0x73b   : > { %v1207_v40 = vmul.f32 0.00390625, %v1201_v39 }
 0x73c   : > { %v1204_v41 = vpop.xlane.xlu1 %1203 }
 0x73d   : > { %v1211_v32 = vadd.f32 1e-05, %v1207_v40  ;;  %v1208_v33 = vmul.f32 0.00390625, %v1204_v41 }
 0x73f   : > { %1535 = vrsqrt.f32 %v1211_v32  ;;  %v1212_v42 = vadd.f32 1e-05, %v1208_v33 }
 0x741   : > { %v1532_v35 = vpop.eup %1531  ;;  %1537 = vrsqrt.f32 %v1212_v42 }
 0x742   : > { %v1217_v36 = vmul.f32 %v1532_v35, %v1177_v3  ;;  %v1218_v43 = vmul.f32 %v1532_v35, %v1178_v4 }
 0x743   : > { %v1534_v44 = vpop.eup %1533 }
 0x744   : > { %1225 = vst [vmem:[%s421_s24] sm:$0xff] %v1217_v36  ;;  %1226 = vst [vmem:[%s421_s24 + $0x8] sm:$0xff] %v1218_v43  ;;  %v1219_v45 = vmul.f32 %v1534_v44, %v1179_v6  ;;  %v1220_v46 = vmul.f32 %v1534_v44, %v1180_v7 }
 0x746   : > { %1227 = vst [vmem:[%s421_s24 + $0x10] sm:$0xff] %v1219_v45  ;;  %1228 = vst [vmem:[%s421_s24 + $0x18] sm:$0xff] %v1220_v46 }
 0x749   : > { %v1536_v47 = vpop.eup %1535 }
 0x74a   : > { %v1221_v48 = vmul.f32 %v1536_v47, %v1181_v17  ;;  %v1222_v49 = vmul.f32 %v1536_v47, %v1182_v18 }
 0x74b   : > { %v1538_v50 = vpop.eup %1537 }
 0x74c   : > { %1229 = vst [vmem:[%s421_s24 + $0x20] sm:$0xff] %v1221_v48  ;;  %1230 = vst [vmem:[%s421_s24 + $0x28] sm:$0xff] %v1222_v49  ;;  %v1223_v51 = vmul.f32 %v1538_v50, %v1183_v20  ;;  %v1224_v52 = vmul.f32 %v1538_v50, %v1184_v21 }
 0x74e   : > { %1231 = vst [vmem:[%s421_s24 + $0x30] sm:$0xff] %v1223_v51  ;;  %1232 = vst [vmem:[%s421_s24 + $0x38] sm:$0xff] %v1224_v52 }
 0x74f PF: > { %s24_s16 = sadd.s32 1, %s1545_s16  }
 0x750   : > { %p21_p4 = scmp.ge.s32.totalorder %s24_s16, 4  }
 0x752   :  { %23 = sbr.rel (!%p21_p4) target bundleno = 1 (0x1), region = 105 }

// kernel: _lambda_.10
= control target key start
LH: loop header
LB: loop body
LE: loop exit
PB: predicated region body
PF: predicated region fallthrough
CT: control target
= control target key end

     0   :  { %s1103_s12 = smov 0   ;;  %s1245_s0 = inlined_call_operand.vmem [shape: f32[2,32,256], index: 0, kind: input, shape index: {}]   ;;  %s1246_s1 = inlined_call_operand.vmem [shape: bf16[2,32,256], index: 1, kind: input, shape index: {}]   ;;  %s1247_s2 = inlined_call_operand.<no memory space> [shape: f32[1,1], index: 2, kind: input, shape index: {}, may-alias: {2,3}]   ;;  %s1248_s4 = inlined_call_operand.vmem [shape: bf16[32,32], index: 4, kind: input, shape index: {}]   ;;  %s1249_s5 = inlined_call_operand.vmem [shape: f32[32,1], index: 5, kind: input, shape index: {}]   ;;  %s1250_s6 = inlined_call_operand.vmem [shape: bf16[32,32], index: 6, kind: input, shape index: {}]   ;;  %s1251_s7 = inlined_call_operand.vmem [shape: f32[32,1], index: 7, kind: input, shape index: {}]   ;;  %s1252_s8 = inlined_call_operand.vmem [shape: bf16[32,32], index: 8, kind: input, shape index: {}]   ;;  %s1253_s9 = inlined_call_operand.vmem [shape: f32[32,1], index: 9, kind: input, shape index: {}]   ;;  %s1254_s10 = inlined_call_operand.vmem [shape: bf16[2,32,256], index: 10, kind: output, shape index: {}]   ;;  %s1255_s3 = inlined_call_operand.<no memory space> [shape: f32[1,1], index: 3, kind: input, shape index: {}, may-alias: {2,3}]  }
   0x1 LB: > { %s924_s13 = sadd.s32 4294967295, %s1045_s12   ;;  %p928_p0 = scmp.ge.s32.totalorder %s1045_s12, 1  ;;  %s1045_s12 = sphi %s1103_s12, %s24_s12  }
   0x2   : > { %p326_p1 = scmp.lt.s32.totalorder %s1045_s12, 3 }
   0x4   : > { %p327_p2 = pnand %p928_p0, %p326_p1 }
   0x5   : > { %p369_p3 = scmp.lt.s32.totalorder (!%p327_p2), %s924_s13, 1  ;;  %v1047_v40 = vmov (!%p327_p2), 0   ;;  %v474_v41 = vld [vmem:[%s1249_s5 + $0x8] sm:$0xff] (!%p327_p2)  ;;  %v475_v42 = vld [vmem:[%s1249_s5 + $0x10] sm:$0xff] (!%p327_p2)  ;;  %v473_v43 = vld [vmem:[%s1249_s5] sm:$0xff] (!%p327_p2)  ;;  %vm507_vm0 = vcmask (!%p327_p2), 261120  }
   0x6   : > { %330 = sbr.rel (%p327_p2) target bundleno = 826 (0x33a), region = 60  ;;  %546 = vmatprep.mubr.bf16.mxu0 (!%p327_p2), %v1047_v40  ;;  %1002 = vset.pattern.permute.xlu1 (!%p327_p2), %v1047_v40  ;;  %v709_v44 = vld [vmem:[%s1253_s9 + $0x8] sm:$0xff] (!%p327_p2)  ;;  %v476_v45 = vld [vmem:[%s1249_s5 + $0x18] sm:$0xff] (!%p327_p2)  ;;  %v611_v47 = vld [vmem:[%s1251_s7] sm:$0xff] (!%p327_p2) }
   0x7   : > { %1001 = vset.pattern.permute.xlu0 (!%p327_p2), %v1047_v40  ;;  %693 = vmatprep.mubr.bf16.mxu1 (!%p327_p2), %v1047_v40  ;;  %v711_v46 = vld [vmem:[%s1253_s9 + $0x18] sm:$0xff] (!%p327_p2)  ;;  %v612_v48 = vld [vmem:[%s1251_s7 + $0x8] sm:$0xff] (!%p327_p2)  ;;  %v613_v49 = vld [vmem:[%s1251_s7 + $0x10] sm:$0xff] (!%p327_p2) }
   0x8   : > { %v614_v50 = vld [vmem:[%s1251_s7 + $0x18] sm:$0xff] (!%p327_p2)  ;;  %v708_v51 = vld [vmem:[%s1253_s9] sm:$0xff] (!%p327_p2)  ;;  %v710_v52 = vld [vmem:[%s1253_s9 + $0x10] sm:$0xff] (!%p327_p2) }
   0xd   : > { %s1257_s13 = smov (!%p369_p3, %s924_s13), 1 }
   0xe   : > { %s957_s3 = sshll.u32 %s1257_s13, 6  ;;  %s958_s25 = sshll.u32 %s1257_s13, 5 }
   0xf   : > { %s373_s16 = scalar_lea.vmem %s1245_s0, %s957_s3  ;;  %s1213_s28 = scalar_lea.vmem %s1246_s1, %s958_s25 }
  0x10   : > { %v397_v0 = vld [vmem:[%s373_s16] sm:$0xff]  ;;  %v398_v1 = vld [vmem:[%s373_s16 + $0x8] sm:$0xff]  ;;  %v399_v5 = vld [vmem:[%s373_s16 + $0x10] sm:$0xff]  ;;  %s383_s19 = scalar_lea.vmem %s1254_s10, %s958_s25 }
  0x11   : > { %v401_v2 = vld [vmem:[%s373_s16 + $0x20] sm:$0xff]  ;;  %v405_v3 = vadd.f32 %v398_v1, %v397_v0  ;;  %v402_v4 = vld [vmem:[%s373_s16 + $0x28] sm:$0xff]  ;;  %v400_v6 = vld [vmem:[%s373_s16 + $0x18] sm:$0xff] }
  0x12   : > { %v411_v7 = vadd.f32 %v402_v4, %v401_v2  ;;  %v403_v8 = vld [vmem:[%s373_s16 + $0x30] sm:$0xff]  ;;  %v404_v9 = vld [vmem:[%s373_s16 + $0x38] sm:$0xff]  ;;  %v408_v10 = vadd.f32 %v400_v6, %v399_v5 }
  0x13   : > { %406 = vadd.xlane.f32.xlu0 %v405_v3  ;;  %v414_v11 = vadd.f32 %v404_v9, %v403_v8 }
  0x14   : > { %412 = vadd.xlane.f32.xlu1 %v411_v7 }
  0x17   : > { %409 = vadd.xlane.f32.xlu0 %v408_v10 }
  0x18   : > { %415 = vadd.xlane.f32.xlu1 %v414_v11 }
  0xa0   : > { %v407_v12 = vpop.xlane.xlu0 %406 }
  0xa1   : > { %v417_v13 = vmul.f32 0.00390625, %v407_v12  ;;  %v413_v14 = vpop.xlane.xlu1 %412 }
  0xa2   : > { %v419_v15 = vmul.f32 0.00390625, %v413_v14 }
  0xa3   : > { %v1117_v16 = vsub.f32 %v397_v0, %v417_v13  ;;  %v1119_v17 = vsub.f32 %v398_v1, %v417_v13 }
  0xa4   : > { %v1121_v18 = vsub.f32 %v401_v2, %v419_v15  ;;  %v1123_v19 = vsub.f32 %v402_v4, %v419_v15  ;;  %v410_v20 = vpop.xlane.xlu0 %409 }
  0xa5   : > { %v418_v21 = vmul.f32 0.00390625, %v410_v20  ;;  %v416_v22 = vpop.xlane.xlu1 %415  ;;  %v429_v23 = vmul.f32 %v1117_v16, %v1117_v16  ;;  %v430_v24 = vmul.f32 %v1119_v17, %v1119_v17 }
  0xa6   : > { %v420_v25 = vmul.f32 0.00390625, %v416_v22  ;;  %v433_v26 = vmul.f32 %v1121_v18, %v1121_v18  ;;  %v434_v27 = vmul.f32 %v1123_v19, %v1123_v19 }
  0xa7   : > { %v1133_v28 = vsub.f32 %v399_v5, %v418_v21  ;;  %v1135_v29 = vsub.f32 %v400_v6, %v418_v21  ;;  %v437_v30 = vadd.f32 %v430_v24, %v429_v23 }
  0xa8   : > { %v1137_v31 = vsub.f32 %v403_v8, %v420_v25  ;;  %v1139_v32 = vsub.f32 %v404_v9, %v420_v25  ;;  %v443_v33 = vadd.f32 %v434_v27, %v433_v26 }
  0xa9   : > { %438 = vadd.xlane.f32.xlu0 %v437_v30  ;;  %v431_v34 = vmul.f32 %v1133_v28, %v1133_v28  ;;  %v432_v35 = vmul.f32 %v1135_v29, %v1135_v29 }
  0xaa   : > { %v435_v36 = vmul.f32 %v1137_v31, %v1137_v31  ;;  %v436_v37 = vmul.f32 %v1139_v32, %v1139_v32 }
  0xab   : > { %v440_v38 = vadd.f32 %v432_v35, %v431_v34 }
  0xac   : > { %v446_v39 = vadd.f32 %v436_v37, %v435_v36 }
  0xad   : > { %444 = vadd.xlane.f32.xlu0 %v443_v33  ;;  %441 = vadd.xlane.f32.xlu1 %v440_v38 }
  0xb1   : > { %447 = vadd.xlane.f32.xlu1 %v446_v39 }
  0xc2   : > { %484 = vperm.xlu1 %1002, %v474_v41  }
  0xc3   : > { %479 = vperm.xlu0 %1001, %v473_v43  }
  0xc6   : > { %489 = vperm.xlu1 %1002, %v475_v42  }
  0xc7   : > { %719 = vperm.xlu0 %1001, %v709_v44  }
  0xca   : > { %494 = vperm.xlu1 %1002, %v476_v45  }
  0xcb   : > { %729 = vperm.xlu0 %1001, %v711_v46  }
  0xce   : > { %617 = vperm.xlu1 %1002, %v611_v47  }
  0xd2   : > { %622 = vperm.xlu1 %1002, %v612_v48  }
  0xd6   : > { %627 = vperm.xlu1 %1002, %v613_v49  }
  0xda   : > { %632 = vperm.xlu1 %1002, %v614_v50  }
  0xde   : > { %714 = vperm.xlu1 %1002, %v708_v51  }
  0xe2   : > { %724 = vperm.xlu1 %1002, %v710_v52  }
 0x136   : > { %v439_v53 = vpop.xlane.xlu0 %438 }
 0x137   : > { %v449_v54 = vmul.f32 0.00390625, %v439_v53 }
 0x139   : > { %v453_v55 = vadd.f32 1e-05, %v449_v54 }
 0x13a   : > { %v442_v56 = vpop.xlane.xlu1 %441  ;;  %v445_v57 = vpop.xlane.xlu0 %444 }
 0x13b   : > { %v450_v58 = vmul.f32 0.00390625, %v442_v56  ;;  %v451_v59 = vmul.f32 0.00390625, %v445_v57  ;;  %1015 = vrsqrt.f32 %v453_v55 }
 0x13d   : > { %v454_v60 = vadd.f32 1e-05, %v450_v58  ;;  %v455_v61 = vadd.f32 1e-05, %v451_v59 }
 0x13e   : > { %v448_v62 = vpop.xlane.xlu1 %447 }
 0x13f   : > { %1017 = vrsqrt.f32 %v454_v60  ;;  %v452_v63 = vmul.f32 0.00390625, %v448_v62 }
 0x140   : > { %1019 = vrsqrt.f32 %v455_v61 }
 0x141   : > { %v456_v0 = vadd.f32 1e-05, %v452_v63 }
 0x142   : > { %v480_v20 = vpop.permute.xlu0 %479 }
 0x143   : > { %1021 = vrsqrt.f32 %v456_v0 }
 0x145   : > { %v1016_v1 = vpop.eup %1015 }
 0x146   : > { %v462_v3 = vmul.f32 %v1016_v1, %v1119_v17  ;;  %v461_v5 = vmul.f32 %v1016_v1, %v1117_v16  ;;  %v1003_v17 = vld [vmem:[%s1248_s4] sm:$0xff]  }
 0x149   : > { %v1018_v2 = vpop.eup %1017 }
 0x14a   : > { %v464_v4 = vmul.f32 %v1018_v2, %v1135_v29  ;;  %v463_v6 = vmul.f32 %v1018_v2, %v1133_v28  ;;  %v1020_v7 = vpop.eup %1019 }
 0x14b   : > { %v466_v11 = vmul.f32 %v1020_v7, %v1123_v19  ;;  %v465_v13 = vmul.f32 %v1020_v7, %v1121_v18  ;;  %v1004_v18 = vld [vmem:[%s1248_s4 + $0x8] sm:$0xff]   ;;  %v485_v19 = vpop.permute.xlu1 %484 }
 0x14c   : > { %v470_v8 = vpack.c.bf16 %v464_v4, %v462_v3  ;;  %v469_v9 = vpack.c.bf16 %v463_v6, %v461_v5 }
 0x14d   : > { %v1022_v10 = vpop.eup %1021 }
 0x14e   : > { %514 = vmatprep.subr.bf16.mxu0 %v470_v8  ;;  %v468_v12 = vmul.f32 %v1022_v10, %v1139_v32  ;;  %v467_v14 = vmul.f32 %v1022_v10, %v1137_v31 }
 0x14f   : > { %515 = vmatpush1.bf16.msra.mxu0 %v469_v9  ;;  %v490_v29 = vpop.permute.xlu1 %489 }
 0x150   : > { %v472_v15 = vpack.c.bf16 %v468_v12, %v466_v11  ;;  %v471_v16 = vpack.c.bf16 %v467_v14, %v465_v13 }
 0x152   : > { %516 = vmatprep.subr.bf16.mxu0 %v472_v15 }
 0x153   : > { %517 = vmatpush1.bf16.msra.mxu0 %v471_v16  ;;  %v495_v37 = vpop.permute.xlu1 %494 }
 0x156   : > { %937 = vmatmul.mubr.msk.bf16.vlgmr.msra.gmra.mrb[0].mxu0 %vm507_vm0, %v1003_v17 }
 0x157   : > { %556 = vmatprep.mubr.bf16.mxu0 %v1047_v40 }
 0x15e   : > { %938 = vmatmul.mubr.msk.bf16.gmra.mrb[4].mxu0 %vm507_vm0, %v1004_v18 }
 0x15f   : > { %683 = vmatprep.mubr.bf16.mxu0 %v1047_v40 }
 0x229   : > { %v548_v21 = vpop.f32.mrb[0].mxu0 }
 0x22a   : > { %v549_v22 = vadd.f32 %v548_v21, %v480_v20  ;;  %v550_v23 = vpop.f32.mrb[1].mxu0  ;;  %v1005_v21 = vld [vmem:[%s1250_s6] sm:$0xff]  }
 0x22b   : > { %v551_v24 = vadd.f32 %v550_v23, %v480_v20  ;;  %v552_v25 = vpop.f32.mrb[2].mxu0  ;;  %v1009_v20 = vld [vmem:[%s1213_s28 + $0x4] ss:$8 sps:$4 sm:$0xff]   ;;  %v1007_v23 = vld [vmem:[%s1213_s28] ss:$8 sps:$4 sm:$0xff]  }
 0x22c   : > { %v575_v26 = vmul.f32 0.70710677, %v549_v22  ;;  %v553_v27 = vadd.f32 %v552_v25, %v485_v19  ;;  %v554_v28 = vpop.f32.mrb[3].mxu0  ;;  %v567_v54 = vmul.f32 0.5, %v549_v22  ;;  %v1006_v22 = vld [vmem:[%s1250_s6 + $0x8] sm:$0xff]  }
 0x22d   : > { %v576_v30 = vmul.f32 0.70710677, %v551_v24  ;;  %v555_v31 = vadd.f32 %v554_v28, %v485_v19  ;;  %v568_v57 = vmul.f32 0.5, %v551_v24  ;;  %v1012_v24 = vld [vmem:[%s1213_s28 + $0x14] ss:$8 sps:$4 sm:$0xff]   ;;  %v618_v28 = vpop.permute.xlu1 %617 }
 0x22e   : > { %1023 = verf.f32 %v575_v26  ;;  %v577_v32 = vmul.f32 0.70710677, %v553_v27  ;;  %v569_v55 = vmul.f32 0.5, %v553_v27  ;;  %v1010_v25 = vld [vmem:[%s1213_s28 + $0x10] ss:$8 sps:$4 sm:$0xff]   ;;  %v1013_v26 = vld [vmem:[%s1252_s8] sm:$0xff]  }
 0x22f   : > { %1025 = verf.f32 %v576_v30  ;;  %v578_v33 = vmul.f32 0.70710677, %v555_v31  ;;  %v570_v58 = vmul.f32 0.5, %v555_v31  ;;  %v1014_v27 = vld [vmem:[%s1252_s8 + $0x8] sm:$0xff]  }
 0x230   : > { %1027 = verf.f32 %v577_v32 }
 0x231   : > { %1029 = verf.f32 %v578_v33  ;;  %v558_v34 = vpop.f32.mrb[4].mxu0 }
 0x232   : > { %v559_v35 = vadd.f32 %v558_v34, %v490_v29  ;;  %v560_v36 = vpop.f32.mrb[5].mxu0 }
 0x233   : > { %v561_v38 = vadd.f32 %v560_v36, %v490_v29  ;;  %v562_v39 = vpop.f32.mrb[6].mxu0  ;;  %v623_v29 = vpop.permute.xlu1 %622 }
 0x234   : > { %v579_v41 = vmul.f32 0.70710677, %v559_v35  ;;  %v563_v42 = vadd.f32 %v562_v39, %v495_v37  ;;  %v564_v43 = vpop.f32.mrb[7].mxu0  ;;  %v571_v8 = vmul.f32 0.5, %v559_v35 }
 0x235   : > { %v580_v44 = vmul.f32 0.70710677, %v561_v38  ;;  %v565_v45 = vadd.f32 %v564_v43, %v495_v37  ;;  %v572_v11 = vmul.f32 0.5, %v561_v38 }
 0x236   : > { %1031 = verf.f32 %v579_v41  ;;  %v581_v46 = vmul.f32 0.70710677, %v563_v42  ;;  %v573_v9 = vmul.f32 0.5, %v563_v42  ;;  %v720_v42 = vpop.permute.xlu0 %719 }
 0x237   : > { %1033 = verf.f32 %v580_v44  ;;  %v582_v47 = vmul.f32 0.70710677, %v565_v45  ;;  %v574_v12 = vmul.f32 0.5, %v565_v45  ;;  %v628_v30 = vpop.permute.xlu1 %627 }
 0x238   : > { %v1024_v48 = vpop.eup %1023  ;;  %1035 = verf.f32 %v581_v46 }
 0x239   : > { %v1026_v49 = vpop.eup %1025  ;;  %v591_v50 = vadd.f32 1.0, %v1024_v48  ;;  %1037 = verf.f32 %v582_v47 }
 0x23a   : > { %v1028_v51 = vpop.eup %1027  ;;  %v592_v52 = vadd.f32 1.0, %v1026_v49 }
 0x23b   : > { %v1030_v53 = vpop.eup %1029  ;;  %v593_v56 = vadd.f32 1.0, %v1028_v51  ;;  %v599_v60 = vmul.f32 %v591_v50, %v567_v54  ;;  %v633_v31 = vpop.permute.xlu1 %632 }
 0x23c   : > { %v594_v59 = vadd.f32 1.0, %v1030_v53  ;;  %v600_v62 = vmul.f32 %v592_v52, %v568_v57 }
 0x23d   : > { %v601_v61 = vmul.f32 %v593_v56, %v569_v55  ;;  %v730_v56 = vpop.permute.xlu0 %729 }
 0x23e   : > { %v602_v63 = vmul.f32 %v594_v59, %v570_v58 }
 0x23f   : > { %v607_v0 = vpack.c.bf16 %v601_v61, %v599_v60  ;;  %v715_v39 = vpop.permute.xlu1 %714  ;;  %v984_v60 = vadd.f32 %v730_v56, %v633_v31 }
 0x240   : > { %v1032_v1 = vpop.eup %1031  ;;  %v608_v2 = vpack.c.bf16 %v602_v63, %v600_v62 }
 0x241   : > { %v1034_v3 = vpop.eup %1033  ;;  %v595_v4 = vadd.f32 1.0, %v1032_v1 }
 0x242   : > { %v1036_v5 = vpop.eup %1035  ;;  %v596_v6 = vadd.f32 1.0, %v1034_v3  ;;  %651 = vmatprep.subr.bf16.mxu0 %v608_v2  ;;  %964 = vmatprep.subr.bf16.mxu1 %v608_v2 }
 0x243   : > { %v1038_v7 = vpop.eup %1037  ;;  %v597_v10 = vadd.f32 1.0, %v1036_v5  ;;  %652 = vmatpush1.bf16.msra.mxu0 %v607_v0  ;;  %966 = vmatpush1.bf16.msra.mxu1 %v607_v0  ;;  %v603_v14 = vmul.f32 %v595_v4, %v571_v8  ;;  %v725_v53 = vpop.permute.xlu1 %724 }
 0x244   : > { %v598_v13 = vadd.f32 1.0, %v1038_v7  ;;  %v604_v16 = vmul.f32 %v596_v6, %v572_v11  ;;  %v980_v58 = vadd.f32 %v725_v53, %v628_v30 }
 0x245   : > { %v605_v15 = vmul.f32 %v597_v10, %v573_v9 }
 0x246   : > { %v606_v17 = vmul.f32 %v598_v13, %v574_v12 }
 0x247   : > { %v609_v18 = vpack.c.bf16 %v605_v15, %v603_v14 }
 0x248   : > { %v610_v19 = vpack.c.bf16 %v606_v17, %v604_v16 }
 0x24a   : > { %653 = vmatprep.subr.bf16.mxu0 %v610_v19  ;;  %965 = vmatprep.subr.bf16.mxu1 %v610_v19 }
 0x24b   : > { %654 = vmatpush1.bf16.msra.mxu0 %v609_v18  ;;  %967 = vmatpush1.bf16.msra.mxu1 %v609_v18 }
 0x24c   : > { %768 = vmatprep.subr.bf16.mxu1 %v1009_v20 }
 0x24e   : > { %941 = vmatmul.mubr.msk.bf16.vlgmr.msra.gmra.mrb[8].mxu0 %vm507_vm0, %v1005_v21  ;;  %942 = vmatmul.mubr.msk.bf16.vlgmr.msra.gmra.mrb[0].mxu1 %vm507_vm0, %v1006_v22 }
 0x24f   : > { %769 = vmatpush1.bf16.msra.mxu1 %v1007_v23  ;;  %800 = vmatprep.mubr.bf16.mxu1 %v1047_v40 }
 0x250   : > { %770 = vmatprep.subr.bf16.mxu1 %v1012_v24 }
 0x253   : > { %771 = vmatpush1.bf16.msra.mxu1 %v1010_v25 }
 0x256   : > { %949 = vmatmul.mubr.msk.bf16.vlgmr.msra.gmra.mrb[4].mxu1 %vm507_vm0, %v1013_v26 }
 0x257   : > { %810 = vmatprep.mubr.bf16.mxu1 %v1047_v40 }
 0x25e   : > { %950 = vmatmul.mubr.msk.bf16.gmra.mrb[0].mxu1 %vm507_vm0, %v1014_v27 }
 0x321   : > { %v685_v32 = vpop.f32.mrb[8].mxu0 }
 0x322   : > { %v687_v33 = vpop.f32.mrb[9].mxu0  ;;  %v686_v35 = vadd.f32 %v685_v32, %v618_v28 }
 0x323   : > { %v689_v34 = vpop.f32.mrb[10].mxu0  ;;  %v688_v37 = vadd.f32 %v687_v33, %v618_v28 }
 0x324   : > { %v691_v36 = vpop.f32.mrb[11].mxu0  ;;  %v690_v38 = vadd.f32 %v689_v34, %v623_v29  ;;  %v969_v41 = vadd.f32 %v715_v39, %v686_v35 }
 0x325   : > { %v692_v40 = vadd.f32 %v691_v36, %v623_v29  ;;  %v972_v44 = vadd.f32 %v715_v39, %v688_v37 }
 0x326   : > { %v975_v47 = vadd.f32 %v720_v42, %v690_v38 }
 0x327   : > { %v978_v50 = vadd.f32 %v720_v42, %v692_v40 }
 0x329   : > { %v802_v43 = vpop.f32.mrb[4].mxu1 }
 0x32a   : > { %v970_v45 = vadd.f32 %v969_v41, %v802_v43  ;;  %v804_v46 = vpop.f32.mrb[5].mxu1 }
 0x32b   : > { %v973_v48 = vadd.f32 %v972_v44, %v804_v46  ;;  %v806_v49 = vpop.f32.mrb[6].mxu1 }
 0x32c   : > { %v976_v51 = vadd.f32 %v975_v47, %v806_v49  ;;  %v808_v52 = vpop.f32.mrb[7].mxu1 }
 0x32d   : > { %v960_v54 = vpack.c.bf16 %v973_v48, %v970_v45  ;;  %v979_v55 = vadd.f32 %v978_v50, %v808_v52 }
 0x32f   : > { %853 = vst [vmem:[%s383_s19] sm:$0xff] %v960_v54  ;;  %v961_v57 = vpack.c.bf16 %v979_v55, %v976_v51 }
 0x331   : > { %854 = vst [vmem:[%s383_s19 + $0x8] sm:$0xff] %v961_v57  ;;  %v812_v59 = vpop.f32.mrb[0].mxu1 }
 0x332   : > { %v981_v61 = vadd.f32 %v980_v58, %v812_v59  ;;  %v814_v62 = vpop.f32.mrb[1].mxu1 }
 0x333   : > { %v983_v63 = vadd.f32 %v980_v58, %v814_v62  ;;  %v816_v0 = vpop.f32.mrb[2].mxu1 }
 0x334   : > { %v985_v1 = vadd.f32 %v984_v60, %v816_v0  ;;  %v818_v2 = vpop.f32.mrb[3].mxu1 }
 0x335   : > { %v962_v3 = vpack.c.bf16 %v983_v63, %v981_v61  ;;  %v987_v4 = vadd.f32 %v984_v60, %v818_v2 }
 0x337   : > { %855 = vst [vmem:[%s383_s19 + $0x10] sm:$0xff] %v962_v3  ;;  %v963_v5 = vpack.c.bf16 %v987_v4, %v985_v1 }
 0x339   : > { %856 = vst [vmem:[%s383_s19 + $0x18] sm:$0xff] %v963_v5 }
 0x33a PF: > { %s24_s12 = sadd.s32 1, %s1045_s12  }
 0x33b   : > { %p21_p4 = scmp.ge.s32.totalorder %s24_s12, 4  }
 0x33d   :  { %23 = sbr.rel (!%p21_p4) target bundleno = 1 (0x1), region = 93 }

// kernel: _lambda_.11
= control target key start
LH: loop header
LB: loop body
LE: loop exit
PB: predicated region body
PF: predicated region fallthrough
CT: control target
= control target key end

     0   :  { %s1107_s20 = smov 0   ;;  %s1109_s21 = smov 0   ;;  %s1314_s0 = inlined_call_operand.vmem [shape: bf16[2,32,256], index: 0, kind: input, shape index: {}]   ;;  %s1315_s1 = inlined_call_operand.vmem [shape: bf16[128,32], index: 1, kind: input, shape index: {}]   ;;  %s1316_s2 = inlined_call_operand.vmem [shape: f32[128,1], index: 2, kind: input, shape index: {}]   ;;  %s1317_s3 = inlined_call_operand.vmem [shape: bf16[1,128], index: 3, kind: input, shape index: {}]   ;;  %s1318_s4 = inlined_call_operand.<no memory space> [shape: f32[1,1], index: 4, kind: input, shape index: {}]   ;;  %s1319_s5 = inlined_call_operand.vmem [shape: f32[2,1,256], index: 5, kind: output, shape index: {}]  }
   0x1   :  { %v10_v0 = vstv %s1318_s4  ;;  %s1111_s22 = smov 0  }
   0x2   :  { %11 = vst [vmem:[#allocation2] sm:$0x1] %v10_v0 }
   0x3 LB: > { %s29_s4 = sadd.s32 1, %s1066_s21  ;;  %p915_p0 = scmp.ge.s32.totalorder %s1070_s22, 1  ;;  %s1070_s22 = sphi %s1111_s22, %s17_s22   ;;  %s1066_s21 = sphi %s1109_s21, %s1321_s21   ;;  %s1062_s20 = sphi %s1107_s20, %s1320_s20  }
   0x4   : > { %p31_p1 = scmp.ge.s32.totalorder %s29_s4, 2  ;;  %p210_p2 = scmp.lt.s32.totalorder %s1070_s22, 3 }
   0x6   : > { %s1323_s4 = smov (%p31_p1, %s29_s4), 0  ;;  %p211_p3 = pnand %p915_p0, %p210_p2 }
   0x7   : > { %p246_p4 = scmp.lt.s32.totalorder (!%p211_p3), %s1062_s20, 1  ;;  %v1072_v1 = vmov (!%p211_p3), 0   ;;  %v286_v6 = vld [vmem:[%s1316_s2] sm:$0xff] (!%p211_p3)  ;;  %v288_v7 = vld [vmem:[%s1316_s2 + $0x10] sm:$0xff] (!%p211_p3)  ;;  %vm442_vm0 = vcmask (!%p211_p3), 261120   ;;  %v287_v9 = vld [vmem:[%s1316_s2 + $0x8] sm:$0xff] (!%p211_p3) }
   0x8   : > { %214 = sbr.rel (%p211_p3) target bundleno = 545 (0x221), region = 40  ;;  %499 = vmatprep.mubr.bf16.mxu0 (!%p211_p3), %v1072_v1  ;;  %968 = vset.pattern.permute.xlu0 (!%p211_p3), %v1072_v1  ;;  %v976_v8 = vld [vmem:[%s1315_s1] sm:$0xff] (!%p211_p3)   ;;  %v289_v10 = vld [vmem:[%s1316_s2 + $0x18] sm:$0xff] (!%p211_p3)  ;;  %v291_v12 = vld [vmem:[%s1316_s2 + $0x28] sm:$0xff] (!%p211_p3) }
   0x9   : > { %969 = vset.pattern.permute.xlu1 (!%p211_p3), %v1072_v1  ;;  %798 = vmatprep.mubr.bf16.mxu1 (!%p211_p3), %v1072_v1  ;;  %v290_v11 = vld [vmem:[%s1316_s2 + $0x20] sm:$0xff] (!%p211_p3)  ;;  %v977_v13 = vld [vmem:[%s1315_s1 + $0x8] sm:$0xff] (!%p211_p3)   ;;  %v292_v14 = vld [vmem:[%s1316_s2 + $0x30] sm:$0xff] (!%p211_p3) }
   0xa   : > { %304 = vperm.xlu0 (!%p211_p3), %968, %v286_v6   ;;  %314 = vperm.xlu1 (!%p211_p3), %969, %v288_v7   ;;  %v293_v15 = vld [vmem:[%s1316_s2 + $0x38] sm:$0xff] (!%p211_p3)  ;;  %v294_v16 = vld [vmem:[%s1316_s2 + $0x40] sm:$0xff] (!%p211_p3)  ;;  %v295_v17 = vld [vmem:[%s1316_s2 + $0x48] sm:$0xff] (!%p211_p3) }
   0xb   : > { %v978_v18 = vld [vmem:[%s1315_s1 + $0x10] sm:$0xff] (!%p211_p3)   ;;  %v297_v20 = vld [vmem:[%s1316_s2 + $0x58] sm:$0xff] (!%p211_p3)  ;;  %v298_v21 = vld [vmem:[%s1316_s2 + $0x60] sm:$0xff] (!%p211_p3) }
   0xc   : > { %v296_v19 = vld [vmem:[%s1316_s2 + $0x50] sm:$0xff] (!%p211_p3)  ;;  %v299_v22 = vld [vmem:[%s1316_s2 + $0x68] sm:$0xff] (!%p211_p3)  ;;  %v979_v23 = vld [vmem:[%s1315_s1 + $0x18] sm:$0xff] (!%p211_p3)  }
   0xd   : > { %v300_v24 = vld [vmem:[%s1316_s2 + $0x70] sm:$0xff] (!%p211_p3)  ;;  %v301_v25 = vld [vmem:[%s1316_s2 + $0x78] sm:$0xff] (!%p211_p3)  ;;  %v756_v26 = vld [vmem:[#allocation2] sm:$0x1] (!%p211_p3) }
   0xe   : > { %309 = vperm.xlu0 (!%p211_p3), %968, %v287_v9   ;;  %319 = vperm.xlu1 (!%p211_p3), %969, %v289_v10   ;;  %v980_v27 = vld [vmem:[%s1315_s1 + $0x20] sm:$0xff] (!%p211_p3)   ;;  %v981_v28 = vld [vmem:[%s1315_s1 + $0x28] sm:$0xff] (!%p211_p3)   ;;  %v982_v29 = vld [vmem:[%s1315_s1 + $0x30] sm:$0xff] (!%p211_p3)  }
   0xf   : > { %s1325_s20 = smov (!%p246_p4, %s1062_s20), 1  ;;  %v983_v30 = vld [vmem:[%s1315_s1 + $0x38] sm:$0xff]  }
  0x10   : > { %s941_s23 = sshll.u32 %s1325_s20, 5  ;;  %s918_s8 = sshll.u32 %s1325_s20, 1 }
  0x11   : > { %s253_s26 = scalar_lea.vmem %s1314_s0, %s941_s23  ;;  %s262_s11 = scalar_lea.vmem %s1319_s5, %s918_s8 }
  0x12   : > { %v970_v2 = vld [vmem:[%s253_s26 + $0x4] ss:$8 sps:$4 sm:$0xff]   ;;  %v972_v3 = vld [vmem:[%s253_s26] ss:$8 sps:$4 sm:$0xff]   ;;  %v973_v4 = vld [vmem:[%s253_s26 + $0x14] ss:$8 sps:$4 sm:$0xff]   ;;  %324 = vperm.xlu0 %968, %v290_v11   ;;  %329 = vperm.xlu1 %969, %v291_v12  }
  0x13   : > { %467 = vmatprep.subr.bf16.mxu0 %v970_v2  ;;  %v975_v5 = vld [vmem:[%s253_s26 + $0x10] ss:$8 sps:$4 sm:$0xff]  }
  0x14   : > { %468 = vmatpush1.bf16.msra.mxu0 %v972_v3 }
  0x15   : > { %469 = vmatprep.subr.bf16.mxu0 %v973_v4 }
  0x16   : > { %334 = vperm.xlu0 %968, %v292_v14   ;;  %339 = vperm.xlu1 %969, %v293_v15  }
  0x18   : > { %470 = vmatpush1.bf16.msra.mxu0 %v975_v5 }
  0x1a   : > { %344 = vperm.xlu0 %968, %v294_v16   ;;  %349 = vperm.xlu1 %969, %v295_v17  }
  0x1b   : > { %931 = vmatmul.mubr.msk.bf16.vlgmr.msra.gmra.mrb[0].mxu0 %vm442_vm0, %v976_v8 }
  0x1c   : > { %509 = vmatprep.mubr.bf16.mxu0 %v1072_v1 }
  0x1e   : > { %354 = vperm.xlu0 %968, %v296_v19   ;;  %359 = vperm.xlu1 %969, %v297_v20  }
  0x22   : > { %364 = vperm.xlu0 %968, %v298_v21   ;;  %369 = vperm.xlu1 %969, %v299_v22  }
  0x23   : > { %932 = vmatmul.mubr.msk.bf16.gmra.mrb[4].mxu0 %vm442_vm0, %v977_v13 }
  0x24   : > { %519 = vmatprep.mubr.bf16.mxu0 %v1072_v1 }
  0x26   : > { %374 = vperm.xlu0 %968, %v300_v24   ;;  %379 = vperm.xlu1 %969, %v301_v25  }
  0x2a   : > { %759 = vperm.xlu0 %968, %v756_v26  }
  0x2b   : > { %933 = vmatmul.mubr.msk.bf16.gmra.mrb[8].mxu0 %vm442_vm0, %v978_v18 }
  0x2c   : > { %529 = vmatprep.mubr.bf16.mxu0 %v1072_v1 }
  0x33   : > { %934 = vmatmul.mubr.msk.bf16.gmra.mrb[12].mxu0 %vm442_vm0, %v979_v23 }
  0x34   : > { %539 = vmatprep.mubr.bf16.mxu0 %v1072_v1 }
  0x3b   : > { %935 = vmatmul.mubr.msk.bf16.gmra.mrb[16].mxu0 %vm442_vm0, %v980_v27 }
  0x3c   : > { %549 = vmatprep.mubr.bf16.mxu0 %v1072_v1 }
  0x43   : > { %936 = vmatmul.mubr.msk.bf16.gmra.mrb[20].mxu0 %vm442_vm0, %v981_v28 }
  0x44   : > { %559 = vmatprep.mubr.bf16.mxu0 %v1072_v1 }
  0x4b   : > { %937 = vmatmul.mubr.msk.bf16.gmra.mrb[24].mxu0 %vm442_vm0, %v982_v29 }
  0x4c   : > { %569 = vmatprep.mubr.bf16.mxu0 %v1072_v1 }
  0x53   : > { %938 = vmatmul.mubr.msk.bf16.gmra.mrb[28].mxu0 %vm442_vm0, %v983_v30 }
  0x89   : > { %v305_v31 = vpop.permute.xlu0 %304  ;;  %v315_v42 = vpop.permute.xlu1 %314 }
  0x8d   : > { %v310_v35 = vpop.permute.xlu0 %309  ;;  %v320_v49 = vpop.permute.xlu1 %319 }
  0x91   : > { %v325_v61 = vpop.permute.xlu0 %324  ;;  %v330_v5 = vpop.permute.xlu1 %329 }
  0x95   : > { %v335_v28 = vpop.permute.xlu0 %334 }
  0xee   : > { %v501_v32 = vpop.f32.mrb[0].mxu0 }
  0xef   : > { %v502_v33 = vadd.f32 %v501_v32, %v305_v31  ;;  %v503_v34 = vpop.f32.mrb[1].mxu0 }
  0xf0   : > { %v504_v36 = vadd.f32 %v503_v34, %v305_v31  ;;  %v505_v37 = vpop.f32.mrb[2].mxu0 }
  0xf1   : > { %v612_v38 = vmul.f32 0.70710677, %v502_v33  ;;  %v506_v39 = vadd.f32 %v505_v37, %v310_v35  ;;  %v507_v40 = vpop.f32.mrb[3].mxu0  ;;  %v580_v15 = vmul.f32 0.5, %v502_v33 }
  0xf2   : > { %v613_v41 = vmul.f32 0.70710677, %v504_v36  ;;  %v508_v43 = vadd.f32 %v507_v40, %v310_v35  ;;  %v581_v4 = vmul.f32 0.5, %v504_v36 }
  0xf3   : > { %984 = verf.f32 %v612_v38  ;;  %v614_v44 = vmul.f32 0.70710677, %v506_v39  ;;  %v582_v16 = vmul.f32 0.5, %v506_v39 }
  0xf4   : > { %986 = verf.f32 %v613_v41  ;;  %v615_v45 = vmul.f32 0.70710677, %v508_v43  ;;  %v583_v10 = vmul.f32 0.5, %v508_v43 }
  0xf5   : > { %988 = verf.f32 %v614_v44 }
  0xf6   : > { %990 = verf.f32 %v615_v45  ;;  %v511_v46 = vpop.f32.mrb[4].mxu0  ;;  %v340_v45 = vpop.permute.xlu1 %339 }
  0xf7   : > { %v512_v47 = vadd.f32 %v511_v46, %v315_v42  ;;  %v513_v48 = vpop.f32.mrb[5].mxu0 }
  0xf8   : > { %v1222_v50 = vadd.f32 %v513_v48, %v315_v42  ;;  %v515_v51 = vpop.f32.mrb[6].mxu0 }
  0xf9   : > { %v616_v52 = vmul.f32 0.70710677, %v512_v47  ;;  %v516_v53 = vadd.f32 %v515_v51, %v320_v49  ;;  %v517_v54 = vpop.f32.mrb[7].mxu0  ;;  %v584_v37 = vmul.f32 0.5, %v512_v47 }
  0xfa   : > { %v617_v55 = vmul.f32 0.70710677, %v1222_v50  ;;  %v518_v56 = vadd.f32 %v517_v54, %v320_v49  ;;  %v585_v42 = vmul.f32 0.5, %v1222_v50 }
  0xfb   : > { %992 = verf.f32 %v616_v52  ;;  %v618_v57 = vmul.f32 0.70710677, %v516_v53  ;;  %v586_v38 = vmul.f32 0.5, %v516_v53 }
  0xfc   : > { %994 = verf.f32 %v617_v55  ;;  %v619_v58 = vmul.f32 0.70710677, %v518_v56  ;;  %v587_v43 = vmul.f32 0.5, %v518_v56 }
  0xfd   : > { %v985_v59 = vpop.eup %984  ;;  %996 = verf.f32 %v618_v57 }
  0xfe   : > { %v987_v60 = vpop.eup %986  ;;  %998 = verf.f32 %v619_v58  ;;  %v521_v62 = vpop.f32.mrb[8].mxu0  ;;  %v676_v8 = vadd.f32 1.0, %v985_v59 }
  0xff   : > { %v989_v63 = vpop.eup %988  ;;  %v1225_v0 = vadd.f32 %v521_v62, %v325_v61  ;;  %v523_v1 = vpop.f32.mrb[9].mxu0  ;;  %v677_v2 = vadd.f32 1.0, %v987_v60 }
 0x100   : > { %v991_v3 = vpop.eup %990  ;;  %v1227_v6 = vadd.f32 %v523_v1, %v325_v61  ;;  %v525_v7 = vpop.f32.mrb[10].mxu0  ;;  %v678_v9 = vadd.f32 1.0, %v989_v63  ;;  %v708_v23 = vmul.f32 %v676_v8, %v580_v15 }
 0x101   : > { %v620_v11 = vmul.f32 0.70710677, %v1225_v0  ;;  %v1230_v12 = vadd.f32 %v525_v7, %v330_v5  ;;  %v527_v13 = vpop.f32.mrb[11].mxu0  ;;  %v679_v14 = vadd.f32 1.0, %v991_v3  ;;  %v709_v20 = vmul.f32 %v677_v2, %v581_v4  ;;  %v345_v61 = vpop.permute.xlu0 %344 }
 0x102   : > { %v621_v17 = vmul.f32 0.70710677, %v1227_v6  ;;  %v1233_v18 = vadd.f32 %v527_v13, %v330_v5  ;;  %v710_v24 = vmul.f32 %v678_v9, %v582_v16  ;;  %v588_v7 = vmul.f32 0.5, %v1225_v0 }
 0x103   : > { %1000 = verf.f32 %v620_v11  ;;  %v622_v19 = vmul.f32 0.70710677, %v1230_v12  ;;  %v711_v21 = vmul.f32 %v679_v14, %v583_v10  ;;  %v590_v8 = vmul.f32 0.5, %v1230_v12  ;;  %v350_v14 = vpop.permute.xlu1 %349 }
 0x104   : > { %1002 = verf.f32 %v621_v17  ;;  %v623_v22 = vmul.f32 0.70710677, %v1233_v18  ;;  %v740_v31 = vpack.c.bf16 %v710_v24, %v708_v23  ;;  %v589_v13 = vmul.f32 0.5, %v1227_v6 }
 0x105   : > { %v993_v25 = vpop.eup %992  ;;  %1004 = verf.f32 %v622_v19  ;;  %v741_v26 = vpack.c.bf16 %v711_v21, %v709_v20  ;;  %v591_v15 = vmul.f32 0.5, %v1233_v18 }
 0x106   : > { %v995_v27 = vpop.eup %994  ;;  %v680_v29 = vadd.f32 1.0, %v993_v25  ;;  %1006 = verf.f32 %v623_v22  ;;  %v531_v30 = vpop.f32.mrb[12].mxu0 }
 0x107   : > { %v997_v32 = vpop.eup %996  ;;  %v681_v33 = vadd.f32 1.0, %v995_v27  ;;  %v1237_v34 = vadd.f32 %v531_v30, %v335_v28  ;;  %v533_v35 = vpop.f32.mrb[13].mxu0  ;;  %766 = vmatprep.subr.bf16.mxu1 %v741_v26 }
 0x108   : > { %v999_v36 = vpop.eup %998  ;;  %v682_v39 = vadd.f32 1.0, %v997_v32  ;;  %v1239_v40 = vadd.f32 %v533_v35, %v335_v28  ;;  %v535_v41 = vpop.f32.mrb[14].mxu0  ;;  %767 = vmatpush1.bf16.msra.mxu1 %v740_v31  ;;  %v712_v49 = vmul.f32 %v680_v29, %v584_v37 }
 0x109   : > { %v683_v44 = vadd.f32 1.0, %v999_v36  ;;  %v624_v46 = vmul.f32 0.70710677, %v1237_v34  ;;  %v537_v48 = vpop.f32.mrb[15].mxu0  ;;  %v1244_v54 = vadd.f32 %v535_v41, %v340_v45  ;;  %v713_v47 = vmul.f32 %v681_v33, %v585_v42  ;;  %v355_v29 = vpop.permute.xlu0 %354 }
 0x10a   : > { %v714_v51 = vmul.f32 %v682_v39, %v586_v38  ;;  %v625_v52 = vmul.f32 0.70710677, %v1239_v40  ;;  %v1246_v55 = vadd.f32 %v537_v48, %v340_v45  ;;  %v592_v36 = vmul.f32 0.5, %v1237_v34  ;;  %v360_v42 = vpop.permute.xlu1 %359 }
 0x10b   : > { %v715_v53 = vmul.f32 %v683_v44, %v587_v43  ;;  %1008 = verf.f32 %v624_v46  ;;  %v626_v50 = vmul.f32 0.70710677, %v1244_v54  ;;  %v593_v43 = vmul.f32 0.5, %v1239_v40 }
 0x10c   : > { %1010 = verf.f32 %v625_v52  ;;  %v742_v56 = vpack.c.bf16 %v714_v51, %v712_v49  ;;  %v627_v58 = vmul.f32 0.70710677, %v1246_v55  ;;  %v594_v44 = vmul.f32 0.5, %v1244_v54 }
 0x10d   : > { %v1001_v57 = vpop.eup %1000  ;;  %v743_v59 = vpack.c.bf16 %v715_v53, %v713_v47  ;;  %1012 = verf.f32 %v626_v50  ;;  %v595_v49 = vmul.f32 0.5, %v1246_v55 }
 0x10e   : > { %v1003_v60 = vpop.eup %1002  ;;  %v684_v62 = vadd.f32 1.0, %v1001_v57  ;;  %v541_v63 = vpop.f32.mrb[16].mxu0  ;;  %1014 = verf.f32 %v627_v58 }
 0x10f   : > { %v1005_v1 = vpop.eup %1004  ;;  %v685_v2 = vadd.f32 1.0, %v1003_v60  ;;  %v1250_v3 = vadd.f32 %v541_v63, %v345_v61  ;;  %v543_v4 = vpop.f32.mrb[17].mxu0  ;;  %768 = vmatprep.subr.bf16.mxu1 %v743_v59 }
 0x110   : > { %v1007_v5 = vpop.eup %1006  ;;  %v686_v9 = vadd.f32 1.0, %v1005_v1  ;;  %v1254_v10 = vadd.f32 %v543_v4, %v345_v61  ;;  %v545_v11 = vpop.f32.mrb[18].mxu0  ;;  %769 = vmatpush1.bf16.msra.mxu1 %v742_v56  ;;  %v716_v20 = vmul.f32 %v684_v62, %v588_v7 }
 0x111   : > { %v687_v16 = vadd.f32 1.0, %v1007_v5  ;;  %v628_v17 = vmul.f32 0.70710677, %v1250_v3  ;;  %v547_v19 = vpop.f32.mrb[19].mxu0  ;;  %v1260_v22 = vadd.f32 %v545_v11, %v350_v14  ;;  %v717_v12 = vmul.f32 %v685_v2, %v589_v13  ;;  %v365_v60 = vpop.permute.xlu0 %364 }
 0x112   : > { %v718_v21 = vmul.f32 %v686_v9, %v590_v8  ;;  %v629_v0 = vmul.f32 0.70710677, %v1254_v10  ;;  %v1262_v24 = vadd.f32 %v547_v19, %v350_v14  ;;  %v596_v5 = vmul.f32 0.5, %v1250_v3  ;;  %v370_v13 = vpop.permute.xlu1 %369 }
 0x113   : > { %v719_v23 = vmul.f32 %v687_v16, %v591_v15  ;;  %1016 = verf.f32 %v628_v17  ;;  %v630_v6 = vmul.f32 0.70710677, %v1260_v22  ;;  %v597_v14 = vmul.f32 0.5, %v1254_v10 }
 0x114   : > { %1018 = verf.f32 %v629_v0  ;;  %v744_v25 = vpack.c.bf16 %v718_v21, %v716_v20  ;;  %v631_v26 = vmul.f32 0.70710677, %v1262_v24  ;;  %v598_v15 = vmul.f32 0.5, %v1260_v22 }
 0x115   : > { %v1009_v18 = vpop.eup %1008  ;;  %v745_v27 = vpack.c.bf16 %v719_v23, %v717_v12  ;;  %1020 = verf.f32 %v630_v6  ;;  %v599_v20 = vmul.f32 0.5, %v1262_v24 }
 0x116   : > { %v1011_v28 = vpop.eup %1010  ;;  %v551_v30 = vpop.f32.mrb[20].mxu0  ;;  %v688_v31 = vadd.f32 1.0, %v1009_v18  ;;  %1022 = verf.f32 %v631_v26 }
 0x117   : > { %v1266_v32 = vadd.f32 %v551_v30, %v355_v29  ;;  %v553_v33 = vpop.f32.mrb[21].mxu0  ;;  %770 = vmatprep.subr.bf16.mxu1 %v745_v27  ;;  %v1013_v35 = vpop.eup %1012  ;;  %v689_v37 = vadd.f32 1.0, %v1011_v28 }
 0x118   : > { %v1269_v38 = vadd.f32 %v553_v33, %v355_v29  ;;  %v555_v39 = vpop.f32.mrb[22].mxu0  ;;  %771 = vmatpush1.bf16.msra.mxu1 %v744_v25  ;;  %v1015_v41 = vpop.eup %1014  ;;  %v690_v45 = vadd.f32 1.0, %v1013_v35  ;;  %v720_v47 = vmul.f32 %v688_v31, %v592_v36 }
 0x119   : > { %v632_v46 = vmul.f32 0.70710677, %v1266_v32  ;;  %v557_v48 = vpop.f32.mrb[23].mxu0  ;;  %v691_v51 = vadd.f32 1.0, %v1015_v41  ;;  %v1276_v52 = vadd.f32 %v555_v39, %v360_v42  ;;  %v721_v56 = vmul.f32 %v689_v37, %v593_v43  ;;  %v375_v29 = vpop.permute.xlu0 %374 }
 0x11a   : > { %v633_v34 = vmul.f32 0.70710677, %v1269_v38  ;;  %v722_v53 = vmul.f32 %v690_v45, %v594_v44  ;;  %v1278_v50 = vadd.f32 %v557_v48, %v360_v42  ;;  %v600_v37 = vmul.f32 0.5, %v1266_v32  ;;  %v380_v44 = vpop.permute.xlu1 %379 }
 0x11b   : > { %1024 = verf.f32 %v632_v46  ;;  %v723_v40 = vmul.f32 %v691_v51, %v595_v49  ;;  %v634_v54 = vmul.f32 0.70710677, %v1276_v52  ;;  %v601_v45 = vmul.f32 0.5, %v1269_v38 }
 0x11c   : > { %1026 = verf.f32 %v633_v34  ;;  %v635_v58 = vmul.f32 0.70710677, %v1278_v50  ;;  %v746_v59 = vpack.c.bf16 %v722_v53, %v720_v47  ;;  %v602_v46 = vmul.f32 0.5, %v1276_v52 }
 0x11d   : > { %v1017_v57 = vpop.eup %1016  ;;  %1028 = verf.f32 %v634_v54  ;;  %v747_v62 = vpack.c.bf16 %v723_v40, %v721_v56  ;;  %v603_v34 = vmul.f32 0.5, %v1278_v50 }
 0x11e   : > { %v1019_v55 = vpop.eup %1018  ;;  %v561_v61 = vpop.f32.mrb[24].mxu0  ;;  %v692_v63 = vadd.f32 1.0, %v1017_v57  ;;  %1030 = verf.f32 %v635_v58 }
 0x11f   : > { %v1282_v1 = vadd.f32 %v561_v61, %v365_v60  ;;  %v563_v2 = vpop.f32.mrb[25].mxu0  ;;  %v1021_v4 = vpop.eup %1020  ;;  %v693_v7 = vadd.f32 1.0, %v1019_v55  ;;  %772 = vmatprep.subr.bf16.mxu1 %v747_v62 }
 0x120   : > { %v1285_v8 = vadd.f32 %v563_v2, %v365_v60  ;;  %v565_v9 = vpop.f32.mrb[26].mxu0  ;;  %v1023_v11 = vpop.eup %1022  ;;  %v694_v16 = vadd.f32 1.0, %v1021_v4  ;;  %773 = vmatpush1.bf16.msra.mxu1 %v746_v59  ;;  %v724_v12 = vmul.f32 %v692_v63, %v596_v5 }
 0x121   : > { %v636_v17 = vmul.f32 0.70710677, %v1282_v1  ;;  %v567_v19 = vpop.f32.mrb[27].mxu0  ;;  %v695_v21 = vadd.f32 1.0, %v1023_v11  ;;  %v566_v0 = vadd.f32 %v565_v9, %v370_v13  ;;  %v725_v25 = vmul.f32 %v693_v7, %v597_v14 }
 0x122   : > { %v637_v3 = vmul.f32 0.70710677, %v1285_v8  ;;  %v726_v23 = vmul.f32 %v694_v16, %v598_v15  ;;  %v568_v6 = vadd.f32 %v567_v19, %v370_v13  ;;  %v604_v4 = vmul.f32 0.5, %v1282_v1 }
 0x123   : > { %1032 = verf.f32 %v636_v17  ;;  %v727_v18 = vmul.f32 %v695_v21, %v599_v20  ;;  %v638_v10 = vmul.f32 0.70710677, %v566_v0  ;;  %v606_v5 = vmul.f32 0.5, %v566_v0 }
 0x124   : > { %1034 = verf.f32 %v637_v3  ;;  %v639_v26 = vmul.f32 0.70710677, %v568_v6  ;;  %v748_v27 = vpack.c.bf16 %v726_v23, %v724_v12  ;;  %v605_v9 = vmul.f32 0.5, %v1285_v8 }
 0x125   : > { %v1025_v22 = vpop.eup %1024  ;;  %1036 = verf.f32 %v638_v10  ;;  %v749_v24 = vpack.c.bf16 %v727_v18, %v725_v25  ;;  %v607_v11 = vmul.f32 0.5, %v568_v6 }
 0x126   : > { %v1027_v28 = vpop.eup %1026  ;;  %v571_v30 = vpop.f32.mrb[28].mxu0  ;;  %v696_v31 = vadd.f32 1.0, %v1025_v22  ;;  %1038 = verf.f32 %v639_v26 }
 0x127   : > { %v572_v33 = vadd.f32 %v571_v30, %v375_v29  ;;  %v573_v35 = vpop.f32.mrb[29].mxu0  ;;  %v1029_v36 = vpop.eup %1028  ;;  %v697_v39 = vadd.f32 1.0, %v1027_v28  ;;  %774 = vmatprep.subr.bf16.mxu1 %v749_v24 }
 0x128   : > { %v574_v41 = vadd.f32 %v573_v35, %v375_v29  ;;  %v575_v42 = vpop.f32.mrb[30].mxu0  ;;  %v1031_v43 = vpop.eup %1030  ;;  %v698_v48 = vadd.f32 1.0, %v1029_v36  ;;  %775 = vmatpush1.bf16.msra.mxu1 %v748_v27  ;;  %v728_v32 = vmul.f32 %v696_v31, %v600_v37  ;;  %v281_v31 = vld [vmem:[%s1317_s3] sm:$0x1]  ;;  %v1073_v36 = vmov 1966171168  }
 0x129   : > { %v640_v49 = vmul.f32 0.70710677, %v572_v33  ;;  %v577_v51 = vpop.f32.mrb[31].mxu0  ;;  %v699_v47 = vadd.f32 1.0, %v1031_v43  ;;  %v576_v56 = vadd.f32 %v575_v42, %v380_v44  ;;  %v729_v57 = vmul.f32 %v697_v39, %v601_v45 }
 0x12a   : > { %v641_v53 = vmul.f32 0.70710677, %v574_v41  ;;  %v730_v40 = vmul.f32 %v698_v48, %v602_v46  ;;  %v578_v54 = vadd.f32 %v577_v51, %v380_v44  ;;  %v608_v0 = vmul.f32 0.5, %v572_v33 }
 0x12b   : > { %1040 = verf.f32 %v640_v49  ;;  %v731_v58 = vmul.f32 %v699_v47, %v603_v34  ;;  %v642_v59 = vmul.f32 0.70710677, %v576_v56  ;;  %v610_v18 = vmul.f32 0.5, %v576_v56 }
 0x12c   : > { %1042 = verf.f32 %v641_v53  ;;  %v643_v55 = vmul.f32 0.70710677, %v578_v54  ;;  %v750_v52 = vpack.c.bf16 %v730_v40, %v728_v32  ;;  %v609_v8 = vmul.f32 0.5, %v574_v41  ;;  %v760_v41 = vpop.permute.xlu0 %759 }
 0x12d   : > { %v1033_v38 = vpop.eup %1032  ;;  %1044 = verf.f32 %v642_v59  ;;  %v751_v61 = vpack.c.bf16 %v731_v58, %v729_v57  ;;  %v611_v6 = vmul.f32 0.5, %v578_v54  ;;  %v762_v33 = vlaneseq }
 0x12e   : > { %v1035_v60 = vpop.eup %1034  ;;  %v700_v62 = vadd.f32 1.0, %v1033_v38  ;;  %1046 = verf.f32 %v643_v55  ;;  %v811_v37 = vunpack.c.l.s4 %v1073_v36 }
 0x12f   : > { %v1037_v50 = vpop.eup %1036  ;;  %v701_v63 = vadd.f32 1.0, %v1035_v60  ;;  %776 = vmatprep.subr.bf16.mxu1 %v751_v61  ;;  %v763_v35 = vshrl.u32 %v762_v33, 7  ;;  %vm827_vm1 = vcmp.lt.s32.totalorder %v762_v33, 256 }
 0x130   : > { %v1039_v2 = vpop.eup %1038  ;;  %v702_v7 = vadd.f32 1.0, %v1037_v50  ;;  %777 = vmatpush1.bf16.msra.mxu1 %v750_v52  ;;  %v732_v14 = vmul.f32 %v700_v62, %v604_v4  ;;  %v812_v42 = vunpack.c.0.s8 %v811_v37 }
 0x131   : > { %v703_v13 = vadd.f32 1.0, %v1039_v2  ;;  %v733_v16 = vmul.f32 %v701_v63, %v605_v9  ;;  %v764_v39 = vsub.s32 0, %v763_v35 }
 0x132   : > { %v734_v15 = vmul.f32 %v702_v7, %v606_v5  ;;  %v815_v49 = vsub.s32 %v812_v42, %v763_v35 }
 0x133   : > { %v735_v17 = vmul.f32 %v703_v13, %v607_v11  ;;  %v765_v43 = vrot.slane %v760_v41, %v764_v39 }
 0x134   : > { %v752_v20 = vpack.c.bf16 %v734_v15, %v732_v14 }
 0x135   : > { %v1041_v19 = vpop.eup %1040  ;;  %v753_v3 = vpack.c.bf16 %v735_v17, %v733_v16 }
 0x136   : > { %v1043_v21 = vpop.eup %1042  ;;  %v704_v12 = vadd.f32 1.0, %v1041_v19 }
 0x137   : > { %v1045_v23 = vpop.eup %1044  ;;  %v705_v25 = vadd.f32 1.0, %v1043_v21  ;;  %778 = vmatprep.subr.bf16.mxu1 %v753_v3 }
 0x138   : > { %v1047_v1 = vpop.eup %1046  ;;  %v706_v10 = vadd.f32 1.0, %v1045_v23  ;;  %779 = vmatpush1.bf16.msra.mxu1 %v752_v20  ;;  %v736_v26 = vmul.f32 %v704_v12, %v608_v0 }
 0x139   : > { %v707_v22 = vadd.f32 1.0, %v1047_v1  ;;  %v737_v28 = vmul.f32 %v705_v25, %v609_v8 }
 0x13a   : > { %v738_v27 = vmul.f32 %v706_v10, %v610_v18 }
 0x13b   : > { %v739_v29 = vmul.f32 %v707_v22, %v611_v6 }
 0x13c   : > { %v754_v30 = vpack.c.bf16 %v738_v27, %v736_v26 }
 0x13d   : > { %v755_v24 = vpack.c.bf16 %v739_v29, %v737_v28 }
 0x13f   : > { %780 = vmatprep.subr.bf16.mxu1 %v755_v24 }
 0x140   : > { %781 = vmatpush1.bf16.msra.mxu1 %v754_v30 }
 0x143   : > { %799 = vmatmul.mubr.bf16.vlgmr.msra.gmra.mrb[0].mxu1 %v281_v31 }
 0x216   : > { %v800_v44 = vpop.f32.mrb[0].mxu1 }
 0x217   : > { %v801_v45 = vadd.f32 %v800_v44, %v765_v43  ;;  %v802_v46 = vpop.f32.mrb[1].mxu1 }
 0x218   : > { %v803_v48 = vadd.f32 %v802_v46, %v765_v43  ;;  %v804_v51 = vpop.f32.mrb[2].mxu1 }
 0x219   : > { %v805_v34 = vpop.f32.mrb[3].mxu1 }
 0x21a   : > { %v809_v47 = vcombine.low %v801_v45, %v803_v48 }
 0x21c   : > { %v816_v53 = vrot.slane %v809_v47, %v815_v49 }
 0x21e   : > { %v823_v56 = vrot.slane %v816_v53, %v815_v49 }
 0x220   : > { %829 = vst.msk [vmem:[%s262_s11] sm:$0x3] %vm827_vm1, %v823_v56 }
 0x221 PF: > { %s17_s22 = sadd.s32 1, %s1070_s22   ;;  %s1320_s20 = smov %s1066_s21 }
 0x222   : > { %p14_p5 = scmp.ge.s32.totalorder %s17_s22, 4   ;;  %s1321_s21 = smov %s1323_s4 }
 0x224   :  { %16 = sbr.rel (!%p14_p5) target bundleno = 3 (0x3), region = 70 }

</bundles_post_ra>
